<compile_context>
chip_gen: v7x
topology: tpu7x:2x2x1
jax: 0.10.0
libtpu: 0.0.40
codegen_flags: <defaults>
</compile_context>

<pallas_src>
import functools
import math

import jax
import jax.numpy as jnp
from jax.experimental import pallas as pl
from jax.experimental.pallas import tpu as pltpu

_SQRT_2_OVER_PI = 0.7978845608028654
_GELU_C2 = 0.044715 * _SQRT_2_OVER_PI


def _gelu_tanh(h):
    """tanh-approx GELU (torch.nn.GELU(approximate='tanh')), constants folded, f32."""
    t = jnp.tanh(h * (_SQRT_2_OVER_PI + _GELU_C2 * (h * h)))
    return 0.5 * h * (1.0 + t)


def _pick_tile(requested, total, multiple):
    """Largest tile <= requested that divides `total` and is a multiple of `multiple`."""
    t = min(requested, total)
    t = max((t // multiple) * multiple, multiple)
    while total % t:
        t -= multiple
    return t


# ---------------------------------------------------------------------------
# Weight-resident kernel: grid = (grid_m,).  Weights are DMA'd once and reused
# across all row tiles; the hidden dim is walked in static th sub-chunks so
# the f32 temporaries stay (tm, th)-sized.
# ---------------------------------------------------------------------------
def _mlp_resident_kernel(x_ref, wfc_ref, bfc_ref, wproj_ref, bproj_ref, o_ref, *, th):
    x = x_ref[...]                                   # (tm, C) native dtype
    tm = x.shape[0]
    H = wfc_ref.shape[1]
    C_out = wproj_ref.shape[1]

    acc = jnp.zeros((tm, C_out), jnp.float32)
    for j in range(H // th):                         # static, unrolled
        sl = pl.ds(j * th, th)
        h = jnp.dot(x, wfc_ref[:, sl], preferred_element_type=jnp.float32)
        h = h + bfc_ref[:, sl].astype(jnp.float32)
        g = _gelu_tanh(h)
        acc = acc + jnp.dot(g.astype(wproj_ref.dtype), wproj_ref[sl, :],
                            preferred_element_type=jnp.float32)

    o_ref[...] = (acc + bproj_ref[...].astype(jnp.float32)).astype(o_ref.dtype)


# ---------------------------------------------------------------------------
# Streamed kernel: grid = (grid_m, grid_h), reduction axis last, f32 VMEM
# accumulator; used when the weights do not fit the VMEM budget.
# ---------------------------------------------------------------------------
def _mlp_streamed_kernel(x_ref, wfc_ref, bfc_ref, wproj_ref, bproj_ref, o_ref, acc_ref):
    j = pl.program_id(1)

    @pl.when(j == 0)
    def _():
        acc_ref[...] = jnp.zeros_like(acc_ref)

    h = jnp.dot(x_ref[...], wfc_ref[...], preferred_element_type=jnp.float32)
    h = h + bfc_ref[...].astype(jnp.float32)
    g = _gelu_tanh(h)
    acc_ref[...] += jnp.dot(g.astype(wproj_ref.dtype), wproj_ref[...],
                            preferred_element_type=jnp.float32)

    @pl.when(j == pl.num_programs(1) - 1)
    def _():
        o_ref[...] = (acc_ref[...]
                      + bproj_ref[...].astype(jnp.float32)).astype(o_ref.dtype)


def mlp_pallas(x, w_fc, b_fc, w_proj, b_proj, *, tm=None, th=None, weight_resident=None):
    """Fused GPT MLP. x: (B,T,C); w_fc: (C,H); b_fc: (H,); w_proj: (H,C); b_proj: (C,)."""
    B, T, C = x.shape
    H = w_fc.shape[1]
    M = B * T
    # TODO(synk): pad / mask for shapes where M, C, H are not tile-aligned.
    assert C % 128 == 0 and H % 128 == 0 and M % 8 == 0, "lane/sublane alignment"
    itemsize = jnp.dtype(x.dtype).itemsize

    # Generation-aware VMEM budget (v5e/v6e: 128 MiB, v7x: 64 MiB per TC).
    try:
        vmem_cap = int(pltpu.get_tpu_info().vmem_capacity_bytes)
    except Exception:
        vmem_cap = 64 * 1024 * 1024          # conservative fallback, safe on all gens
    vmem_budget = int(vmem_cap * 0.85)       # leave headroom for compiler scratch

    # Defaults clear the v7x roofline knee (~310 flops/byte) even in streamed
    # mode and fill the 256-wide MXU on v6e/v7x.
    tm = _pick_tile(tm if tm is not None else 512, M, 8)
    th = _pick_tile(th if th is not None else 1024, H, 128)

    x2 = x.reshape(M, C)
    b_fc2 = b_fc.reshape(1, H)
    b_proj2 = b_proj.reshape(1, C)

    # Conservative footprint: weights/bias counted double-buffered, x + out
    # double-buffered, f32 accumulator + ~3 live (tm, th) f32 GELU temporaries.
    weight_bytes = 2 * (C * H + H * C + H + C) * itemsize
    slack = 4 << 20

    def resident_footprint(tm_, th_):
        return (weight_bytes
                + 4 * tm_ * C * itemsize
                + 4 * (3 * tm_ * th_ + tm_ * C)
                + slack)

    def streamed_footprint(tm_, th_):
        return (2 * (tm_ * C + C * th_ + th_ + th_ * C + C + tm_ * C) * itemsize
                + 4 * (tm_ * C + 3 * tm_ * th_)
                + slack)

    if weight_resident is None:
        weight_resident = resident_footprint(tm, th) <= vmem_budget

    grid_m = M // tm

    if weight_resident:
        cost = pl.CostEstimate(
            flops=4 * M * C * H,
            transcendentals=M * H,
            bytes_accessed=(2 * M * C + 2 * C * H + H + C) * itemsize,
        )
        out = pl.pallas_call(
            functools.partial(_mlp_resident_kernel, th=th),
            out_shape=jax.ShapeDtypeStruct((M, C), x.dtype),
            grid_spec=pltpu.PrefetchScalarGridSpec(
                num_scalar_prefetch=0,
                grid=(grid_m,),
                in_specs=[
                    pl.BlockSpec((tm, C), lambda i: (i, 0)),   # x row tile
                    pl.BlockSpec((C, H), lambda i: (0, 0)),    # W_fc, resident
                    pl.BlockSpec((1, H), lambda i: (0, 0)),    # b_fc, resident
                    pl.BlockSpec((H, C), lambda i: (0, 0)),    # W_proj, resident
                    pl.BlockSpec((1, C), lambda i: (0, 0)),    # b_proj, resident
                ],
                out_specs=pl.BlockSpec((tm, C), lambda i: (i, 0)),
            ),
            compiler_params=pltpu.CompilerParams(
                dimension_semantics=("parallel",),
                vmem_limit_bytes=min(max(resident_footprint(tm, th), 32 << 20),
                                     vmem_budget),
            ),
            cost_estimate=cost,
        )(x2, w_fc, b_fc2, w_proj, b_proj2)
    else:
        grid_h = H // th
        cost = pl.CostEstimate(
            flops=4 * M * C * H,
            transcendentals=M * H,
            bytes_accessed=(2 * M * C + grid_m * (2 * C * H + H) + C) * itemsize,
        )
        out = pl.pallas_call(
            _mlp_streamed_kernel,
            out_shape=jax.ShapeDtypeStruct((M, C), x.dtype),
            grid_spec=pltpu.PrefetchScalarGridSpec(
                num_scalar_prefetch=0,
                grid=(grid_m, grid_h),                            # reduction axis last
                in_specs=[
                    pl.BlockSpec((tm, C), lambda i, j: (i, 0)),   # x row tile
                    pl.BlockSpec((C, th), lambda i, j: (0, j)),   # W_fc H-slice
                    pl.BlockSpec((1, th), lambda i, j: (0, j)),   # b_fc H-slice
                    pl.BlockSpec((th, C), lambda i, j: (j, 0)),   # W_proj H-slice
                    pl.BlockSpec((1, C), lambda i, j: (0, 0)),    # b_proj
                ],
                out_specs=pl.BlockSpec((tm, C), lambda i, j: (i, 0)),
                scratch_shapes=[pltpu.VMEM((tm, C), jnp.float32)],
            ),
            compiler_params=pltpu.CompilerParams(
                dimension_semantics=("parallel", "arbitrary"),
                vmem_limit_bytes=min(max(streamed_footprint(tm, th), 32 << 20),
                                     vmem_budget),
            ),
            cost_estimate=cost,
        )(x2, w_fc, b_fc2, w_proj, b_proj2)

    return out.reshape(B, T, C)


def mlp_reference(x, w_fc, b_fc, w_proj, b_proj):
    xf = x.astype(jnp.float32)
    h = xf @ w_fc.astype(jnp.float32) + b_fc.astype(jnp.float32)
    k = math.sqrt(2.0 / math.pi)
    g = 0.5 * h * (1.0 + jnp.tanh(k * (h + 0.044715 * h ** 3)))
    return g @ w_proj.astype(jnp.float32) + b_proj.astype(jnp.float32)


if __name__ == "__main__":
    # TODO(synk): embeddings, causal self-attention, LayerNorms and the lm_head of
    # the full GPT forward are left to stock XLA; this kernel covers Block.mlp.
    n_embd = 128            # lane-aligned small config (GPT-2 uses 768 = 6*128)
    hidden = 4 * n_embd
    B, T = 2, 128

    key = jax.random.PRNGKey(0)
    kx, k1, k2, k3, k4 = jax.random.split(key, 5)

    dtype = jnp.bfloat16    # MXU-native operand dtype
    x = jax.random.normal(kx, (B, T, n_embd), dtype=jnp.float32).astype(dtype)
    w_fc = (jax.random.normal(k1, (n_embd, hidden), jnp.float32) * 0.02).astype(dtype)
    b_fc = (jax.random.normal(k2, (hidden,), jnp.float32) * 0.02).astype(dtype)
    w_proj = (jax.random.normal(k3, (hidden, n_embd), jnp.float32) * 0.02).astype(dtype)
    b_proj = (jax.random.normal(k4, (n_embd,), jnp.float32) * 0.02).astype(dtype)

    ref = mlp_reference(x, w_fc, b_fc, w_proj, b_proj)

    # Weight-resident path (the production fast path for GPT-2-sized weights).
    out_res = jax.block_until_ready(
        mlp_pallas(x, w_fc, b_fc, w_proj, b_proj, weight_resident=True))
    assert out_res.shape == (B, T, n_embd) and out_res.dtype == dtype
    assert jnp.allclose(out_res.astype(jnp.float32), ref, atol=2e-2, rtol=2e-2), (
        float(jnp.max(jnp.abs(out_res.astype(jnp.float32) - ref))))

    # Streamed-reduction path with small tiles so the accumulator init/finalize
    # and multi-step grid (2x2) are exercised too.
    out_str = jax.block_until_ready(
        mlp_pallas(x, w_fc, b_fc, w_proj, b_proj,
                   tm=128, th=256, weight_resident=False))
    assert out_str.shape == (B, T, n_embd) and out_str.dtype == dtype
    assert jnp.allclose(out_str.astype(jnp.float32), ref, atol=2e-2, rtol=2e-2), (
        float(jnp.max(jnp.abs(out_str.astype(jnp.float32) - ref))))

    print("KERNEL_OK")
</pallas_src>

<mosaic_0001>
module attributes {stable_mosaic.version = 11 : i64} {
  func.func @_mlp_resident_kernel(%arg0: i32, %arg1: memref<256x128xbf16, #tpu.memory_space<vmem>>, %arg2: memref<128x512xbf16, #tpu.memory_space<vmem>>, %arg3: memref<1x512xbf16, #tpu.memory_space<vmem>>, %arg4: memref<512x128xbf16, #tpu.memory_space<vmem>>, %arg5: memref<1x128xbf16, #tpu.memory_space<vmem>>, %arg6: memref<256x128xbf16, #tpu.memory_space<vmem>>) attributes {dimension_semantics = [#tpu.dimension_semantics<parallel>], iteration_bounds = array<i64: 1>, scalar_prefetch = 0 : i64, scratch_operands = 0 : i64, tpu.core_type = #tpu.core_type<tc>, window_params = [{transform_indices = @transform_0, window_bounds = array<i64: 256, 128>}, {pipeline_mode = #tpu.pipeline_mode<synchronous>, transform_indices = @transform_1, window_bounds = array<i64: 128, 512>}, {pipeline_mode = #tpu.pipeline_mode<synchronous>, transform_indices = @transform_2, window_bounds = array<i64: 1, 512>}, {pipeline_mode = #tpu.pipeline_mode<synchronous>, transform_indices = @transform_3, window_bounds = array<i64: 512, 128>}, {pipeline_mode = #tpu.pipeline_mode<synchronous>, transform_indices = @transform_4, window_bounds = array<i64: 1, 128>}, {transform_indices = @transform_5, window_bounds = array<i64: 256, 128>}]} {
    %c0 = arith.constant 0 : index
    %c0_0 = arith.constant 0 : index
    %0 = vector.load %arg1[%c0, %c0_0] : memref<256x128xbf16, #tpu.memory_space<vmem>>, vector<256x128xbf16>
    %cst = arith.constant 0.000000e+00 : f32
    %1 = vector.broadcast %cst : f32 to vector<256x128xf32>
    %c0_1 = arith.constant 0 : index
    %c0_2 = arith.constant 0 : index
    %2 = vector.load %arg2[%c0_1, %c0_2] : memref<128x512xbf16, #tpu.memory_space<vmem>>, vector<128x512xbf16>
    %cst_3 = arith.constant dense<0.000000e+00> : vector<256x512xf32>
    %3 = tpu.matmul %0, %2, %cst_3 {dimension_numbers = #tpu.dot_dimension_numbers<[1], [0], [0], [1], [0, 0, 1, 1], [], []>} : vector<256x128xbf16>, vector<128x512xbf16>, vector<256x512xf32> -> vector<256x512xf32>
    %c0_4 = arith.constant 0 : index
    %c0_5 = arith.constant 0 : index
    %4 = vector.load %arg3[%c0_4, %c0_5] : memref<1x512xbf16, #tpu.memory_space<vmem>>, vector<1x512xbf16>
    %5 = arith.extf %4 : vector<1x512xbf16> to vector<1x512xf32>
    %6 = vector.broadcast %5 : vector<1x512xf32> to vector<256x512xf32>
    %7 = arith.addf %3, %6 : vector<256x512xf32>
    %8 = arith.mulf %7, %7 : vector<256x512xf32>
    %cst_6 = arith.constant 0.0356774069 : f32
    %9 = vector.broadcast %cst_6 : f32 to vector<256x512xf32>
    %10 = arith.mulf %9, %8 : vector<256x512xf32>
    %cst_7 = arith.constant 0.797884583 : f32
    %11 = vector.broadcast %cst_7 : f32 to vector<256x512xf32>
    %12 = arith.addf %11, %10 : vector<256x512xf32>
    %13 = arith.mulf %7, %12 : vector<256x512xf32>
    %14 = math.tanh %13 : vector<256x512xf32>
    %cst_8 = arith.constant 5.000000e-01 : f32
    %15 = vector.broadcast %cst_8 : f32 to vector<256x512xf32>
    %16 = arith.mulf %15, %7 : vector<256x512xf32>
    %cst_9 = arith.constant 1.000000e+00 : f32
    %17 = vector.broadcast %cst_9 : f32 to vector<256x512xf32>
    %18 = arith.addf %17, %14 : vector<256x512xf32>
    %19 = arith.mulf %16, %18 : vector<256x512xf32>
    %20 = arith.truncf %19 : vector<256x512xf32> to vector<256x512xbf16>
    %c0_10 = arith.constant 0 : index
    %c0_11 = arith.constant 0 : index
    %21 = vector.load %arg4[%c0_10, %c0_11] : memref<512x128xbf16, #tpu.memory_space<vmem>>, vector<512x128xbf16>
    %cst_12 = arith.constant dense<0.000000e+00> : vector<256x128xf32>
    %22 = tpu.matmul %20, %21, %cst_12 {dimension_numbers = #tpu.dot_dimension_numbers<[1], [0], [0], [1], [0, 0, 1, 1], [], []>} : vector<256x512xbf16>, vector<512x128xbf16>, vector<256x128xf32> -> vector<256x128xf32>
    %23 = arith.addf %1, %22 : vector<256x128xf32>
    %c0_13 = arith.constant 0 : index
    %c0_14 = arith.constant 0 : index
    %24 = vector.load %arg5[%c0_13, %c0_14] : memref<1x128xbf16, #tpu.memory_space<vmem>>, vector<1x128xbf16>
    %25 = arith.extf %24 : vector<1x128xbf16> to vector<1x128xf32>
    %26 = vector.broadcast %25 : vector<1x128xf32> to vector<256x128xf32>
    %27 = arith.addf %23, %26 : vector<256x128xf32>
    %28 = arith.truncf %27 : vector<256x128xf32> to vector<256x128xbf16>
    %c0_15 = arith.constant 0 : index
    %c0_16 = arith.constant 0 : index
    %29 = vector.load %arg6[%c0_15, %c0_16] : memref<256x128xbf16, #tpu.memory_space<vmem>>, vector<256x128xbf16>
    tpu.vector_store %arg6[%c0_15, %c0_16], %28 {strides = array<i32>} : memref<256x128xbf16, #tpu.memory_space<vmem>>, vector<256x128xbf16>,
    return
  }
  func.func @transform_0(%arg0: i32) -> (i32, i32) {
    %c0_i32 = arith.constant 0 : i32
    %c0_i32_0 = arith.constant 0 : i32
    return %arg0, %c0_i32 : i32, i32
  }
  func.func @transform_1(%arg0: i32) -> (i32, i32) {
    %c0_i32 = arith.constant 0 : i32
    %c0_i32_0 = arith.constant 0 : i32
    %c0_i32_1 = arith.constant 0 : i32
    return %c0_i32, %c0_i32_0 : i32, i32
  }
  func.func @transform_2(%arg0: i32) -> (i32, i32) {
    %c0_i32 = arith.constant 0 : i32
    %c0_i32_0 = arith.constant 0 : i32
    %c0_i32_1 = arith.constant 0 : i32
    return %c0_i32, %c0_i32_0 : i32, i32
  }
  func.func @transform_3(%arg0: i32) -> (i32, i32) {
    %c0_i32 = arith.constant 0 : i32
    %c0_i32_0 = arith.constant 0 : i32
    %c0_i32_1 = arith.constant 0 : i32
    return %c0_i32, %c0_i32_0 : i32, i32
  }
  func.func @transform_4(%arg0: i32) -> (i32, i32) {
    %c0_i32 = arith.constant 0 : i32
    %c0_i32_0 = arith.constant 0 : i32
    %c0_i32_1 = arith.constant 0 : i32
    return %c0_i32, %c0_i32_0 : i32, i32
  }
  func.func @transform_5(%arg0: i32) -> (i32, i32) {
    %c0_i32 = arith.constant 0 : i32
    %c0_i32_0 = arith.constant 0 : i32
    return %arg0, %c0_i32 : i32, i32
  }
}

</mosaic_0001>

<bundles_post_ra>
// kernel: tpu_custom_call.1
= control target key start
LH: loop header
LB: loop body
LE: loop exit
PB: predicated region body
PF: predicated region fallthrough
CT: control target
= control target key end

     0   :  { %10 = vsyncpa [#allocation3], 0  ;;  %s5007_s0 = inlined_call_operand.hbm [shape: bf16[256,128], index: 0, kind: input, shape index: {}]   ;;  %s5008_s1 = inlined_call_operand.hbm [shape: bf16[128,512], index: 1, kind: input, shape index: {}]   ;;  %s5009_s2 = inlined_call_operand.vmem [shape: bf16[1,512], index: 2, kind: input, shape index: {}]   ;;  %s5010_s3 = inlined_call_operand.hbm [shape: bf16[512,128], index: 3, kind: input, shape index: {}]   ;;  %s5011_s4 = inlined_call_operand.vmem [shape: bf16[1,128], index: 4, kind: input, shape index: {}]   ;;  %s5012_s5 = inlined_call_operand.hbm [shape: bf16[256,128], index: 5, kind: output, shape index: {}]  }
   0x1   :  { %11 = vsyncpa [#allocation6], 0 }
   0x2   :  { %12 = vsyncpa [#allocation4], 0  ;;  %s3576_s18 = smov [#allocation5]   ;;  %s3482_s22 = scalar_lea.hbm %s5008_s1, 4096 }
   0x3   :  { %s30_s19 = sshll.u32 %s3576_s18, 4  ;;  %p3483_p0 = scmp.ne.s32.totalorder %s5008_s1, %s3482_s22  ;;  %s31_s19 = int_to_ptr.vmem [resolvable:$true] %s30_s19 }
   0x4   :  { %p3486_p1 = scmp.lt.u32.totalorder %s3482_s22, %s5008_s1 }
   0x6   :  { %p3488_p2 = pnand %p3486_p1, %p3483_p0 }
   0x8   :  { %3491 = shalt.err (!%p3488_p2)
}
   0x9   :  { %s3492_s27 = scalar_lea.vmem %s31_s19, 4096  ;;  %p3497_p4 = scmp.lt.s32.totalorder %s31_s19, %s31_s19 }
   0xa   :  { %p3493_p3 = scmp.ne.s32.totalorder %s31_s19, %s3492_s27  ;;  %p3498_p5 = scmp.lt.s32.totalorder %s3492_s27, %s3492_s27 }
   0xc   :  { %p3499_p6 = por %p3498_p5, %p3497_p4 }
   0xe   :  { %p3500_p7 = pnand %p3499_p6, %p3493_p3 }
  0x10   :  { %3503 = shalt.err (!%p3500_p7)
}
  0x11   :  { %s3577_s28 = smov 256   ;;  %s3578_s29 = smov 16  }
  0x12   :  { %36 = dma.hbm_to_vmem [thread:$0]  %s5008_s1, 4096, %s31_s19, [#allocation6], %s3577_s28, %s3577_s28, %s3578_s29  }
  0x13   :  { %s3579_s7 = smov [#allocation2]   ;;  %s3504_s11 = scalar_lea.hbm %s5007_s0, 2048 }
  0x14   :  { %s18_s8 = sshll.u32 %s3579_s7, 4  ;;  %p3505_p8 = scmp.ne.s32.totalorder %s5007_s0, %s3504_s11  ;;  %s19_s8 = int_to_ptr.vmem [resolvable:$true] %s18_s8 }
  0x15   :  { %p3508_p9 = scmp.lt.u32.totalorder %s3504_s11, %s5007_s0 }
  0x17   :  { %p3510_p10 = pnand %p3508_p9, %p3505_p8 }
  0x19   :  { %3513 = shalt.err (!%p3510_p10)
}
  0x1a   :  { %s3514_s16 = scalar_lea.vmem %s19_s8, 2048  ;;  %p3519_p12 = scmp.lt.s32.totalorder %s19_s8, %s19_s8 }
  0x1b   :  { %p3515_p11 = scmp.ne.s32.totalorder %s19_s8, %s3514_s16  ;;  %p3520_p13 = scmp.lt.s32.totalorder %s3514_s16, %s3514_s16 }
  0x1d   :  { %p3521_p0 = por %p3520_p13, %p3519_p12 }
  0x1f   :  { %p3522_p1 = pnand %p3521_p0, %p3515_p11 }
  0x21   :  { %3525 = shalt.err (!%p3522_p1)
}
  0x22   :  { %s3580_s1 = smov 64   ;;  %s3581_s17 = smov 4  }
  0x23   :  { %24 = dma.hbm_to_vmem [thread:$0]  %s5007_s0, 2048, %s19_s8, [#allocation3], %s3580_s1, %s3580_s1, %s3581_s17  }
  0x24   :  { %s3582_s20 = smov [#allocation7]   ;;  %s3526_s24 = scalar_lea.hbm %s5010_s3, 4096 }
  0x25   :  { %s44_s21 = sshll.u32 %s3582_s20, 4  ;;  %p3527_p2 = scmp.ne.s32.totalorder %s5010_s3, %s3526_s24  ;;  %s45_s21 = int_to_ptr.vmem [resolvable:$true] %s44_s21 }
  0x26   :  { %p3530_p3 = scmp.lt.u32.totalorder %s3526_s24, %s5010_s3 }
  0x28   :  { %p3532_p4 = pnand %p3530_p3, %p3527_p2 }
  0x2a   :  { %3535 = shalt.err (!%p3532_p4)
}
  0x2b   :  { %s3536_s29 = scalar_lea.vmem %s45_s21, 4096  ;;  %p3541_p6 = scmp.lt.s32.totalorder %s45_s21, %s45_s21 }
  0x2c   :  { %p3537_p5 = scmp.ne.s32.totalorder %s45_s21, %s3536_s29  ;;  %p3542_p7 = scmp.lt.s32.totalorder %s3536_s29, %s3536_s29 }
  0x2e   :  { %p3543_p8 = por %p3542_p7, %p3541_p6 }
  0x30   :  { %p3544_p9 = pnand %p3543_p8, %p3537_p5 }
  0x32   :  { %3547 = shalt.err (!%p3544_p9)
}
  0x33   :  { %50 = dma.hbm_to_vmem [thread:$0]  %s5010_s3, 4096, %s45_s21, [#allocation6], %s3580_s1, %s3580_s1, %s3581_s17  }
  0x34   :  { %3570 = dma.done.wait [#allocation3], 2048  }
  0x35   :  { %3571 = vsyncadd [#allocation3], 4294965248 }
  0x36   :  { %3572 = dma.done.wait [#allocation6], 8192  }
  0x37   :  { %3573 = vsyncadd [#allocation6], 4294959104  ;;  %v3583_v0 = vmov 0   ;;  %v3130_v1 = vld [vmem:[#allocation5 + $0x4] ss:$16 sps:$4 sm:$0xff]   ;;  %v3179_v34 = vld [vmem:[#allocation2 + $0x8] sm:$0xff]  }
  0x38   :  { %454 = vmatprep.mubr.bf16.mxu0 %v3583_v0  ;;  %647 = vmatprep.mubr.bf16.mxu1 %v3583_v0  ;;  %v3132_v2 = vld [vmem:[#allocation5 + $0xc] ss:$16 sps:$4 sm:$0xff]   ;;  %v3134_v3 = vld [vmem:[#allocation5] ss:$16 sps:$4 sm:$0xff]   ;;  %v3135_v4 = vld [vmem:[#allocation5 + $0x8] ss:$16 sps:$4 sm:$0xff]  }
  0x39   :  { %422 = vmatprep.subr.bf16.mxu0 %v3130_v1  ;;  %615 = vmatprep.subr.bf16.mxu1 %v3132_v2  ;;  %v3136_v5 = vld [vmem:[#allocation5 + $0x24] ss:$16 sps:$4 sm:$0xff]   ;;  %v3138_v6 = vld [vmem:[#allocation5 + $0x2c] ss:$16 sps:$4 sm:$0xff]   ;;  %v3140_v7 = vld [vmem:[#allocation5 + $0x20] ss:$16 sps:$4 sm:$0xff]  }
  0x3a   :  { %423 = vmatpush1.bf16.msra.mxu0 %v3134_v3  ;;  %616 = vmatpush1.bf16.msra.mxu1 %v3135_v4  ;;  %v3141_v8 = vld [vmem:[#allocation5 + $0x28] ss:$16 sps:$4 sm:$0xff]   ;;  %v3142_v9 = vld [vmem:[#allocation5 + $0x44] ss:$16 sps:$4 sm:$0xff]   ;;  %v3144_v10 = vld [vmem:[#allocation5 + $0x4c] ss:$16 sps:$4 sm:$0xff]  }
  0x3b   :  { %424 = vmatprep.subr.bf16.mxu0 %v3136_v5  ;;  %617 = vmatprep.subr.bf16.mxu1 %v3138_v6  ;;  %v3146_v11 = vld [vmem:[#allocation5 + $0x40] ss:$16 sps:$4 sm:$0xff]   ;;  %v3147_v12 = vld [vmem:[#allocation5 + $0x48] ss:$16 sps:$4 sm:$0xff]   ;;  %v3148_v13 = vld [vmem:[#allocation5 + $0x64] ss:$16 sps:$4 sm:$0xff]  }
  0x3c   :  { %v3150_v14 = vld [vmem:[#allocation5 + $0x6c] ss:$16 sps:$4 sm:$0xff]   ;;  %v3152_v15 = vld [vmem:[#allocation5 + $0x60] ss:$16 sps:$4 sm:$0xff]   ;;  %v3153_v16 = vld [vmem:[#allocation5 + $0x68] ss:$16 sps:$4 sm:$0xff]  }
  0x3d   :  { %v3154_v17 = vld [vmem:[#allocation5 + $0x84] ss:$16 sps:$4 sm:$0xff]   ;;  %v3156_v18 = vld [vmem:[#allocation5 + $0x8c] ss:$16 sps:$4 sm:$0xff]   ;;  %v3158_v19 = vld [vmem:[#allocation5 + $0x80] ss:$16 sps:$4 sm:$0xff]  }
  0x3e   :  { %425 = vmatpush1.bf16.msra.mxu0 %v3140_v7  ;;  %618 = vmatpush1.bf16.msra.mxu1 %v3141_v8  ;;  %v3159_v20 = vld [vmem:[#allocation5 + $0x88] ss:$16 sps:$4 sm:$0xff]   ;;  %v3160_v21 = vld [vmem:[#allocation5 + $0xa4] ss:$16 sps:$4 sm:$0xff]   ;;  %v3162_v22 = vld [vmem:[#allocation5 + $0xac] ss:$16 sps:$4 sm:$0xff]  }
  0x3f   :  { %426 = vmatprep.subr.bf16.mxu0 %v3142_v9  ;;  %619 = vmatprep.subr.bf16.mxu1 %v3144_v10  ;;  %v3164_v23 = vld [vmem:[#allocation5 + $0xa0] ss:$16 sps:$4 sm:$0xff]   ;;  %v3165_v24 = vld [vmem:[#allocation5 + $0xa8] ss:$16 sps:$4 sm:$0xff]   ;;  %v3166_v25 = vld [vmem:[#allocation5 + $0xc4] ss:$16 sps:$4 sm:$0xff]  }
  0x40   :  { %v3168_v26 = vld [vmem:[#allocation5 + $0xcc] ss:$16 sps:$4 sm:$0xff]   ;;  %v3170_v27 = vld [vmem:[#allocation5 + $0xc0] ss:$16 sps:$4 sm:$0xff]   ;;  %v3171_v28 = vld [vmem:[#allocation5 + $0xc8] ss:$16 sps:$4 sm:$0xff]  }
  0x41   :  { %v3172_v29 = vld [vmem:[#allocation5 + $0xe4] ss:$16 sps:$4 sm:$0xff]   ;;  %v3174_v30 = vld [vmem:[#allocation5 + $0xec] ss:$16 sps:$4 sm:$0xff]   ;;  %v3176_v31 = vld [vmem:[#allocation5 + $0xe0] ss:$16 sps:$4 sm:$0xff]  }
  0x42   :  { %427 = vmatpush1.bf16.msra.mxu0 %v3146_v11  ;;  %620 = vmatpush1.bf16.msra.mxu1 %v3147_v12  ;;  %v3177_v32 = vld [vmem:[#allocation5 + $0xe8] ss:$16 sps:$4 sm:$0xff]   ;;  %v3178_v33 = vld [vmem:[#allocation2] sm:$0xff]   ;;  %v3180_v42 = vld [vmem:[#allocation2 + $0x10] sm:$0xff]  }
  0x43   :  { %428 = vmatprep.subr.bf16.mxu0 %v3148_v13  ;;  %621 = vmatprep.subr.bf16.mxu1 %v3150_v14  ;;  %v3193_v35 = vld [vmem:[#allocation7 + $0x40] sm:$0xff]   ;;  %v3198_v39 = vld [vmem:[#allocation7 + $0x48] sm:$0xff]   ;;  %v3202_v44 = vld [vmem:[#allocation7 + $0x50] sm:$0xff]  }
  0x44   :  { %v3194_v36 = vld [vmem:[#allocation7] sm:$0xff]   ;;  %v3199_v40 = vld [vmem:[#allocation7 + $0x8] sm:$0xff]   ;;  %v3203_v45 = vld [vmem:[#allocation7 + $0x10] sm:$0xff]  }
  0x45   :  { %v3195_v37 = vld [vmem:[#allocation7 + $0xc0] sm:$0xff]   ;;  %v3200_v41 = vld [vmem:[#allocation7 + $0xc8] sm:$0xff]   ;;  %v3204_v46 = vld [vmem:[#allocation7 + $0xd0] sm:$0xff]  }
  0x46   :  { %429 = vmatpush1.bf16.msra.mxu0 %v3152_v15  ;;  %622 = vmatpush1.bf16.msra.mxu1 %v3153_v16  ;;  %v3196_v38 = vld [vmem:[#allocation7 + $0x80] sm:$0xff]   ;;  %v3201_v43 = vld [vmem:[#allocation7 + $0x88] sm:$0xff]   ;;  %v3205_v47 = vld [vmem:[#allocation7 + $0x90] sm:$0xff]  }
  0x47   :  { %430 = vmatprep.subr.bf16.mxu0 %v3154_v17  ;;  %623 = vmatprep.subr.bf16.mxu1 %v3156_v18  ;;  %v3206_v48 = vld [vmem:[#allocation7 + $0x58] sm:$0xff]   ;;  %v3210_v53 = vld [vmem:[#allocation7 + $0x60] sm:$0xff]   ;;  %v3214_v57 = vld [vmem:[#allocation7 + $0x68] sm:$0xff]   ;;  %v130_v18 = vlaneseq }
  0x48   :  { %v3207_v49 = vld [vmem:[#allocation7 + $0x18] sm:$0xff]   ;;  %v3211_v54 = vld [vmem:[#allocation7 + $0x20] sm:$0xff]   ;;  %v3215_v58 = vld [vmem:[#allocation7 + $0x28] sm:$0xff]  }
  0x49   :  { %v3208_v50 = vld [vmem:[#allocation7 + $0xd8] sm:$0xff]   ;;  %v3212_v55 = vld [vmem:[#allocation7 + $0xe0] sm:$0xff]   ;;  %v3216_v59 = vld [vmem:[#allocation7 + $0xe8] sm:$0xff]  }
  0x4a   :  { %431 = vmatpush1.bf16.msra.mxu0 %v3158_v19  ;;  %624 = vmatpush1.bf16.msra.mxu1 %v3159_v20  ;;  %v3181_v51 = vld [vmem:[#allocation2 + $0x18] sm:$0xff]   ;;  %v3213_v56 = vld [vmem:[#allocation7 + $0xa0] sm:$0xff]   ;;  %v3217_v60 = vld [vmem:[#allocation7 + $0xa8] sm:$0xff]   ;;  %v131_v19 = vshrl.u32 %v130_v18, 7 }
  0x4b   :  { %432 = vmatprep.subr.bf16.mxu0 %v3160_v21  ;;  %625 = vmatprep.subr.bf16.mxu1 %v3162_v22  ;;  %v3209_v52 = vld [vmem:[#allocation7 + $0x98] sm:$0xff]   ;;  %v3182_v61 = vld [vmem:[#allocation2 + $0x20] sm:$0xff]   ;;  %v3218_v62 = vld [vmem:[#allocation7 + $0x70] sm:$0xff]  }
  0x4c   :  { %v3183_v63 = vld [vmem:[#allocation2 + $0x28] sm:$0xff]   ;;  %v3184_v1 = vld [vmem:[#allocation2 + $0x30] sm:$0xff]   ;;  %v3185_v2 = vld [vmem:[#allocation2 + $0x38] sm:$0xff]   ;;  %v3692_v22 = vsub.s32 0, %v131_v19 }
  0x4d   :  { %v3186_v3 = vld [vmem:[#allocation2 + $0x40] sm:$0xff]   ;;  %v3187_v4 = vld [vmem:[#allocation2 + $0x48] sm:$0xff]   ;;  %v3188_v5 = vld [vmem:[#allocation2 + $0x50] sm:$0xff]  }
  0x4e   :  { %433 = vmatpush1.bf16.msra.mxu0 %v3164_v23  ;;  %626 = vmatpush1.bf16.msra.mxu1 %v3165_v24  ;;  %v3189_v6 = vld [vmem:[#allocation2 + $0x58] sm:$0xff]   ;;  %v3190_v7 = vld [vmem:[#allocation2 + $0x60] sm:$0xff]   ;;  %v3191_v8 = vld [vmem:[#allocation2 + $0x68] sm:$0xff]   ;;  %5014 = vst [vmem:[#allocation12_spill] sm:$0xff] %v3692_v22  ;;  %v136_v23 = vsub.s32 2, %v131_v19  ;;  %v144_v24 = vsub.s32 6, %v131_v19 }
  0x4f   :  { %434 = vmatprep.subr.bf16.mxu0 %v3166_v25  ;;  %627 = vmatprep.subr.bf16.mxu1 %v3168_v26  ;;  %v3219_v9 = vld [vmem:[#allocation7 + $0x30] sm:$0xff]   ;;  %v3197_v13 = vld [vmem:[#allocation2 + $0x78] sm:$0xff]   ;;  %v127_v20 = vld [vmem:[%s5009_s2] sm:$0xf] }
  0x50   :  { %v3220_v10 = vld [vmem:[#allocation7 + $0xf0] sm:$0xff]   ;;  %v3222_v14 = vld [vmem:[#allocation7 + $0x78] sm:$0xff]   ;;  %v128_v21 = vunpack.c.l.bf16 %v127_v20 }
  0x51   :  { %v3192_v11 = vld [vmem:[#allocation2 + $0x70] sm:$0xff]   ;;  %v3223_v15 = vld [vmem:[#allocation7 + $0x38] sm:$0xff]  }
  0x52   :  { %435 = vmatpush1.bf16.msra.mxu0 %v3170_v27  ;;  %628 = vmatpush1.bf16.msra.mxu1 %v3171_v28  ;;  %v3221_v12 = vld [vmem:[#allocation7 + $0xb0] sm:$0xff]   ;;  %v3224_v16 = vld [vmem:[#allocation7 + $0xf8] sm:$0xff]   ;;  %v133_v25 = vrot.slane %v128_v21, %v3692_v22  ;;  %v137_v27 = vrot.slane %v128_v21, %v136_v23  ;;  %v145_v28 = vrot.slane %v128_v21, %v144_v24 }
  0x53   :  { %436 = vmatprep.subr.bf16.mxu0 %v3172_v29  ;;  %629 = vmatprep.subr.bf16.mxu1 %v3174_v30  ;;  %v3225_v17 = vld [vmem:[#allocation7 + $0xb8] sm:$0xff]  }
  0x54   :  { %v3696_v29 = vrot.slane %v133_v25, %v3692_v22 }
  0x56   :  { %437 = vmatpush1.bf16.msra.mxu0 %v3176_v31  ;;  %630 = vmatpush1.bf16.msra.mxu1 %v3177_v32  ;;  %v3702_v31 = vrot.slane %v137_v27, %v3692_v22  ;;  %v3705_v32 = vrot.slane %v145_v28, %v3692_v22 }
  0x57   :  { %2897 = vmatprep.subr.bf16.mxu0 %v3193_v35  ;;  %3009 = vmatprep.subr.bf16.mxu1 %v3195_v37 }
  0x59   :  { %455 = vmatmul.mubr.bf16.vlgmr.msra.gmra.mrb[0].mxu0 %v3178_v33  ;;  %648 = vmatmul.mubr.bf16.vlgmr.msra.gmra.mrb[0].mxu1 %v3178_v33 }
  0x5a   :  { %464 = vmatprep.mubr.bf16.mxu0 %v3583_v0  ;;  %657 = vmatprep.mubr.bf16.mxu1 %v3583_v0 }
  0x5b   :  { %2898 = vmatpush3.bf16.msra.mxu0 %v3194_v36  ;;  %3010 = vmatpush3.bf16.msra.mxu1 %v3196_v38 }
  0x5c   :  { %2899 = vmatprep.subr.bf16.mxu0 %v3198_v39  ;;  %3011 = vmatprep.subr.bf16.mxu1 %v3200_v41 }
  0x5f   :  { %2900 = vmatpush3.bf16.msra.mxu0 %v3199_v40  ;;  %3012 = vmatpush3.bf16.msra.mxu1 %v3201_v43 }
  0x60   :  { %2901 = vmatprep.subr.bf16.mxu0 %v3202_v44  ;;  %3013 = vmatprep.subr.bf16.mxu1 %v3204_v46 }
  0x61   :  { %465 = vmatmul.mubr.bf16.gmra.mrb[4].mxu0 %v3179_v34  ;;  %658 = vmatmul.mubr.bf16.gmra.mrb[4].mxu1 %v3179_v34 }
  0x62   :  { %474 = vmatprep.mubr.bf16.mxu0 %v3583_v0  ;;  %667 = vmatprep.mubr.bf16.mxu1 %v3583_v0 }
  0x63   :  { %2902 = vmatpush3.bf16.msra.mxu0 %v3203_v45  ;;  %3014 = vmatpush3.bf16.msra.mxu1 %v3205_v47 }
  0x64   :  { %2903 = vmatprep.subr.bf16.mxu0 %v3206_v48  ;;  %3015 = vmatprep.subr.bf16.mxu1 %v3208_v50 }
  0x67   :  { %2904 = vmatpush3.bf16.msra.mxu0 %v3207_v49  ;;  %3016 = vmatpush3.bf16.msra.mxu1 %v3209_v52 }
  0x68   :  { %2905 = vmatprep.subr.bf16.mxu0 %v3210_v53  ;;  %3017 = vmatprep.subr.bf16.mxu1 %v3212_v55 }
  0x69   :  { %475 = vmatmul.mubr.bf16.gmra.mrb[8].mxu0 %v3180_v42  ;;  %668 = vmatmul.mubr.bf16.gmra.mrb[8].mxu1 %v3180_v42 }
  0x6a   :  { %484 = vmatprep.mubr.bf16.mxu0 %v3583_v0  ;;  %677 = vmatprep.mubr.bf16.mxu1 %v3583_v0 }
  0x6b   :  { %2906 = vmatpush3.bf16.msra.mxu0 %v3211_v54  ;;  %3018 = vmatpush3.bf16.msra.mxu1 %v3213_v56 }
  0x6c   :  { %2907 = vmatprep.subr.bf16.mxu0 %v3214_v57  ;;  %3019 = vmatprep.subr.bf16.mxu1 %v3216_v59 }
  0x6f   :  { %2908 = vmatpush3.bf16.msra.mxu0 %v3215_v58  ;;  %3020 = vmatpush3.bf16.msra.mxu1 %v3217_v60 }
  0x70   :  { %2909 = vmatprep.subr.bf16.mxu0 %v3218_v62  ;;  %3021 = vmatprep.subr.bf16.mxu1 %v3220_v10 }
  0x71   :  { %485 = vmatmul.mubr.bf16.gmra.mrb[12].mxu0 %v3181_v51  ;;  %678 = vmatmul.mubr.bf16.gmra.mrb[12].mxu1 %v3181_v51 }
  0x72   :  { %494 = vmatprep.mubr.bf16.mxu0 %v3583_v0  ;;  %687 = vmatprep.mubr.bf16.mxu1 %v3583_v0 }
  0x73   :  { %2910 = vmatpush3.bf16.msra.mxu0 %v3219_v9  ;;  %3022 = vmatpush3.bf16.msra.mxu1 %v3221_v12 }
  0x74   :  { %2911 = vmatprep.subr.bf16.mxu0 %v3222_v14  ;;  %3023 = vmatprep.subr.bf16.mxu1 %v3224_v16 }
  0x77   :  { %2912 = vmatpush3.bf16.msra.mxu0 %v3223_v15  ;;  %3024 = vmatpush3.bf16.msra.mxu1 %v3225_v17 }
  0x79   :  { %495 = vmatmul.mubr.bf16.gmra.mrb[16].mxu0 %v3182_v61  ;;  %688 = vmatmul.mubr.bf16.gmra.mrb[16].mxu1 %v3182_v61 }
  0x7a   :  { %504 = vmatprep.mubr.bf16.mxu0 %v3583_v0  ;;  %697 = vmatprep.mubr.bf16.mxu1 %v3583_v0 }
  0x81   :  { %505 = vmatmul.mubr.bf16.gmra.mrb[20].mxu0 %v3183_v63  ;;  %698 = vmatmul.mubr.bf16.gmra.mrb[20].mxu1 %v3183_v63 }
  0x82   :  { %514 = vmatprep.mubr.bf16.mxu0 %v3583_v0  ;;  %707 = vmatprep.mubr.bf16.mxu1 %v3583_v0 }
  0x89   :  { %515 = vmatmul.mubr.bf16.gmra.mrb[24].mxu0 %v3184_v1  ;;  %708 = vmatmul.mubr.bf16.gmra.mrb[24].mxu1 %v3184_v1 }
  0x8a   :  { %524 = vmatprep.mubr.bf16.mxu0 %v3583_v0  ;;  %717 = vmatprep.mubr.bf16.mxu1 %v3583_v0 }
  0x91   :  { %525 = vmatmul.mubr.bf16.gmra.mrb[28].mxu0 %v3185_v2  ;;  %718 = vmatmul.mubr.bf16.gmra.mrb[28].mxu1 %v3185_v2 }
  0x92   :  { %534 = vmatprep.mubr.bf16.mxu0 %v3583_v0  ;;  %727 = vmatprep.mubr.bf16.mxu1 %v3583_v0 }
  0x99   :  { %535 = vmatmul.mubr.bf16.gmra.mrb[32].mxu0 %v3186_v3  ;;  %728 = vmatmul.mubr.bf16.gmra.mrb[32].mxu1 %v3186_v3 }
  0x9a   :  { %544 = vmatprep.mubr.bf16.mxu0 %v3583_v0  ;;  %737 = vmatprep.mubr.bf16.mxu1 %v3583_v0 }
  0xa1   :  { %545 = vmatmul.mubr.bf16.gmra.mrb[36].mxu0 %v3187_v4  ;;  %738 = vmatmul.mubr.bf16.gmra.mrb[36].mxu1 %v3187_v4 }
  0xa2   :  { %554 = vmatprep.mubr.bf16.mxu0 %v3583_v0  ;;  %747 = vmatprep.mubr.bf16.mxu1 %v3583_v0 }
  0xa9   :  { %555 = vmatmul.mubr.bf16.gmra.mrb[40].mxu0 %v3188_v5  ;;  %748 = vmatmul.mubr.bf16.gmra.mrb[40].mxu1 %v3188_v5 }
  0xaa   :  { %564 = vmatprep.mubr.bf16.mxu0 %v3583_v0  ;;  %757 = vmatprep.mubr.bf16.mxu1 %v3583_v0 }
  0xb1   :  { %565 = vmatmul.mubr.bf16.gmra.mrb[44].mxu0 %v3189_v6  ;;  %758 = vmatmul.mubr.bf16.gmra.mrb[44].mxu1 %v3189_v6 }
  0xb2   :  { %574 = vmatprep.mubr.bf16.mxu0 %v3583_v0  ;;  %767 = vmatprep.mubr.bf16.mxu1 %v3583_v0 }
  0xb9   :  { %575 = vmatmul.mubr.bf16.gmra.mrb[48].mxu0 %v3190_v7  ;;  %768 = vmatmul.mubr.bf16.gmra.mrb[48].mxu1 %v3190_v7 }
  0xba   :  { %584 = vmatprep.mubr.bf16.mxu0 %v3583_v0  ;;  %777 = vmatprep.mubr.bf16.mxu1 %v3583_v0 }
  0xc1   :  { %585 = vmatmul.mubr.bf16.gmra.mrb[52].mxu0 %v3191_v8  ;;  %778 = vmatmul.mubr.bf16.gmra.mrb[52].mxu1 %v3191_v8 }
  0xc2   :  { %594 = vmatprep.mubr.bf16.mxu0 %v3583_v0  ;;  %787 = vmatprep.mubr.bf16.mxu1 %v3583_v0 }
  0xc9   :  { %595 = vmatmul.mubr.bf16.gmra.mrb[56].mxu0 %v3192_v11  ;;  %788 = vmatmul.mubr.bf16.gmra.mrb[56].mxu1 %v3192_v11 }
  0xca   :  { %604 = vmatprep.mubr.bf16.mxu0 %v3583_v0  ;;  %797 = vmatprep.mubr.bf16.mxu1 %v3583_v0  ;;  %v140_v0 = vsub.s32 4, %v131_v19 }
  0xcc   :  { %v141_v26 = vrot.slane %v128_v21, %v140_v0 }
  0xce   :  { %v3699_v30 = vrot.slane %v141_v26, %v3692_v22 }
  0xd1   :  { %605 = vmatmul.mubr.bf16.gmra.mrb[60].mxu0 %v3197_v13  ;;  %798 = vmatmul.mubr.bf16.gmra.mrb[60].mxu1 %v3197_v13 }
 0x12c   :  { %v456_v33 = vpop.f32.mrb[0].mxu0  ;;  %v649_v34 = vpop.f32.mrb[0].mxu1 }
 0x12d   :  { %v457_v35 = vadd.f32 %v456_v33, %v3696_v29  ;;  %v650_v36 = vadd.f32 %v649_v34, %v3699_v30  ;;  %v458_v37 = vpop.f32.mrb[1].mxu0  ;;  %v651_v38 = vpop.f32.mrb[1].mxu1 }
 0x12e   :  { %v459_v39 = vadd.f32 %v458_v37, %v3702_v31  ;;  %v652_v40 = vadd.f32 %v651_v38, %v3705_v32  ;;  %v460_v41 = vpop.f32.mrb[2].mxu0  ;;  %v653_v42 = vpop.f32.mrb[2].mxu1 }
 0x12f   :  { %v808_v43 = vmul.f32 %v457_v35, %v457_v35  ;;  %v3711_v44 = vmul.f32 0.5, %v457_v35  ;;  %v810_v45 = vmul.f32 %v650_v36, %v650_v36  ;;  %v3713_v46 = vmul.f32 0.5, %v650_v36  ;;  %v462_v47 = vpop.f32.mrb[3].mxu0  ;;  %v655_v48 = vpop.f32.mrb[3].mxu1 }
 0x130   :  { %v809_v49 = vmul.f32 %v459_v39, %v459_v39  ;;  %v3715_v50 = vmul.f32 0.5, %v459_v39  ;;  %v811_v51 = vmul.f32 %v652_v40, %v652_v40  ;;  %v3717_v52 = vmul.f32 0.5, %v652_v40 }
 0x131   :  { %v936_v53 = vmul.f32 0.035677407, %v808_v43  ;;  %v938_v54 = vmul.f32 0.035677407, %v810_v45  ;;  %v461_v55 = vadd.f32 %v460_v41, %v3696_v29  ;;  %v654_v56 = vadd.f32 %v653_v42, %v3699_v30 }
 0x132   :  { %v937_v57 = vmul.f32 0.035677407, %v809_v49  ;;  %v939_v58 = vmul.f32 0.035677407, %v811_v51  ;;  %v463_v59 = vadd.f32 %v462_v47, %v3702_v31  ;;  %v656_v60 = vadd.f32 %v655_v48, %v3705_v32 }
 0x133   :  { %v1064_v61 = vadd.f32 0.7978846, %v936_v53  ;;  %v1066_v62 = vadd.f32 0.7978846, %v938_v54  ;;  %v812_v63 = vmul.f32 %v461_v55, %v461_v55  ;;  %v3723_v1 = vmul.f32 0.5, %v461_v55 }
 0x134   :  { %v1065_v2 = vadd.f32 0.7978846, %v937_v57  ;;  %v1067_v3 = vadd.f32 0.7978846, %v939_v58  ;;  %v814_v4 = vmul.f32 %v654_v56, %v654_v56  ;;  %v3725_v5 = vmul.f32 0.5, %v654_v56  ;;  %v466_v6 = vpop.f32.mrb[4].mxu0 }
 0x135   :  { %v1192_v7 = vmul.f32 %v1064_v61, %v457_v35  ;;  %v1194_v8 = vmul.f32 %v1066_v62, %v650_v36  ;;  %v940_v9 = vmul.f32 0.035677407, %v812_v63  ;;  %v813_v10 = vmul.f32 %v463_v59, %v463_v59  ;;  %v659_v11 = vpop.f32.mrb[4].mxu1  ;;  %v468_v12 = vpop.f32.mrb[5].mxu0 }
 0x136   :  { %v1193_v13 = vmul.f32 %v1065_v2, %v459_v39  ;;  %v1195_v14 = vmul.f32 %v1067_v3, %v652_v40  ;;  %v942_v15 = vmul.f32 0.035677407, %v814_v4  ;;  %v3727_v16 = vmul.f32 0.5, %v463_v59  ;;  %v661_v17 = vpop.f32.mrb[5].mxu1  ;;  %v470_v18 = vpop.f32.mrb[6].mxu0 }
 0x137   :  { %3226 = vtanh.f32 %v1192_v7  ;;  %v1068_v19 = vadd.f32 0.7978846, %v940_v9  ;;  %v941_v20 = vmul.f32 0.035677407, %v813_v10  ;;  %v815_v21 = vmul.f32 %v656_v60, %v656_v60  ;;  %v663_v0 = vpop.f32.mrb[6].mxu1  ;;  %v472_v23 = vpop.f32.mrb[7].mxu0 }
 0x138   :  { %3228 = vtanh.f32 %v1194_v8  ;;  %v1070_v24 = vadd.f32 0.7978846, %v942_v15  ;;  %v3729_v25 = vmul.f32 0.5, %v656_v60  ;;  %v467_v26 = vadd.f32 %v466_v6, %v3696_v29  ;;  %v3732_v27 = vpop.f32.mrb[7].mxu1 }
 0x139   :  { %3230 = vtanh.f32 %v1193_v13  ;;  %v1196_v28 = vmul.f32 %v1068_v19, %v461_v55  ;;  %v1069_v33 = vadd.f32 0.7978846, %v941_v20  ;;  %v943_v34 = vmul.f32 0.035677407, %v815_v21 }
 0x13a   :  { %3232 = vtanh.f32 %v1195_v14  ;;  %v1198_v35 = vmul.f32 %v1070_v24, %v654_v56  ;;  %v816_v36 = vmul.f32 %v467_v26, %v467_v26  ;;  %v3734_v37 = vmul.f32 0.5, %v467_v26 }
 0x13b   :  { %3234 = vtanh.f32 %v1196_v28  ;;  %v1197_v38 = vmul.f32 %v1069_v33, %v463_v59  ;;  %v1071_v39 = vadd.f32 0.7978846, %v943_v34  ;;  %v660_v40 = vadd.f32 %v659_v11, %v3699_v30 }
 0x13c   :  { %5015 = vst [vmem:[#allocation13_spill] sm:$0xff] %v3734_v37  ;;  %3236 = vtanh.f32 %v1198_v35  ;;  %v944_v41 = vmul.f32 0.035677407, %v816_v36  ;;  %v469_v42 = vadd.f32 %v468_v12, %v3702_v31  ;;  %v662_v43 = vadd.f32 %v661_v17, %v3705_v32  ;;  %v3739_v45 = vpop.f32.mrb[8].mxu0  ;;  %v3741_v47 = vpop.f32.mrb[8].mxu1 }
 0x13d   :  { %3238 = vtanh.f32 %v1197_v38  ;;  %v1199_v48 = vmul.f32 %v1071_v39, %v656_v60  ;;  %v818_v49 = vmul.f32 %v660_v40, %v660_v40  ;;  %v3743_v51 = vmul.f32 0.5, %v660_v40  ;;  %v3745_v53 = vpop.f32.mrb[9].mxu0  ;;  %v3747_v54 = vpop.f32.mrb[9].mxu1 }
 0x13e   :  { %v1072_v55 = vadd.f32 0.7978846, %v944_v41  ;;  %v817_v56 = vmul.f32 %v469_v42, %v469_v42  ;;  %v3749_v57 = vmul.f32 0.5, %v469_v42  ;;  %v819_v58 = vmul.f32 %v662_v43, %v662_v43  ;;  %v3751_v59 = vpop.f32.mrb[10].mxu0  ;;  %v3753_v61 = vpop.f32.mrb[10].mxu1 }
 0x13f   :  { %5016 = vst [vmem:[#allocation14_spill] sm:$0xff] %v3743_v51  ;;  %3240 = vtanh.f32 %v1199_v48  ;;  %v946_v62 = vmul.f32 0.035677407, %v818_v49  ;;  %v3755_v63 = vmul.f32 0.5, %v662_v43  ;;  %v471_v60 = vadd.f32 %v470_v18, %v3696_v29  ;;  %v3758_v2 = vpop.f32.mrb[11].mxu0  ;;  %v3760_v3 = vpop.f32.mrb[11].mxu1 }
 0x140   :  { %v1200_v4 = vmul.f32 %v1072_v55, %v467_v26  ;;  %v945_v6 = vmul.f32 0.035677407, %v817_v56  ;;  %v947_v7 = vmul.f32 0.035677407, %v819_v58  ;;  %v664_v8 = vadd.f32 %v663_v0, %v3699_v30 }
 0x141   :  { %v3227_v9 = vpop.eup %3226  ;;  %v1074_v10 = vadd.f32 0.7978846, %v946_v62  ;;  %v820_v11 = vmul.f32 %v471_v60, %v471_v60  ;;  %v3763_v12 = vmul.f32 0.5, %v471_v60  ;;  %v473_v13 = vadd.f32 %v472_v23, %v3702_v31 }
 0x142   :  { %v3229_v14 = vpop.eup %3228  ;;  %v1576_v15 = vadd.f32 1.0, %v3227_v9  ;;  %3242 = vtanh.f32 %v1200_v4  ;;  %v1073_v17 = vadd.f32 0.7978846, %v945_v6  ;;  %v1075_v18 = vadd.f32 0.7978846, %v947_v7 }
 0x143   :  { %5017 = vst [vmem:[#allocation15_spill] sm:$0xff] %v3763_v12  ;;  %v3766_v19 = vpop.eup %3230  ;;  %v1578_v20 = vadd.f32 1.0, %v3229_v14  ;;  %v1202_v21 = vmul.f32 %v1074_v10, %v660_v40  ;;  %v948_v24 = vmul.f32 0.035677407, %v820_v11  ;;  %v822_v26 = vmul.f32 %v664_v8, %v664_v8 }
 0x144   :  { %v3768_v28 = vpop.eup %3232  ;;  %v3771_v0 = vmul.f32 %v1576_v15, %v3711_v44  ;;  %v1201_v33 = vmul.f32 %v1073_v17, %v469_v42  ;;  %v1203_v34 = vmul.f32 %v1075_v18, %v662_v43  ;;  %v3773_v35 = vmul.f32 0.5, %v664_v8  ;;  %v3775_v23 = vpop.f32.mrb[12].mxu0 }
 0x145   :  { %v3777_v36 = vpop.f32.mrb[12].mxu1  ;;  %v3235_v38 = vpop.eup %3234  ;;  %v3780_v39 = vmul.f32 %v1578_v20, %v3713_v46  ;;  %3244 = vtanh.f32 %v1202_v21  ;;  %v1076_v40 = vadd.f32 0.7978846, %v948_v24  ;;  %v950_v41 = vmul.f32 0.035677407, %v822_v26 }
 0x146   :  { %5018 = vst [vmem:[#allocation16_spill] sm:$0xff] %v3773_v35  ;;  %v3782_v48 = vpop.f32.mrb[13].mxu0  ;;  %v3784_v49 = vpop.f32.mrb[13].mxu1  ;;  %v1580_v42 = vadd.f32 1.0, %v3235_v38  ;;  %3246 = vtanh.f32 %v1201_v33  ;;  %v821_v43 = vmul.f32 %v473_v13, %v473_v13  ;;  %v3786_v55 = vmul.f32 0.5, %v473_v13 }
 0x147   :  { %v3237_v44 = vpop.eup %3236  ;;  %v3788_v56 = vpop.f32.mrb[14].mxu0  ;;  %3248 = vtanh.f32 %v1203_v34  ;;  %v1204_v4 = vmul.f32 %v1076_v40, %v471_v60  ;;  %v1078_v6 = vadd.f32 0.7978846, %v950_v41  ;;  %v666_v14 = vadd.f32 %v3732_v27, %v3705_v32 }
 0x148   :  { %v3790_v58 = vpop.f32.mrb[14].mxu1  ;;  %v3792_v62 = vpop.eup %3238  ;;  %v1582_v46 = vadd.f32 1.0, %v3237_v44  ;;  %v3799_v10 = vmul.f32 %v1580_v42, %v3723_v1  ;;  %v949_v11 = vmul.f32 0.035677407, %v821_v43  ;;  %v477_v15 = vadd.f32 %v3739_v45, %v3696_v29 }
 0x149   :  { %v3794_v7 = vpop.f32.mrb[15].mxu0  ;;  %v3796_v9 = vpop.f32.mrb[15].mxu1  ;;  %3250 = vtanh.f32 %v1204_v4  ;;  %v1206_v60 = vmul.f32 %v1078_v6, %v664_v8  ;;  %v670_v20 = vadd.f32 %v3741_v47, %v3699_v30  ;;  %v823_v24 = vmul.f32 %v666_v14, %v666_v14 }
 0x14a   :  { %v3805_v17 = vpop.eup %3240  ;;  %v3808_v18 = vmul.f32 %v1582_v46, %v3725_v5  ;;  %v1077_v21 = vadd.f32 0.7978846, %v949_v11  ;;  %v3814_v26 = vmul.f32 0.5, %v666_v14  ;;  %v824_v45 = vmul.f32 %v477_v15, %v477_v15 }
 0x14b   :  { %3252 = vtanh.f32 %v1206_v60  ;;  %v3818_v33 = vmul.f32 0.5, %v477_v15  ;;  %v951_v34 = vmul.f32 0.035677407, %v823_v24  ;;  %v826_v38 = vmul.f32 %v670_v20, %v670_v20 }
 0x14c   :  { %5019 = vst [vmem:[#allocation17_spill] sm:$0xff] %v3814_v26  ;;  %v3820_v5 = vpop.eup %3242  ;;  %v1205_v8 = vmul.f32 %v1077_v21, %v473_v13  ;;  %v3822_v47 = vmul.f32 0.5, %v670_v20  ;;  %v3824_v40 = vpop.f32.mrb[16].mxu0  ;;  %v952_v44 = vmul.f32 0.035677407, %v824_v45  ;;  %v479_v42 = vadd.f32 %v3745_v53, %v3702_v31 }
 0x14d   :  { %5020 = vst [vmem:[#allocation18_spill] sm:$0xff] %v3818_v33  ;;  %5021 = vst [vmem:[#allocation19_spill] sm:$0xff] %v3820_v5  ;;  %v3826_v41 = vpop.f32.mrb[16].mxu1  ;;  %v672_v43 = vadd.f32 %v3747_v54, %v3705_v32  ;;  %v481_v46 = vadd.f32 %v3751_v59, %v3696_v29  ;;  %v3834_v4 = vpop.f32.mrb[17].mxu0  ;;  %v1079_v6 = vadd.f32 0.7978846, %v951_v34  ;;  %v674_v60 = vadd.f32 %v3753_v61, %v3699_v30 }
 0x14e   :  { %5022 = vst [vmem:[#allocation20_spill] sm:$0xff] %v3822_v47  ;;  %v3836_v13 = vpop.f32.mrb[17].mxu1  ;;  %3254 = vtanh.f32 %v1205_v8  ;;  %v954_v11 = vmul.f32 0.035677407, %v826_v38  ;;  %v3840_v21 = vpop.f32.mrb[18].mxu0  ;;  %v825_v45 = vmul.f32 %v479_v42, %v479_v42  ;;  %v3846_v27 = vmul.f32 0.5, %v479_v42 }
 0x14f   :  { %v3842_v24 = vpop.f32.mrb[18].mxu1  ;;  %v3844_v53 = vpop.eup %3244  ;;  %v1080_v54 = vadd.f32 0.7978846, %v952_v44  ;;  %v827_v59 = vmul.f32 %v672_v43, %v672_v43  ;;  %v1207_v34 = vmul.f32 %v1079_v6, %v666_v14  ;;  %v3854_v61 = vmul.f32 0.5, %v672_v43 }
 0x150   :  { %5023 = vst [vmem:[#allocation21_spill] sm:$0xff] %v3844_v53  ;;  %5024 = vst [vmem:[#allocation22_spill] sm:$0xff] %v3846_v27  ;;  %v3848_v1 = vpop.f32.mrb[19].mxu0  ;;  %v3850_v22 = vpop.f32.mrb[19].mxu1  ;;  %v1082_v38 = vadd.f32 0.7978846, %v954_v11  ;;  %v828_v47 = vmul.f32 %v481_v46, %v481_v46  ;;  %v830_v37 = vmul.f32 %v674_v60, %v674_v60 }
 0x151   :  { %v3852_v8 = vpop.eup %3246  ;;  %5025 = vst [vmem:[#allocation23_spill] sm:$0xff] %v3854_v61  ;;  %v1208_v35 = vmul.f32 %v1080_v54, %v477_v15  ;;  %v953_v51 = vmul.f32 0.035677407, %v825_v45  ;;  %v955_v44 = vmul.f32 0.035677407, %v827_v59  ;;  %v3858_v53 = vmul.f32 0.5, %v481_v46 }
 0x152   :  { %v3856_v33 = vpop.eup %3248  ;;  %3256 = vtanh.f32 %v1207_v34  ;;  %v1210_v27 = vmul.f32 %v1082_v38, %v670_v20  ;;  %v956_v12 = vmul.f32 0.035677407, %v828_v47  ;;  %v3862_v6 = vmul.f32 0.5, %v674_v60 }
 0x153   :  { %5026 = vst [vmem:[#allocation24_spill] sm:$0xff] %v3858_v53  ;;  %v3860_v5 = vpop.eup %3250  ;;  %3258 = vtanh.f32 %v1208_v35  ;;  %v1081_v26 = vadd.f32 0.7978846, %v953_v51  ;;  %v1083_v14 = vadd.f32 0.7978846, %v955_v44  ;;  %v483_v15 = vadd.f32 %v3758_v2, %v3702_v31 }
 0x154   :  { %5027 = vst [vmem:[#allocation25_spill] sm:$0xff] %v3862_v6  ;;  %3260 = vtanh.f32 %v1210_v27  ;;  %v1084_v11 = vadd.f32 0.7978846, %v956_v12  ;;  %v958_v61 = vmul.f32 0.035677407, %v830_v37  ;;  %v3866_v54 = vpop.f32.mrb[20].mxu0  ;;  %v676_v51 = vadd.f32 %v3760_v3, %v3705_v32 }
 0x155   :  { %v3868_v45 = vpop.f32.mrb[20].mxu1  ;;  %v3870_v20 = vpop.eup %3252  ;;  %v1209_v47 = vmul.f32 %v1081_v26, %v479_v42  ;;  %v1211_v59 = vmul.f32 %v1083_v14, %v672_v43  ;;  %v487_v35 = vadd.f32 %v3775_v23, %v3696_v29  ;;  %v829_v34 = vmul.f32 %v483_v15, %v483_v15 }
 0x156   :  { %v3876_v27 = vpop.f32.mrb[21].mxu0  ;;  %v3878_v37 = vpop.f32.mrb[21].mxu1  ;;  %v1212_v12 = vmul.f32 %v1084_v11, %v481_v46  ;;  %v1086_v2 = vadd.f32 0.7978846, %v958_v61  ;;  %v3880_v38 = vmul.f32 0.5, %v483_v15  ;;  %v831_v26 = vmul.f32 %v676_v51, %v676_v51 }
 0x157   :  { %v3882_v44 = vpop.f32.mrb[22].mxu0  ;;  %v3884_v6 = vpop.f32.mrb[22].mxu1  ;;  %3262 = vtanh.f32 %v1209_v47  ;;  %v3886_v42 = vmul.f32 0.5, %v676_v51  ;;  %v832_v3 = vmul.f32 %v487_v35, %v487_v35  ;;  %v957_v61 = vmul.f32 0.035677407, %v829_v34 }
 0x158   :  { %5028 = vst [vmem:[#allocation26_spill] sm:$0xff] %v3880_v38  ;;  %5029 = vst [vmem:[#allocation27_spill] sm:$0xff] %v3882_v44  ;;  %v3888_v43 = vpop.f32.mrb[23].mxu0  ;;  %v3890_v23 = vpop.f32.mrb[23].mxu1  ;;  %3264 = vtanh.f32 %v1211_v59  ;;  %v1214_v46 = vmul.f32 %v1086_v2, %v674_v60  ;;  %v3894_v11 = vmul.f32 0.5, %v487_v35  ;;  %v680_v47 = vadd.f32 %v3777_v36, %v3699_v30 }
 0x159   :  { %5030 = vst [vmem:[#allocation28_spill] sm:$0xff] %v3884_v6  ;;  %5031 = vst [vmem:[#allocation29_spill] sm:$0xff] %v3886_v42  ;;  %v3892_v14 = vpop.eup %3254  ;;  %3266 = vtanh.f32 %v1212_v12  ;;  %v959_v53 = vmul.f32 0.035677407, %v831_v26  ;;  %v960_v38 = vmul.f32 0.035677407, %v832_v3 }
 0x15a   :  { %5032 = vst [vmem:[#allocation30_spill] sm:$0xff] %v3888_v43  ;;  %5033 = vst [vmem:[#allocation31_spill] sm:$0xff] %v3890_v23  ;;  %3268 = vtanh.f32 %v1214_v46  ;;  %v1085_v42 = vadd.f32 0.7978846, %v957_v61  ;;  %v489_v43 = vadd.f32 %v3782_v48, %v3702_v31  ;;  %v682_v23 = vadd.f32 %v3784_v49, %v3705_v32 }
 0x15b   :  { %5034 = vst [vmem:[#allocation32_spill] sm:$0xff] %v3894_v11  ;;  %v1087_v6 = vadd.f32 0.7978846, %v959_v53  ;;  %v1088_v59 = vadd.f32 0.7978846, %v960_v38  ;;  %v834_v60 = vmul.f32 %v680_v47, %v680_v47  ;;  %v3902_v2 = vmul.f32 0.5, %v680_v47 }
 0x15c   :  { %v3904_v34 = vpop.eup %3256  ;;  %v1213_v12 = vmul.f32 %v1085_v42, %v483_v15  ;;  %v833_v26 = vmul.f32 %v489_v43, %v489_v43  ;;  %v3906_v3 = vmul.f32 0.5, %v489_v43  ;;  %v835_v36 = vmul.f32 %v682_v23, %v682_v23  ;;  %v3908_v46 = vpop.f32.mrb[24].mxu0 }
 0x15d   :  { %5035 = vst [vmem:[#allocation33_spill] sm:$0xff] %v3902_v2  ;;  %5037 = vst [vmem:[#allocation35_spill] sm:$0xff] %v3908_v46  ;;  %v3910_v61 = vpop.f32.mrb[24].mxu1  ;;  %v3912_v48 = vpop.eup %3258  ;;  %v1215_v11 = vmul.f32 %v1087_v6, %v676_v51  ;;  %v1216_v49 = vmul.f32 %v1088_v59, %v487_v35  ;;  %v962_v53 = vmul.f32 0.035677407, %v834_v60  ;;  %v3914_v38 = vmul.f32 0.5, %v682_v23 }
 0x15e   :  { %5036 = vst [vmem:[#allocation34_spill] sm:$0xff] %v3906_v3  ;;  %5038 = vst [vmem:[#allocation36_spill] sm:$0xff] %v3910_v61  ;;  %v3916_v44 = vpop.f32.mrb[25].mxu0  ;;  %v3918_v2 = vpop.f32.mrb[25].mxu1  ;;  %3270 = vtanh.f32 %v1213_v12  ;;  %v961_v42 = vmul.f32 0.035677407, %v833_v26  ;;  %v491_v46 = vadd.f32 %v3788_v56, %v3696_v29  ;;  %v684_v51 = vadd.f32 %v3790_v58, %v3699_v30 }
 0x15f   :  { %5039 = vst [vmem:[#allocation37_spill] sm:$0xff] %v3912_v48  ;;  %5040 = vst [vmem:[#allocation38_spill] sm:$0xff] %v3914_v38  ;;  %v3920_v15 = vpop.eup %3260  ;;  %v963_v3 = vmul.f32 0.035677407, %v835_v36  ;;  %v3924_v61 = vpop.f32.mrb[26].mxu0  ;;  %3272 = vtanh.f32 %v1215_v11  ;;  %v493_v35 = vadd.f32 %v3794_v7, %v3702_v31 }
 0x160   :  { %5041 = vst [vmem:[#allocation39_spill] sm:$0xff] %v3916_v44  ;;  %5042 = vst [vmem:[#allocation40_spill] sm:$0xff] %v3918_v2  ;;  %v3926_v48 = vpop.f32.mrb[26].mxu1  ;;  %v1090_v6 = vadd.f32 0.7978846, %v962_v53  ;;  %v3932_v59 = vpop.f32.mrb[27].mxu0  ;;  %3274 = vtanh.f32 %v1216_v49  ;;  %v836_v56 = vmul.f32 %v491_v46, %v491_v46  ;;  %v838_v11 = vmul.f32 %v684_v51, %v684_v51 }
 0x161   :  { %5043 = vst [vmem:[#allocation41_spill] sm:$0xff] %v3924_v61  ;;  %5044 = vst [vmem:[#allocation42_spill] sm:$0xff] %v3926_v48  ;;  %v3934_v60 = vpop.f32.mrb[27].mxu1  ;;  %v1089_v12 = vadd.f32 0.7978846, %v961_v42  ;;  %v3936_v36 = vpop.eup %3262  ;;  %v3938_v48 = vmul.f32 0.5, %v491_v46 }
 0x162   :  { %5045 = vst [vmem:[#allocation43_spill] sm:$0xff] %v3932_v59  ;;  %v1091_v26 = vadd.f32 0.7978846, %v963_v3  ;;  %v1218_v38 = vmul.f32 %v1090_v6, %v680_v47  ;;  %v3940_v53 = vmul.f32 0.5, %v684_v51  ;;  %v3942_v58 = vpop.eup %3264  ;;  %v964_v2 = vmul.f32 0.035677407, %v836_v56 }
 0x163   :  { %5046 = vst [vmem:[#allocation44_spill] sm:$0xff] %v3938_v48  ;;  %v1217_v61 = vmul.f32 %v1089_v12, %v489_v43  ;;  %v837_v59 = vmul.f32 %v493_v35, %v493_v35  ;;  %v3944_v44 = vpop.eup %3266  ;;  %v966_v49 = vmul.f32 0.035677407, %v838_v11  ;;  %v3946_v3 = vmul.f32 0.5, %v493_v35 }
 0x164   :  { %5047 = vst [vmem:[#allocation45_spill] sm:$0xff] %v3940_v53  ;;  %v1219_v7 = vmul.f32 %v1091_v26, %v682_v23  ;;  %3276 = vtanh.f32 %v1218_v38  ;;  %v686_v47 = vadd.f32 %v3796_v9, %v3705_v32  ;;  %v3950_v42 = vpop.eup %3268  ;;  %v1092_v6 = vadd.f32 0.7978846, %v964_v2  ;;  %v3953_v43 = vpop.f32.mrb[28].mxu0 }
 0x165   :  { %5048 = vst [vmem:[#allocation46_spill] sm:$0xff] %v3946_v3  ;;  %3278 = vtanh.f32 %v1217_v61  ;;  %v965_v53 = vmul.f32 0.035677407, %v837_v59  ;;  %v1577_v48 = vadd.f32 1.0, %v3766_v19  ;;  %5049 = vst [vmem:[#allocation47_spill] sm:$0xff] %v3953_v43  ;;  %v3957_v38 = vpop.f32.mrb[28].mxu1 }
 0x166   :  { %3280 = vtanh.f32 %v1219_v7  ;;  %v1094_v23 = vadd.f32 0.7978846, %v966_v49  ;;  %v839_v12 = vmul.f32 %v686_v47, %v686_v47  ;;  %v3955_v26 = vmul.f32 0.5, %v686_v47  ;;  %5051 = vst [vmem:[#allocation49_spill] sm:$0xff] %v3957_v38  ;;  %v3959_v56 = vpop.f32.mrb[29].mxu0  ;;  %v3963_v61 = vpop.f32.mrb[29].mxu1 }
 0x167   :  { %v1220_v11 = vmul.f32 %v1092_v6, %v491_v46  ;;  %v1093_v9 = vadd.f32 0.7978846, %v965_v53  ;;  %v1581_v3 = vadd.f32 1.0, %v3792_v62  ;;  %v1705_v2 = vmul.f32 %v1577_v48, %v3715_v50  ;;  %v3965_v19 = vpop.f32.mrb[30].mxu0  ;;  %v3969_v43 = vpop.f32.mrb[30].mxu1 }
 0x168   :  { %5050 = vst [vmem:[#allocation48_spill] sm:$0xff] %v3955_v26  ;;  %v1222_v59 = vmul.f32 %v1094_v23, %v684_v51  ;;  %v967_v7 = vmul.f32 0.035677407, %v839_v12  ;;  %v1579_v49 = vadd.f32 1.0, %v3768_v28  ;;  %v1583_v26 = vadd.f32 1.0, %v3805_v17  ;;  %v3971_v38 = vpop.f32.mrb[31].mxu0  ;;  %v3973_v46 = vpop.eup %3270 }
 0x169   :  { %3282 = vtanh.f32 %v1220_v11  ;;  %v1221_v62 = vmul.f32 %v1093_v9, %v493_v35  ;;  %v1709_v50 = vmul.f32 %v1581_v3, %v3727_v16  ;;  %v497_v48 = vadd.f32 %v3824_v40, %v3696_v29  ;;  %v3978_v53 = vpop.f32.mrb[31].mxu1  ;;  %v3980_v51 = vpop.eup %3272 }
 0x16a   :  { %3284 = vtanh.f32 %v1222_v59  ;;  %v1095_v28 = vadd.f32 0.7978846, %v967_v7  ;;  %v1707_v17 = vmul.f32 %v1579_v49, %v3717_v52  ;;  %v1711_v6 = vmul.f32 %v1583_v26, %v3729_v25  ;;  %v3984_v23 = vpop.eup %3274 }
 0x16b   :  { %3286 = vtanh.f32 %v1221_v62  ;;  %v1833_v12 = vpack.c.bf16 %v1709_v50, %v1705_v2  ;;  %v840_v35 = vmul.f32 %v497_v48, %v497_v48  ;;  %v3986_v11 = vmul.f32 0.5, %v497_v48 }
 0x16c   :  { %v1223_v16 = vmul.f32 %v1095_v28, %v686_v47  ;;  %v1835_v3 = vpack.c.bf16 %v1711_v6, %v1707_v17  ;;  %v690_v40 = vadd.f32 %v3826_v41, %v3699_v30  ;;  %v499_v9 = vadd.f32 %v3834_v4, %v3702_v31  ;;  %v3998_v2 = vpop.f32.mrb[32].mxu0  ;;  %v4000_v47 = vpop.f32.mrb[32].mxu1 }
 0x16d   :  { %5052 = vst [vmem:[#allocation50_spill] sm:$0xff] %v3986_v11  ;;  %2190 = vmatprep.mubr.bf16.mxu0 %v1833_v12  ;;  %v968_v59 = vmul.f32 0.035677407, %v840_v35  ;;  %v692_v52 = vadd.f32 %v3836_v13, %v3705_v32  ;;  %v501_v25 = vadd.f32 %v3840_v21, %v3696_v29  ;;  %v694_v26 = vadd.f32 %v3842_v24, %v3699_v30  ;;  %v4009_v21 = vpop.f32.mrb[33].mxu0  ;;  %v4011_v62 = vpop.f32.mrb[33].mxu1 }
 0x16e   :  { %5053 = vst [vmem:[#allocation51_spill] sm:$0xff] %v3998_v2  ;;  %5054 = vst [vmem:[#allocation52_spill] sm:$0xff] %v4000_v47  ;;  %v4002_v7 = vpop.eup %3276  ;;  %3288 = vtanh.f32 %v1223_v16  ;;  %2351 = vmatprep.mubr.bf16.mxu1 %v1835_v3  ;;  %v842_v41 = vmul.f32 %v690_v40, %v690_v40  ;;  %v4004_v4 = vmul.f32 0.5, %v690_v40  ;;  %v5056_v13 = vpack.c.bf16 %v3799_v10, %v3771_v0  ;;  %v4022_v35 = vpop.f32.mrb[34].mxu0 }
 0x16f   :  { %v841_v49 = vmul.f32 %v499_v9, %v499_v9  ;;  %5057 = vst [vmem:[#allocation54_spill] sm:$0xff] %v4009_v21  ;;  %5058 = vst [vmem:[#allocation55_spill] sm:$0xff] %v4011_v62  ;;  %v4013_v24 = vpop.eup %3278  ;;  %v1096_v50 = vadd.f32 0.7978846, %v968_v59  ;;  %v5059_v28 = vpack.c.bf16 %v3808_v18, %v3780_v39  ;;  %v4018_v17 = vmul.f32 0.5, %v499_v9  ;;  %v4024_v0 = vpop.f32.mrb[34].mxu1 }
 0x170   :  { %5055 = vst [vmem:[#allocation53_spill] sm:$0xff] %v4004_v4  ;;  %2191 = vmatmul.mubr.bf16.vlgmr.msra.gmra.mrb[64].mxu0 %v5056_v13  ;;  %v843_v6 = vmul.f32 %v692_v52, %v692_v52  ;;  %v4020_v12 = vmul.f32 0.5, %v692_v52  ;;  %5061 = vst [vmem:[#allocation57_spill] sm:$0xff] %v4022_v35  ;;  %v4026_v10 = vpop.eup %3280  ;;  %v970_v16 = vmul.f32 0.035677407, %v842_v41  ;;  %v844_v13 = vmul.f32 %v501_v25, %v501_v25  ;;  %v4030_v59 = vpop.f32.mrb[35].mxu0 }
 0x171   :  { %2352 = vmatmul.mubr.bf16.vlgmr.msra.gmra.mrb[64].mxu1 %v5059_v28  ;;  %5062 = vst [vmem:[#allocation58_spill] sm:$0xff] %v4024_v0  ;;  %v969_v3 = vmul.f32 0.035677407, %v841_v49  ;;  %v4028_v62 = vmul.f32 0.5, %v501_v25  ;;  %5064 = vst [vmem:[#allocation60_spill] sm:$0xff] %v4030_v59  ;;  %v1224_v39 = vmul.f32 %v1096_v50, %v497_v48  ;;  %v846_v28 = vmul.f32 %v694_v26, %v694_v26  ;;  %v4034_v21 = vpop.f32.mrb[35].mxu1 }
 0x172   :  { %5060 = vst [vmem:[#allocation56_spill] sm:$0xff] %v4020_v12  ;;  %v971_v18 = vmul.f32 0.035677407, %v843_v6  ;;  %v4032_v4 = vmul.f32 0.5, %v694_v26  ;;  %5066 = vst [vmem:[#allocation62_spill] sm:$0xff] %v4034_v21  ;;  %v503_v0 = vadd.f32 %v3848_v1, %v3702_v31  ;;  %v696_v48 = vadd.f32 %v3850_v22, %v3705_v32 }
 0x173   :  { %5063 = vst [vmem:[#allocation59_spill] sm:$0xff] %v4028_v62  ;;  %v1098_v11 = vadd.f32 0.7978846, %v970_v16  ;;  %v1097_v35 = vadd.f32 0.7978846, %v969_v3  ;;  %v4038_v41 = vpop.eup %3282  ;;  %3290 = vtanh.f32 %v1224_v39 }
 0x174   :  { %5065 = vst [vmem:[#allocation61_spill] sm:$0xff] %v4032_v4  ;;  %v972_v47 = vmul.f32 0.035677407, %v844_v13  ;;  %v1099_v49 = vadd.f32 0.7978846, %v971_v18  ;;  %v4042_v50 = vpop.eup %3284  ;;  %v845_v21 = vmul.f32 %v503_v0, %v503_v0  ;;  %v4046_v2 = vmul.f32 0.5, %v503_v0 }
 0x175   :  { %v974_v62 = vmul.f32 0.035677407, %v846_v28  ;;  %v1226_v6 = vmul.f32 %v1098_v11, %v690_v40  ;;  %v1225_v59 = vmul.f32 %v1097_v35, %v499_v9  ;;  %v4044_v16 = vpop.eup %3286  ;;  %v847_v1 = vmul.f32 %v696_v48, %v696_v48  ;;  %v4048_v12 = vpop.f32.mrb[36].mxu0 }
 0x176   :  { %v1100_v4 = vadd.f32 0.7978846, %v972_v47  ;;  %v1227_v3 = vmul.f32 %v1099_v49, %v692_v52  ;;  %v4050_v39 = vpop.f32.mrb[36].mxu1  ;;  %v973_v22 = vmul.f32 0.035677407, %v845_v21  ;;  %v4052_v28 = vmul.f32 0.5, %v696_v48 }
 0x177   :  { %v1102_v13 = vadd.f32 0.7978846, %v974_v62  ;;  %5067 = vst [vmem:[#allocation63_spill] sm:$0xff] %v4050_v39  ;;  %3292 = vtanh.f32 %v1226_v6  ;;  %v4054_v11 = vpop.f32.mrb[37].mxu0  ;;  %v4056_v40 = vpop.f32.mrb[37].mxu1  ;;  %v1585_v47 = vadd.f32 1.0, %v3852_v8 }
 0x178   :  { %v1228_v18 = vmul.f32 %v1100_v4, %v501_v25  ;;  %5068 = vst [vmem:[#allocation64_spill] sm:$0xff] %v4054_v11  ;;  %5069 = vst [vmem:[#allocation65_spill] sm:$0xff] %v4056_v40  ;;  %3294 = vtanh.f32 %v1225_v59  ;;  %v975_v52 = vmul.f32 0.035677407, %v847_v1  ;;  %v4059_v62 = vpop.f32.mrb[38].mxu0  ;;  %v4061_v35 = vpop.f32.mrb[38].mxu1 }
 0x179   :  { %v1230_v9 = vmul.f32 %v1102_v13, %v694_v26  ;;  %5070 = vst [vmem:[#allocation66_spill] sm:$0xff] %v4059_v62  ;;  %5071 = vst [vmem:[#allocation67_spill] sm:$0xff] %v4061_v35  ;;  %v4063_v49 = vpop.eup %3288  ;;  %3296 = vtanh.f32 %v1227_v3  ;;  %v1101_v25 = vadd.f32 0.7978846, %v973_v22  ;;  %v1589_v4 = vadd.f32 1.0, %v3892_v14  ;;  %v4067_v6 = vpop.f32.mrb[39].mxu0 }
 0x17a   :  { %v1587_v21 = vadd.f32 1.0, %v3856_v33  ;;  %5072 = vst [vmem:[#allocation68_spill] sm:$0xff] %v4067_v6  ;;  %v4069_v40 = vpop.f32.mrb[39].mxu1  ;;  %3298 = vtanh.f32 %v1228_v18  ;;  %v1103_v26 = vadd.f32 0.7978846, %v975_v52  ;;  %v1713_v8 = vmul.f32 %v1585_v47, %v3749_v57  ;;  %v5074_v14 = vld [vmem:[#allocation17_spill] sm:$0xff] }
 0x17b   :  { %5073 = vst [vmem:[#allocation69_spill] sm:$0xff] %v4069_v40  ;;  %v1591_v59 = vadd.f32 1.0, %v3904_v34  ;;  %3300 = vtanh.f32 %v1230_v9  ;;  %v1229_v13 = vmul.f32 %v1101_v25, %v503_v0  ;;  %v1717_v1 = vmul.f32 %v1589_v4, %v3786_v55  ;;  %v5075_v57 = vld [vmem:[#allocation19_spill] sm:$0xff]  ;;  %v5080_v4 = vld [vmem:[#allocation13_spill] sm:$0xff] }
 0x17c   :  { %v1715_v3 = vmul.f32 %v1587_v21, %v3755_v63  ;;  %v1231_v22 = vmul.f32 %v1103_v26, %v696_v48  ;;  %v507_v33 = vadd.f32 %v3866_v54, %v3696_v29  ;;  %v700_v18 = vadd.f32 %v3868_v45, %v3699_v30  ;;  %v4086_v9 = vpop.f32.mrb[40].mxu0  ;;  %v4088_v25 = vpop.f32.mrb[40].mxu1  ;;  %v5081_v26 = vld [vmem:[#allocation15_spill] sm:$0xff] }
 0x17d   :  { %v1719_v35 = vmul.f32 %v1591_v59, %v5074_v14  ;;  %3302 = vtanh.f32 %v1229_v13  ;;  %v1837_v52 = vpack.c.bf16 %v1717_v1, %v1713_v8  ;;  %v1584_v47 = vadd.f32 1.0, %v5075_v57  ;;  %v4082_v0 = vpop.eup %3290  ;;  %5077 = vst [vmem:[#allocation19_spill] sm:$0xff] %v4086_v9  ;;  %5078 = vst [vmem:[#allocation70_spill] sm:$0xff] %v4088_v25  ;;  %v4096_v59 = vpop.f32.mrb[41].mxu1  ;;  %v5084_v13 = vld [vmem:[#allocation21_spill] sm:$0xff] }
 0x17e   :  { %v1588_v34 = vadd.f32 1.0, %v3860_v5  ;;  %3304 = vtanh.f32 %v1231_v22  ;;  %v848_v63 = vmul.f32 %v507_v33, %v507_v33  ;;  %v4084_v48 = vmul.f32 0.5, %v507_v33  ;;  %v4094_v5 = vpop.f32.mrb[41].mxu0  ;;  %5083 = vst [vmem:[#allocation15_spill] sm:$0xff] %v4096_v59 }
 0x17f   :  { %v1839_v55 = vpack.c.bf16 %v1719_v35, %v1715_v3  ;;  %2198 = vmatprep.mubr.bf16.mxu0 %v1837_v52  ;;  %v850_v54 = vmul.f32 %v700_v18, %v700_v18  ;;  %v4090_v45 = vmul.f32 0.5, %v700_v18  ;;  %v1712_v21 = vmul.f32 %v1584_v47, %v5080_v4  ;;  %5082 = vst [vmem:[#allocation13_spill] sm:$0xff] %v4094_v5  ;;  %v4102_v14 = vpop.f32.mrb[42].mxu0  ;;  %v4104_v52 = vpop.f32.mrb[42].mxu1 }
 0x180   :  { %5076 = vst [vmem:[#allocation17_spill] sm:$0xff] %v4084_v48  ;;  %v1716_v8 = vmul.f32 %v1588_v34, %v5081_v26  ;;  %v976_v35 = vmul.f32 0.035677407, %v848_v63  ;;  %v1586_v1 = vadd.f32 1.0, %v5084_v13  ;;  %v1590_v3 = vadd.f32 1.0, %v3870_v20  ;;  %5085 = vst [vmem:[#allocation21_spill] sm:$0xff] %v4102_v14 }
 0x181   :  { %5079 = vst [vmem:[#allocation71_spill] sm:$0xff] %v4090_v45  ;;  %2359 = vmatprep.mubr.bf16.mxu1 %v1839_v55  ;;  %v509_v22 = vadd.f32 %v3876_v27, %v3702_v31  ;;  %5086 = vst [vmem:[#allocation72_spill] sm:$0xff] %v4104_v52  ;;  %v4106_v57 = vpop.eup %3292  ;;  %v978_v47 = vmul.f32 0.035677407, %v850_v54  ;;  %v702_v4 = vadd.f32 %v3878_v37, %v3705_v32  ;;  %v5087_v55 = vld [vmem:[#allocation27_spill] sm:$0xff]  ;;  %v4112_v26 = vpop.f32.mrb[43].mxu0 }
 0x182   :  { %v1836_v34 = vpack.c.bf16 %v1716_v8, %v1712_v21  ;;  %v511_v63 = vadd.f32 %v5087_v55, %v3696_v29  ;;  %5088 = vst [vmem:[#allocation27_spill] sm:$0xff] %v4112_v26  ;;  %v4114_v20 = vpop.f32.mrb[43].mxu1  ;;  %v4116_v13 = vpop.eup %3294  ;;  %v1104_v27 = vadd.f32 0.7978846, %v976_v35  ;;  %v5090_v14 = vld [vmem:[#allocation14_spill] sm:$0xff]  ;;  %v5091_v52 = vld [vmem:[#allocation16_spill] sm:$0xff] }
 0x183   :  { %5089 = vst [vmem:[#allocation73_spill] sm:$0xff] %v4114_v20  ;;  %v1714_v59 = vmul.f32 %v1586_v1, %v5090_v14  ;;  %v1718_v5 = vmul.f32 %v1590_v3, %v5091_v52  ;;  %v849_v25 = vmul.f32 %v509_v22, %v509_v22  ;;  %v4120_v54 = vpop.eup %3296  ;;  %v1106_v21 = vadd.f32 0.7978846, %v978_v47  ;;  %v5093_v52 = vld [vmem:[#allocation28_spill] sm:$0xff]  ;;  %v5094_v45 = vld [vmem:[#allocation30_spill] sm:$0xff] }
 0x184   :  { %2199 = vmatmul.mubr.bf16.gmra.mrb[68].mxu0 %v1836_v34  ;;  %v4122_v37 = vmul.f32 0.5, %v509_v22  ;;  %v851_v8 = vmul.f32 %v702_v4, %v702_v4  ;;  %v4124_v55 = vmul.f32 0.5, %v702_v4  ;;  %v4126_v26 = vpop.eup %3298  ;;  %v1232_v20 = vmul.f32 %v1104_v27, %v507_v33  ;;  %v4136_v33 = vpop.f32.mrb[44].mxu0 }
 0x185   :  { %v1838_v9 = vpack.c.bf16 %v1718_v5, %v1714_v59  ;;  %v977_v40 = vmul.f32 0.035677407, %v849_v25  ;;  %v852_v35 = vmul.f32 %v511_v63, %v511_v63  ;;  %v4128_v6 = vpop.eup %3300  ;;  %v1234_v1 = vmul.f32 %v1106_v21, %v700_v18  ;;  %5095 = vst [vmem:[#allocation16_spill] sm:$0xff] %v4136_v33  ;;  %v4138_v25 = vpop.f32.mrb[44].mxu1  ;;  %v5102_v33 = vld [vmem:[#allocation31_spill] sm:$0xff] }
 0x186   :  { %v979_v3 = vmul.f32 0.035677407, %v851_v8  ;;  %v4130_v14 = vmul.f32 0.5, %v511_v63  ;;  %v704_v47 = vadd.f32 %v5093_v52, %v3699_v30  ;;  %3306 = vtanh.f32 %v1232_v20  ;;  %5096 = vst [vmem:[#allocation28_spill] sm:$0xff] %v4138_v25  ;;  %v4144_v21 = vpop.f32.mrb[45].mxu0  ;;  %v4146_v20 = vpop.f32.mrb[45].mxu1 }
 0x187   :  { %2360 = vmatmul.mubr.bf16.gmra.mrb[68].mxu1 %v1838_v9  ;;  %v1105_v34 = vadd.f32 0.7978846, %v977_v40  ;;  %v980_v62 = vmul.f32 0.035677407, %v852_v35  ;;  %v513_v11 = vadd.f32 %v5094_v45, %v3702_v31  ;;  %v4140_v5 = vpop.eup %3302  ;;  %3308 = vtanh.f32 %v1234_v1  ;;  %5098 = vst [vmem:[#allocation74_spill] sm:$0xff] %v4144_v21  ;;  %5099 = vst [vmem:[#allocation75_spill] sm:$0xff] %v4146_v20 }
 0x188   :  { %5092 = vst [vmem:[#allocation14_spill] sm:$0xff] %v4130_v14  ;;  %v1107_v18 = vadd.f32 0.7978846, %v979_v3  ;;  %v854_v59 = vmul.f32 %v704_v47, %v704_v47  ;;  %v4142_v27 = vmul.f32 0.5, %v704_v47  ;;  %v4148_v40 = vpop.eup %3304  ;;  %v4152_v52 = vpop.f32.mrb[46].mxu0  ;;  %v1593_v21 = vadd.f32 1.0, %v3936_v36 }
 0x189   :  { %v1233_v9 = vmul.f32 %v1105_v34, %v509_v22  ;;  %v1108_v8 = vadd.f32 0.7978846, %v980_v62  ;;  %v853_v45 = vmul.f32 %v513_v11, %v513_v11  ;;  %v4150_v35 = vmul.f32 0.5, %v513_v11  ;;  %5100 = vst [vmem:[#allocation76_spill] sm:$0xff] %v4152_v52  ;;  %v4154_v25 = vpop.f32.mrb[46].mxu1  ;;  %v4159_v14 = vpop.f32.mrb[47].mxu0 }
 0x18a   :  { %5097 = vst [vmem:[#allocation30_spill] sm:$0xff] %v4142_v27  ;;  %5101 = vst [vmem:[#allocation77_spill] sm:$0xff] %v4154_v25  ;;  %v1235_v1 = vmul.f32 %v1107_v18, %v702_v4  ;;  %v982_v3 = vmul.f32 0.035677407, %v854_v59  ;;  %v706_v27 = vadd.f32 %v5102_v33, %v3705_v32  ;;  %v4161_v20 = vpop.f32.mrb[47].mxu1  ;;  %v1597_v34 = vadd.f32 1.0, %v3973_v46 }
 0x18b   :  { %5103 = vst [vmem:[#allocation31_spill] sm:$0xff] %v4159_v14  ;;  %5104 = vst [vmem:[#allocation78_spill] sm:$0xff] %v4161_v20  ;;  %3310 = vtanh.f32 %v1233_v9  ;;  %v1236_v62 = vmul.f32 %v1108_v8, %v511_v63  ;;  %v981_v22 = vmul.f32 0.035677407, %v853_v45  ;;  %v5105_v18 = vld [vmem:[#allocation22_spill] sm:$0xff]  ;;  %v1595_v20 = vadd.f32 1.0, %v3942_v58 }
 0x18c   :  { %3312 = vtanh.f32 %v1235_v1  ;;  %v1110_v52 = vadd.f32 0.7978846, %v982_v3  ;;  %v855_v48 = vmul.f32 %v706_v27, %v706_v27  ;;  %v4164_v25 = vmul.f32 0.5, %v706_v27  ;;  %v5106_v59 = vld [vmem:[#allocation26_spill] sm:$0xff]  ;;  %v5107_v46 = vld [vmem:[#allocation35_spill] sm:$0xff]  ;;  %v5108_v1 = vld [vmem:[#allocation36_spill] sm:$0xff] }
 0x18d   :  { %3314 = vtanh.f32 %v1236_v62  ;;  %v1109_v4 = vadd.f32 0.7978846, %v981_v22  ;;  %v1721_v33 = vmul.f32 %v1593_v21, %v5105_v18  ;;  %v1725_v36 = vmul.f32 %v1597_v34, %v5106_v59  ;;  %v4174_v62 = vpop.f32.mrb[48].mxu0  ;;  %v4176_v22 = vpop.f32.mrb[48].mxu1 }
 0x18e   :  { %v1238_v39 = vmul.f32 %v1110_v52, %v704_v47  ;;  %v983_v14 = vmul.f32 0.035677407, %v855_v48  ;;  %v1599_v63 = vadd.f32 1.0, %v3980_v51  ;;  %v517_v45 = vadd.f32 %v5107_v46, %v3696_v29  ;;  %5109 = vst [vmem:[#allocation22_spill] sm:$0xff] %v4174_v62  ;;  %5110 = vst [vmem:[#allocation26_spill] sm:$0xff] %v4176_v22  ;;  %v5111_v47 = vld [vmem:[#allocation23_spill] sm:$0xff] }
 0x18f   :  { %v1237_v9 = vmul.f32 %v1109_v4, %v513_v11  ;;  %v1841_v8 = vpack.c.bf16 %v1725_v36, %v1721_v33  ;;  %v710_v3 = vadd.f32 %v5108_v1, %v3699_v30  ;;  %v1723_v48 = vmul.f32 %v1595_v20, %v5111_v47  ;;  %v5112_v52 = vld [vmem:[#allocation29_spill] sm:$0xff]  ;;  %v4180_v34 = vpop.f32.mrb[49].mxu0  ;;  %v4182_v51 = vpop.f32.mrb[49].mxu1 }
 0x190   :  { %3316 = vtanh.f32 %v1238_v39  ;;  %v1111_v21 = vadd.f32 0.7978846, %v983_v14  ;;  %v1727_v58 = vmul.f32 %v1599_v63, %v5112_v52  ;;  %5113 = vst [vmem:[#allocation35_spill] sm:$0xff] %v4180_v34  ;;  %5114 = vst [vmem:[#allocation36_spill] sm:$0xff] %v4182_v51  ;;  %v4184_v11 = vpop.eup %3306  ;;  %v856_v4 = vmul.f32 %v517_v45, %v517_v45  ;;  %v4188_v59 = vpop.f32.mrb[50].mxu0  ;;  %v5120_v46 = vld [vmem:[#allocation37_spill] sm:$0xff] }
 0x191   :  { %3318 = vtanh.f32 %v1237_v9  ;;  %2206 = vmatprep.mubr.bf16.mxu0 %v1841_v8  ;;  %v4186_v18 = vmul.f32 0.5, %v517_v45  ;;  %v858_v33 = vmul.f32 %v710_v3, %v710_v3  ;;  %5116 = vst [vmem:[#allocation29_spill] sm:$0xff] %v4188_v59  ;;  %v4190_v39 = vpop.f32.mrb[50].mxu1  ;;  %v4192_v14 = vpop.eup %3308  ;;  %v4194_v63 = vmul.f32 0.5, %v710_v3 }
 0x192   :  { %5117 = vst [vmem:[#allocation79_spill] sm:$0xff] %v4190_v39  ;;  %5118 = vst [vmem:[#allocation80_spill] sm:$0xff] %v4192_v14  ;;  %v1239_v20 = vmul.f32 %v1111_v21, %v706_v27  ;;  %v1843_v36 = vpack.c.bf16 %v1727_v58, %v1723_v48  ;;  %v1592_v1 = vadd.f32 1.0, %v5120_v46  ;;  %v4197_v47 = vpop.f32.mrb[51].mxu0  ;;  %v4199_v9 = vpop.f32.mrb[51].mxu1  ;;  %v1596_v51 = vadd.f32 1.0, %v3944_v44 }
 0x193   :  { %5115 = vst [vmem:[#allocation23_spill] sm:$0xff] %v4186_v18  ;;  %5119 = vst [vmem:[#allocation81_spill] sm:$0xff] %v4194_v63  ;;  %v984_v8 = vmul.f32 0.035677407, %v856_v4  ;;  %v986_v52 = vmul.f32 0.035677407, %v858_v33 }
 0x194   :  { %5121 = vst [vmem:[#allocation37_spill] sm:$0xff] %v4197_v47  ;;  %5122 = vst [vmem:[#allocation82_spill] sm:$0xff] %v4199_v9  ;;  %v1594_v59 = vadd.f32 1.0, %v3920_v15  ;;  %3320 = vtanh.f32 %v1239_v20  ;;  %2367 = vmatprep.mubr.bf16.mxu1 %v1843_v36  ;;  %v5123_v39 = vld [vmem:[#allocation18_spill] sm:$0xff]  ;;  %v1598_v27 = vadd.f32 1.0, %v3950_v42  ;;  %v5124_v21 = vld [vmem:[#allocation39_spill] sm:$0xff] }
 0x195   :  { %v1720_v34 = vmul.f32 %v1592_v1, %v5123_v39  ;;  %v519_v48 = vadd.f32 %v5124_v21, %v3702_v31  ;;  %v4207_v58 = vpop.eup %3310  ;;  %v1112_v46 = vadd.f32 0.7978846, %v984_v8  ;;  %v1114_v47 = vadd.f32 0.7978846, %v986_v52  ;;  %v5125_v9 = vld [vmem:[#allocation24_spill] sm:$0xff]  ;;  %v5127_v15 = vld [vmem:[#allocation25_spill] sm:$0xff] }
 0x196   :  { %v1724_v4 = vmul.f32 %v1596_v51, %v5125_v9  ;;  %v5126_v33 = vld [vmem:[#allocation20_spill] sm:$0xff]  ;;  %v4211_v44 = vpop.eup %3312  ;;  %v1726_v20 = vmul.f32 %v1598_v27, %v5127_v15  ;;  %v5130_v52 = vld [vmem:[#allocation41_spill] sm:$0xff]  ;;  %v4228_v14 = vpop.f32.mrb[52].mxu0 }
 0x197   :  { %v1722_v22 = vmul.f32 %v1594_v59, %v5126_v33  ;;  %v857_v36 = vmul.f32 %v519_v48, %v519_v48  ;;  %v4214_v62 = vmul.f32 0.5, %v519_v48  ;;  %v5129_v42 = vld [vmem:[#allocation40_spill] sm:$0xff]  ;;  %v4218_v1 = vpop.eup %3314  ;;  %v1240_v21 = vmul.f32 %v1112_v46, %v517_v45  ;;  %5134 = vst [vmem:[#allocation20_spill] sm:$0xff] %v4228_v14 }
 0x198   :  { %v712_v39 = vadd.f32 %v5129_v42, %v3705_v32  ;;  %v1242_v63 = vmul.f32 %v1114_v47, %v710_v3  ;;  %v1840_v8 = vpack.c.bf16 %v1724_v4, %v1720_v34  ;;  %v521_v51 = vadd.f32 %v5130_v52, %v3696_v29  ;;  %v5133_v42 = vld [vmem:[#allocation42_spill] sm:$0xff]  ;;  %v5136_v34 = vld [vmem:[#allocation43_spill] sm:$0xff] }
 0x199   :  { %5128 = vst [vmem:[#allocation18_spill] sm:$0xff] %v4214_v62  ;;  %v1842_v9 = vpack.c.bf16 %v1726_v20, %v1722_v22  ;;  %v985_v59 = vmul.f32 0.035677407, %v857_v36  ;;  %3322 = vtanh.f32 %v1240_v21  ;;  %v714_v62 = vadd.f32 %v5133_v42, %v3699_v30 }
 0x19a   :  { %v859_v33 = vmul.f32 %v712_v39, %v712_v39  ;;  %v4222_v18 = vmul.f32 0.5, %v712_v39  ;;  %2207 = vmatmul.mubr.bf16.gmra.mrb[72].mxu0 %v1840_v8  ;;  %v860_v27 = vmul.f32 %v521_v51, %v521_v51  ;;  %v4224_v15 = vmul.f32 0.5, %v521_v51  ;;  %v4230_v45 = vpop.eup %3316  ;;  %v4240_v8 = vpop.f32.mrb[52].mxu1 }
 0x19b   :  { %5135 = vst [vmem:[#allocation25_spill] sm:$0xff] %v4230_v45  ;;  %3324 = vtanh.f32 %v1242_v63  ;;  %2368 = vmatmul.mubr.bf16.gmra.mrb[72].mxu1 %v1842_v9  ;;  %v1113_v3 = vadd.f32 0.7978846, %v985_v59  ;;  %v523_v47 = vadd.f32 %v5136_v34, %v3702_v31  ;;  %v4234_v46 = vpop.eup %3318  ;;  %v862_v20 = vmul.f32 %v714_v62, %v714_v62  ;;  %5138 = vst [vmem:[#allocation41_spill] sm:$0xff] %v4240_v8 }
 0x19c   :  { %5131 = vst [vmem:[#allocation39_spill] sm:$0xff] %v4222_v18  ;;  %5132 = vst [vmem:[#allocation24_spill] sm:$0xff] %v4224_v15  ;;  %v987_v22 = vmul.f32 0.035677407, %v859_v33  ;;  %v988_v4 = vmul.f32 0.035677407, %v860_v27  ;;  %v716_v21 = vadd.f32 %v3934_v60, %v3705_v32 }
 0x19d   :  { %v4236_v36 = vmul.f32 0.5, %v714_v62  ;;  %v1241_v52 = vmul.f32 %v1113_v3, %v519_v48  ;;  %v861_v63 = vmul.f32 %v523_v47, %v523_v47  ;;  %v4242_v9 = vmul.f32 0.5, %v523_v47  ;;  %v4250_v3 = vpop.f32.mrb[53].mxu0 }
 0x19e   :  { %v1115_v42 = vadd.f32 0.7978846, %v987_v22  ;;  %v1116_v59 = vadd.f32 0.7978846, %v988_v4  ;;  %v990_v33 = vmul.f32 0.035677407, %v862_v20  ;;  %v863_v14 = vmul.f32 %v716_v21, %v716_v21  ;;  %v4246_v15 = vpop.eup %3320 }
 0x19f   :  { %5137 = vst [vmem:[#allocation40_spill] sm:$0xff] %v4236_v36  ;;  %5139 = vst [vmem:[#allocation42_spill] sm:$0xff] %v4242_v9  ;;  %v4244_v34 = vmul.f32 0.5, %v716_v21  ;;  %3326 = vtanh.f32 %v1241_v52  ;;  %v989_v36 = vmul.f32 0.035677407, %v861_v63  ;;  %v1601_v18 = vadd.f32 1.0, %v4013_v24 }
 0x1a0   :  { %v1243_v27 = vmul.f32 %v1115_v42, %v712_v39  ;;  %v1244_v60 = vmul.f32 %v1116_v59, %v521_v51  ;;  %v1118_v45 = vadd.f32 0.7978846, %v990_v33  ;;  %v991_v8 = vmul.f32 0.035677407, %v863_v14  ;;  %5141 = vst [vmem:[#allocation83_spill] sm:$0xff] %v4250_v3  ;;  %v5142_v4 = vld [vmem:[#allocation34_spill] sm:$0xff] }
 0x1a1   :  { %5140 = vst [vmem:[#allocation43_spill] sm:$0xff] %v4244_v34  ;;  %v1605_v48 = vadd.f32 1.0, %v4044_v16  ;;  %v1117_v22 = vadd.f32 0.7978846, %v989_v36  ;;  %v1729_v20 = vmul.f32 %v1601_v18, %v5142_v4  ;;  %v1603_v34 = vadd.f32 1.0, %v4026_v10  ;;  %v5143_v39 = vld [vmem:[#allocation46_spill] sm:$0xff] }
 0x1a2   :  { %3328 = vtanh.f32 %v1243_v27  ;;  %v1246_v9 = vmul.f32 %v1118_v45, %v714_v62  ;;  %v1119_v52 = vadd.f32 0.7978846, %v991_v8  ;;  %v1607_v24 = vadd.f32 1.0, %v4063_v49  ;;  %v5144_v51 = vld [vmem:[#allocation38_spill] sm:$0xff]  ;;  %v5145_v16 = vld [vmem:[#allocation47_spill] sm:$0xff]  ;;  %v5146_v10 = vld [vmem:[#allocation49_spill] sm:$0xff] }
 0x1a3   :  { %3330 = vtanh.f32 %v1244_v60  ;;  %v1733_v42 = vmul.f32 %v1605_v48, %v5143_v39  ;;  %v1245_v63 = vmul.f32 %v1117_v22, %v523_v47  ;;  %v1731_v14 = vmul.f32 %v1603_v34, %v5144_v51  ;;  %v4259_v33 = vpop.eup %3322  ;;  %v4263_v62 = vpop.f32.mrb[53].mxu1  ;;  %v5148_v47 = vld [vmem:[#allocation48_spill] sm:$0xff] }
 0x1a4   :  { %v527_v59 = vadd.f32 %v5145_v16, %v3696_v29  ;;  %3332 = vtanh.f32 %v1246_v9  ;;  %v1247_v36 = vmul.f32 %v1119_v52, %v716_v21  ;;  %v720_v27 = vadd.f32 %v5146_v10, %v3699_v30  ;;  %5147 = vst [vmem:[#allocation34_spill] sm:$0xff] %v4263_v62  ;;  %v4270_v60 = vpop.f32.mrb[54].mxu0  ;;  %v4272_v48 = vpop.f32.mrb[54].mxu1  ;;  %v5153_v51 = vld [vmem:[#allocation32_spill] sm:$0xff] }
 0x1a5   :  { %v1845_v18 = vpack.c.bf16 %v1733_v42, %v1729_v20  ;;  %v4265_v45 = vpop.eup %3324  ;;  %3334 = vtanh.f32 %v1245_v63  ;;  %v1735_v49 = vmul.f32 %v1607_v24, %v5148_v47  ;;  %5149 = vst [vmem:[#allocation46_spill] sm:$0xff] %v4270_v60  ;;  %5150 = vst [vmem:[#allocation38_spill] sm:$0xff] %v4272_v48  ;;  %v1600_v22 = vadd.f32 1.0, %v3984_v23  ;;  %v4277_v4 = vpop.f32.mrb[55].mxu0  ;;  %v5154_v47 = vld [vmem:[#allocation44_spill] sm:$0xff] }
 0x1a6   :  { %v864_v8 = vmul.f32 %v527_v59, %v527_v59  ;;  %v4268_v34 = vmul.f32 0.5, %v527_v59  ;;  %3336 = vtanh.f32 %v1247_v36  ;;  %v866_v21 = vmul.f32 %v720_v27, %v720_v27  ;;  %5151 = vst [vmem:[#allocation47_spill] sm:$0xff] %v4277_v4  ;;  %v4279_v20 = vpop.f32.mrb[55].mxu1 }
 0x1a7   :  { %2214 = vmatprep.mubr.bf16.mxu0 %v1845_v18  ;;  %v4274_v9 = vmul.f32 0.5, %v720_v27  ;;  %5152 = vst [vmem:[#allocation49_spill] sm:$0xff] %v4279_v20  ;;  %v1847_v52 = vpack.c.bf16 %v1735_v49, %v1731_v14  ;;  %v1604_v42 = vadd.f32 1.0, %v4038_v41  ;;  %v1602_v63 = vadd.f32 1.0, %v4002_v7  ;;  %v5155_v14 = vld [vmem:[#allocation33_spill] sm:$0xff] }
 0x1a8   :  { %v992_v39 = vmul.f32 0.035677407, %v864_v8  ;;  %v994_v24 = vmul.f32 0.035677407, %v866_v21  ;;  %v1728_v16 = vmul.f32 %v1600_v22, %v5153_v51  ;;  %v1606_v36 = vadd.f32 1.0, %v4042_v50  ;;  %v5156_v8 = vld [vmem:[#allocation45_spill] sm:$0xff] }
 0x1a9   :  { %v529_v18 = vadd.f32 %v3959_v56, %v3702_v31  ;;  %v4287_v10 = vpop.eup %3326  ;;  %2375 = vmatprep.mubr.bf16.mxu1 %v1847_v52  ;;  %v1732_v20 = vmul.f32 %v1604_v42, %v5154_v47  ;;  %v1730_v49 = vmul.f32 %v1602_v63, %v5155_v14  ;;  %v722_v41 = vadd.f32 %v3963_v61, %v3705_v32 }
 0x1aa   :  { %v1120_v23 = vadd.f32 0.7978846, %v992_v39  ;;  %v1122_v7 = vadd.f32 0.7978846, %v994_v24  ;;  %v1734_v21 = vmul.f32 %v1606_v36, %v5156_v8  ;;  %v531_v61 = vadd.f32 %v3965_v19, %v3696_v29 }
 0x1ab   :  { %v865_v22 = vmul.f32 %v529_v18, %v529_v18  ;;  %v4294_v51 = vmul.f32 0.5, %v529_v18  ;;  %v1844_v4 = vpack.c.bf16 %v1732_v20, %v1728_v16  ;;  %v867_v48 = vmul.f32 %v722_v41, %v722_v41  ;;  %v4308_v20 = vpop.f32.mrb[56].mxu0 }
 0x1ac   :  { %v4296_v50 = vpop.eup %3328  ;;  %v1248_v56 = vmul.f32 %v1120_v23, %v527_v59  ;;  %v4298_v52 = vmul.f32 0.5, %v722_v41  ;;  %v1250_v42 = vmul.f32 %v1122_v7, %v720_v27  ;;  %v1846_v63 = vpack.c.bf16 %v1734_v21, %v1730_v49  ;;  %5157 = vst [vmem:[#allocation48_spill] sm:$0xff] %v4308_v20  ;;  %v4318_v7 = vpop.f32.mrb[56].mxu1 }
 0x1ad   :  { %v4300_v39 = vpop.eup %3330  ;;  %v993_v47 = vmul.f32 0.035677407, %v865_v22  ;;  %2215 = vmatmul.mubr.bf16.gmra.mrb[76].mxu0 %v1844_v4  ;;  %v995_v24 = vmul.f32 0.035677407, %v867_v48  ;;  %v724_v36 = vadd.f32 %v3969_v43, %v3699_v30  ;;  %v533_v59 = vadd.f32 %v3971_v38, %v3702_v31  ;;  %5159 = vst [vmem:[#allocation44_spill] sm:$0xff] %v4318_v7 }
 0x1ae   :  { %3338 = vtanh.f32 %v1248_v56  ;;  %v4310_v16 = vpop.eup %3332  ;;  %2376 = vmatmul.mubr.bf16.gmra.mrb[76].mxu1 %v1846_v63  ;;  %v868_v23 = vmul.f32 %v531_v61, %v531_v61  ;;  %v4312_v14 = vmul.f32 0.5, %v531_v61  ;;  %v726_v56 = vadd.f32 %v3978_v53, %v3705_v32 }
 0x1af   :  { %3340 = vtanh.f32 %v1250_v42  ;;  %v1121_v27 = vadd.f32 0.7978846, %v993_v47  ;;  %v4314_v19 = vpop.eup %3334  ;;  %v1123_v4 = vadd.f32 0.7978846, %v995_v24  ;;  %v870_v48 = vmul.f32 %v724_v36, %v724_v36 }
 0x1b0   :  { %v4316_v49 = vmul.f32 0.5, %v724_v36  ;;  %v869_v43 = vmul.f32 %v533_v59, %v533_v59  ;;  %v4320_v38 = vpop.eup %3336  ;;  %v996_v21 = vmul.f32 0.035677407, %v868_v23  ;;  %v4322_v22 = vmul.f32 0.5, %v533_v59 }
 0x1b1   :  { %v1249_v8 = vmul.f32 %v1121_v27, %v529_v18  ;;  %v1251_v42 = vmul.f32 %v1123_v4, %v722_v41  ;;  %v998_v63 = vmul.f32 0.035677407, %v870_v48  ;;  %v1609_v24 = vadd.f32 1.0, %v4116_v13  ;;  %v4330_v27 = vpop.f32.mrb[57].mxu0 }
 0x1b2   :  { %5158 = vst [vmem:[#allocation32_spill] sm:$0xff] %v4316_v49  ;;  %v997_v47 = vmul.f32 0.035677407, %v869_v43  ;;  %v1124_v20 = vadd.f32 0.7978846, %v996_v21  ;;  %v871_v60 = vmul.f32 %v726_v56, %v726_v56  ;;  %v4327_v62 = vmul.f32 0.5, %v726_v56 }
 0x1b3   :  { %3342 = vtanh.f32 %v1249_v8  ;;  %v1126_v7 = vadd.f32 0.7978846, %v998_v63  ;;  %v1613_v18 = vadd.f32 1.0, %v4140_v5  ;;  %5160 = vst [vmem:[#allocation33_spill] sm:$0xff] %v4330_v27  ;;  %v1737_v53 = vmul.f32 %v1609_v24, %v4018_v17  ;;  %v5161_v21 = vld [vmem:[#allocation56_spill] sm:$0xff]  ;;  %v5162_v5 = vld [vmem:[#allocation51_spill] sm:$0xff] }
 0x1b4   :  { %3344 = vtanh.f32 %v1251_v42  ;;  %v1125_v3 = vadd.f32 0.7978846, %v997_v47  ;;  %v1252_v23 = vmul.f32 %v1124_v20, %v531_v61  ;;  %v999_v49 = vmul.f32 0.035677407, %v871_v60  ;;  %v4344_v61 = vpop.f32.mrb[57].mxu1  ;;  %v4350_v20 = vpop.f32.mrb[58].mxu0 }
 0x1b5   :  { %v1611_v41 = vadd.f32 1.0, %v4120_v54  ;;  %v1254_v4 = vmul.f32 %v1126_v7, %v724_v36  ;;  %v1741_v48 = vmul.f32 %v1613_v18, %v4046_v2  ;;  %v1615_v43 = vadd.f32 1.0, %v4148_v40  ;;  %v5163_v54 = vld [vmem:[#allocation52_spill] sm:$0xff]  ;;  %5164 = vst [vmem:[#allocation45_spill] sm:$0xff] %v4344_v61  ;;  %5166 = vst [vmem:[#allocation51_spill] sm:$0xff] %v4350_v20 }
 0x1b6   :  { %v1253_v13 = vmul.f32 %v1125_v3, %v533_v59  ;;  %3346 = vtanh.f32 %v1252_v23  ;;  %v1127_v8 = vadd.f32 0.7978846, %v999_v49  ;;  %v537_v63 = vadd.f32 %v5162_v5, %v3696_v29  ;;  %v4352_v49 = vpop.f32.mrb[58].mxu1  ;;  %v4357_v23 = vpop.f32.mrb[59].mxu0 }
 0x1b7   :  { %v1739_v42 = vmul.f32 %v1611_v41, %v5161_v21  ;;  %3348 = vtanh.f32 %v1254_v4  ;;  %v1849_v60 = vpack.c.bf16 %v1741_v48, %v1737_v53  ;;  %v1743_v17 = vmul.f32 %v1615_v43, %v4052_v28  ;;  %5167 = vst [vmem:[#allocation52_spill] sm:$0xff] %v4352_v49  ;;  %5169 = vst [vmem:[#allocation85_spill] sm:$0xff] %v4357_v23  ;;  %v4359_v53 = vpop.f32.mrb[59].mxu1  ;;  %v5171_v48 = vld [vmem:[#allocation50_spill] sm:$0xff] }
 0x1b8   :  { %v4339_v47 = vpop.eup %3338  ;;  %v730_v3 = vadd.f32 %v5163_v54, %v3699_v30  ;;  %3350 = vtanh.f32 %v1253_v13  ;;  %v1255_v40 = vmul.f32 %v1127_v8, %v726_v56  ;;  %v872_v36 = vmul.f32 %v537_v63, %v537_v63  ;;  %5170 = vst [vmem:[#allocation86_spill] sm:$0xff] %v4359_v53  ;;  %v5172_v21 = vld [vmem:[#allocation54_spill] sm:$0xff]  ;;  %v5174_v54 = vld [vmem:[#allocation53_spill] sm:$0xff] }
 0x1b9   :  { %v4346_v2 = vpop.eup %3340  ;;  %v4348_v59 = vmul.f32 0.5, %v537_v63  ;;  %2222 = vmatprep.mubr.bf16.mxu0 %v1849_v60  ;;  %v1851_v7 = vpack.c.bf16 %v1743_v17, %v1739_v42  ;;  %v1608_v18 = vadd.f32 1.0, %v4082_v0  ;;  %v1612_v41 = vadd.f32 1.0, %v4126_v26  ;;  %v5173_v60 = vld [vmem:[#allocation59_spill] sm:$0xff] }
 0x1ba   :  { %v874_v24 = vmul.f32 %v730_v3, %v730_v3  ;;  %v4354_v28 = vmul.f32 0.5, %v730_v3  ;;  %3352 = vtanh.f32 %v1255_v40  ;;  %v1000_v56 = vmul.f32 0.035677407, %v872_v36  ;;  %v5175_v26 = vld [vmem:[#allocation55_spill] sm:$0xff] }
 0x1bb   :  { %5165 = vst [vmem:[#allocation56_spill] sm:$0xff] %v4348_v59  ;;  %v1610_v4 = vadd.f32 1.0, %v4106_v57  ;;  %2383 = vmatprep.mubr.bf16.mxu1 %v1851_v7  ;;  %v1736_v43 = vmul.f32 %v1608_v18, %v5171_v48  ;;  %v1614_v8 = vadd.f32 1.0, %v4128_v6  ;;  %v539_v42 = vadd.f32 %v5172_v21, %v3702_v31 }
 0x1bc   :  { %5168 = vst [vmem:[#allocation84_spill] sm:$0xff] %v4354_v28  ;;  %v1002_v13 = vmul.f32 0.035677407, %v874_v24  ;;  %v1128_v5 = vadd.f32 0.7978846, %v1000_v56  ;;  %v1740_v17 = vmul.f32 %v1612_v41, %v5173_v60  ;;  %v732_v36 = vadd.f32 %v5175_v26, %v3705_v32  ;;  %v5176_v24 = vld [vmem:[#allocation61_spill] sm:$0xff] }
 0x1bd   :  { %v4367_v0 = vpop.eup %3342  ;;  %v1738_v40 = vmul.f32 %v1610_v4, %v5174_v54  ;;  %v1742_v18 = vmul.f32 %v1614_v8, %v5176_v24  ;;  %v873_v48 = vmul.f32 %v539_v42, %v539_v42  ;;  %v4376_v6 = vmul.f32 0.5, %v539_v42  ;;  %v5177_v4 = vld [vmem:[#allocation57_spill] sm:$0xff]  ;;  %v5178_v8 = vld [vmem:[#allocation58_spill] sm:$0xff] }
 0x1be   :  { %v4373_v57 = vpop.eup %3344  ;;  %v1130_v7 = vadd.f32 0.7978846, %v1002_v13  ;;  %v1256_v53 = vmul.f32 %v1128_v5, %v537_v63  ;;  %v1848_v21 = vpack.c.bf16 %v1740_v17, %v1736_v43  ;;  %v875_v23 = vmul.f32 %v732_v36, %v732_v36  ;;  %v5179_v63 = vld [vmem:[#allocation60_spill] sm:$0xff]  ;;  %v4388_v5 = vpop.f32.mrb[60].mxu0 }
 0x1bf   :  { %v4378_v49 = vmul.f32 0.5, %v732_v36  ;;  %v1850_v41 = vpack.c.bf16 %v1742_v18, %v1738_v40  ;;  %v1001_v60 = vmul.f32 0.035677407, %v873_v48  ;;  %v541_v54 = vadd.f32 %v5177_v4, %v3696_v29  ;;  %5180 = vst [vmem:[#allocation50_spill] sm:$0xff] %v4388_v5  ;;  %v4398_v4 = vpop.f32.mrb[60].mxu1 }
 0x1c0   :  { %v1258_v56 = vmul.f32 %v1130_v7, %v730_v3  ;;  %v4382_v26 = vpop.eup %3346  ;;  %3354 = vtanh.f32 %v1256_v53  ;;  %2223 = vmatmul.mubr.bf16.gmra.mrb[80].mxu0 %v1848_v21  ;;  %v1003_v13 = vmul.f32 0.035677407, %v875_v23  ;;  %v734_v24 = vadd.f32 %v5178_v8, %v3699_v30  ;;  %5183 = vst [vmem:[#allocation53_spill] sm:$0xff] %v4398_v4  ;;  %v4410_v4 = vpop.f32.mrb[61].mxu0 }
 0x1c1   :  { %v543_v43 = vadd.f32 %v5179_v63, %v3702_v31  ;;  %v4390_v17 = vpop.eup %3348  ;;  %2384 = vmatmul.mubr.bf16.gmra.mrb[80].mxu1 %v1850_v41  ;;  %v1129_v3 = vadd.f32 0.7978846, %v1001_v60  ;;  %v876_v40 = vmul.f32 %v541_v54, %v541_v54  ;;  %v4392_v7 = vmul.f32 0.5, %v541_v54  ;;  %5185 = vst [vmem:[#allocation55_spill] sm:$0xff] %v4410_v4 }
 0x1c2   :  { %3356 = vtanh.f32 %v1258_v56  ;;  %v4394_v18 = vpop.eup %3350  ;;  %v1131_v53 = vadd.f32 0.7978846, %v1003_v13  ;;  %v878_v23 = vmul.f32 %v734_v24, %v734_v24  ;;  %v4396_v48 = vmul.f32 0.5, %v734_v24  ;;  %v5184_v56 = vld [vmem:[#allocation62_spill] sm:$0xff] }
 0x1c3   :  { %5181 = vst [vmem:[#allocation54_spill] sm:$0xff] %v4392_v7  ;;  %v877_v21 = vmul.f32 %v543_v43, %v543_v43  ;;  %v1257_v8 = vmul.f32 %v1129_v3, %v539_v42  ;;  %v1004_v63 = vmul.f32 0.035677407, %v876_v40  ;;  %v4400_v5 = vmul.f32 0.5, %v543_v43 }
 0x1c4   :  { %5182 = vst [vmem:[#allocation59_spill] sm:$0xff] %v4396_v48  ;;  %v736_v41 = vadd.f32 %v5184_v56, %v3705_v32  ;;  %v4404_v60 = vpop.eup %3352  ;;  %v1259_v20 = vmul.f32 %v1131_v53, %v732_v36  ;;  %v1006_v61 = vmul.f32 0.035677407, %v878_v23  ;;  %v1617_v13 = vadd.f32 1.0, %v4207_v58 }
 0x1c5   :  { %v1005_v27 = vmul.f32 0.035677407, %v877_v21  ;;  %3358 = vtanh.f32 %v1257_v8  ;;  %v1132_v28 = vadd.f32 0.7978846, %v1004_v63  ;;  %v1621_v40 = vadd.f32 1.0, %v4234_v46 }
 0x1c6   :  { %v879_v48 = vmul.f32 %v736_v41, %v736_v41  ;;  %v4407_v7 = vmul.f32 0.5, %v736_v41  ;;  %3360 = vtanh.f32 %v1259_v20  ;;  %v1134_v42 = vadd.f32 0.7978846, %v1006_v61 }
 0x1c7   :  { %v1133_v3 = vadd.f32 0.7978846, %v1005_v27  ;;  %v1260_v56 = vmul.f32 %v1132_v28, %v541_v54  ;;  %v1745_v36 = vmul.f32 %v1617_v13, %v4122_v37  ;;  %v1619_v53 = vadd.f32 1.0, %v4211_v44  ;;  %v5186_v44 = vld [vmem:[#allocation63_spill] sm:$0xff] }
 0x1c8   :  { %v1007_v59 = vmul.f32 0.035677407, %v879_v48  ;;  %v1262_v23 = vmul.f32 %v1134_v42, %v734_v24  ;;  %v1749_v21 = vmul.f32 %v1621_v40, %v4150_v35  ;;  %v1623_v8 = vadd.f32 1.0, %v4246_v15  ;;  %v4424_v24 = vpop.f32.mrb[61].mxu1 }
 0x1c9   :  { %v1261_v58 = vmul.f32 %v1133_v3, %v543_v43  ;;  %3362 = vtanh.f32 %v1260_v56  ;;  %v1747_v27 = vmul.f32 %v1619_v53, %v4124_v55  ;;  %v547_v46 = vadd.f32 %v4048_v12, %v3696_v29  ;;  %5187 = vst [vmem:[#allocation61_spill] sm:$0xff] %v4424_v24  ;;  %v4430_v43 = vpop.f32.mrb[62].mxu0  ;;  %v4432_v12 = vpop.f32.mrb[62].mxu1  ;;  %v5194_v56 = vld [vmem:[#allocation80_spill] sm:$0xff] }
 0x1ca   :  { %v1135_v20 = vadd.f32 0.7978846, %v1007_v59  ;;  %v4419_v61 = vpop.eup %3354  ;;  %3364 = vtanh.f32 %v1262_v23  ;;  %v1853_v28 = vpack.c.bf16 %v1749_v21, %v1745_v36  ;;  %v1751_v37 = vmul.f32 %v1623_v8, %v4164_v25  ;;  %5189 = vst [vmem:[#allocation58_spill] sm:$0xff] %v4430_v43  ;;  %5190 = vst [vmem:[#allocation60_spill] sm:$0xff] %v4432_v12  ;;  %v4437_v42 = vpop.f32.mrb[63].mxu0  ;;  %v5195_v23 = vld [vmem:[#allocation17_spill] sm:$0xff] }
 0x1cb   :  { %v740_v54 = vadd.f32 %v5186_v44, %v3699_v30  ;;  %3366 = vtanh.f32 %v1261_v58  ;;  %v880_v59 = vmul.f32 %v547_v46, %v547_v46  ;;  %v4428_v55 = vmul.f32 0.5, %v547_v46  ;;  %5192 = vst [vmem:[#allocation63_spill] sm:$0xff] %v4437_v42  ;;  %v4439_v3 = vpop.f32.mrb[63].mxu1  ;;  %v5196_v21 = vld [vmem:[#allocation25_spill] sm:$0xff] }
 0x1cc   :  { %v4426_v35 = vpop.eup %3356  ;;  %v1263_v15 = vmul.f32 %v1135_v20, %v736_v41  ;;  %2230 = vmatprep.mubr.bf16.mxu0 %v1853_v28  ;;  %v1855_v48 = vpack.c.bf16 %v1751_v37, %v1747_v27  ;;  %v1616_v13 = vadd.f32 1.0, %v4184_v11  ;;  %5193 = vst [vmem:[#allocation87_spill] sm:$0xff] %v4439_v3  ;;  %v1620_v40 = vadd.f32 1.0, %v4218_v1  ;;  %v5197_v20 = vld [vmem:[#allocation64_spill] sm:$0xff]  ;;  %v5198_v37 = vld [vmem:[#allocation14_spill] sm:$0xff]  ;;  %v5200_v1 = vld [vmem:[#allocation65_spill] sm:$0xff] }
 0x1cd   :  { %5188 = vst [vmem:[#allocation57_spill] sm:$0xff] %v4428_v55  ;;  %v882_v63 = vmul.f32 %v740_v54, %v740_v54  ;;  %v4434_v25 = vmul.f32 0.5, %v740_v54  ;;  %v1008_v41 = vmul.f32 0.035677407, %v880_v59  ;;  %v1618_v36 = vadd.f32 1.0, %v5194_v56 }
 0x1ce   :  { %3368 = vtanh.f32 %v1263_v15  ;;  %2391 = vmatprep.mubr.bf16.mxu1 %v1855_v48  ;;  %v1744_v58 = vmul.f32 %v1616_v13, %v5195_v23  ;;  %v1622_v8 = vadd.f32 1.0, %v5196_v21  ;;  %v549_v27 = vadd.f32 %v5197_v20, %v3702_v31  ;;  %v5199_v15 = vld [vmem:[#allocation71_spill] sm:$0xff] }
 0x1cf   :  { %5191 = vst [vmem:[#allocation62_spill] sm:$0xff] %v4434_v25  ;;  %v1010_v53 = vmul.f32 0.035677407, %v882_v63  ;;  %v4447_v11 = vpop.eup %3358  ;;  %v1136_v28 = vadd.f32 0.7978846, %v1008_v41  ;;  %v1748_v44 = vmul.f32 %v1620_v40, %v5198_v37  ;;  %v1746_v59 = vmul.f32 %v1618_v36, %v5199_v15  ;;  %v5201_v63 = vld [vmem:[#allocation30_spill] sm:$0xff] }
 0x1d0   :  { %v742_v3 = vadd.f32 %v5200_v1, %v3705_v32  ;;  %v4453_v56 = vpop.eup %3360  ;;  %v1750_v13 = vmul.f32 %v1622_v8, %v5201_v63  ;;  %v881_v23 = vmul.f32 %v549_v27, %v549_v27  ;;  %v4456_v21 = vmul.f32 0.5, %v549_v27  ;;  %v5203_v36 = vld [vmem:[#allocation66_spill] sm:$0xff]  ;;  %v5204_v8 = vld [vmem:[#allocation67_spill] sm:$0xff] }
 0x1d1   :  { %v1138_v48 = vadd.f32 0.7978846, %v1010_v53  ;;  %v1264_v42 = vmul.f32 %v1136_v28, %v547_v46  ;;  %v1852_v20 = vpack.c.bf16 %v1748_v44, %v1744_v58  ;;  %v551_v15 = vadd.f32 %v5203_v36, %v3696_v29  ;;  %v5205_v46 = vld [vmem:[#allocation68_spill] sm:$0xff] }
 0x1d2   :  { %v883_v12 = vmul.f32 %v742_v3, %v742_v3  ;;  %v4458_v43 = vmul.f32 0.5, %v742_v3  ;;  %v1854_v40 = vpack.c.bf16 %v1750_v13, %v1746_v59  ;;  %v1009_v37 = vmul.f32 0.035677407, %v881_v23 }
 0x1d3   :  { %v1266_v41 = vmul.f32 %v1138_v48, %v740_v54  ;;  %v4462_v1 = vpop.eup %3362  ;;  %3370 = vtanh.f32 %v1264_v42  ;;  %2231 = vmatmul.mubr.bf16.gmra.mrb[84].mxu0 %v1852_v20  ;;  %v744_v63 = vadd.f32 %v5204_v8, %v3699_v30  ;;  %v553_v58 = vadd.f32 %v5205_v46, %v3702_v31  ;;  %v5209_v46 = vld [vmem:[#allocation69_spill] sm:$0xff] }
 0x1d4   :  { %5202 = vst [vmem:[#allocation80_spill] sm:$0xff] %v4458_v43  ;;  %v1011_v53 = vmul.f32 0.035677407, %v883_v12  ;;  %v4468_v28 = vpop.eup %3364  ;;  %2392 = vmatmul.mubr.bf16.gmra.mrb[84].mxu1 %v1854_v40  ;;  %v1137_v54 = vadd.f32 0.7978846, %v1009_v37  ;;  %v884_v44 = vmul.f32 %v551_v15, %v551_v15  ;;  %v4470_v59 = vmul.f32 0.5, %v551_v15 }
 0x1d5   :  { %3372 = vtanh.f32 %v1266_v41  ;;  %v4472_v48 = vpop.eup %3366  ;;  %v886_v42 = vmul.f32 %v744_v63, %v744_v63  ;;  %v4474_v23 = vmul.f32 0.5, %v744_v63  ;;  %v885_v12 = vmul.f32 %v553_v58, %v553_v58 }
 0x1d6   :  { %5206 = vst [vmem:[#allocation17_spill] sm:$0xff] %v4470_v59  ;;  %v1139_v13 = vadd.f32 0.7978846, %v1011_v53  ;;  %v1265_v20 = vmul.f32 %v1137_v54, %v549_v27  ;;  %v1012_v36 = vmul.f32 0.035677407, %v884_v44  ;;  %v4476_v8 = vmul.f32 0.5, %v553_v58 }
 0x1d7   :  { %5207 = vst [vmem:[#allocation25_spill] sm:$0xff] %v4474_v23  ;;  %v746_v24 = vadd.f32 %v5209_v46, %v3705_v32  ;;  %v1014_v37 = vmul.f32 0.035677407, %v886_v42  ;;  %v1013_v4 = vmul.f32 0.035677407, %v885_v12  ;;  %v1625_v25 = vadd.f32 1.0, %v4287_v10 }
 0x1d8   :  { %5208 = vst [vmem:[#allocation64_spill] sm:$0xff] %v4476_v8  ;;  %v4480_v41 = vpop.eup %3368  ;;  %v1267_v40 = vmul.f32 %v1139_v13, %v742_v3  ;;  %3374 = vtanh.f32 %v1265_v20  ;;  %v1140_v53 = vadd.f32 0.7978846, %v1012_v36  ;;  %v1629_v44 = vadd.f32 1.0, %v4314_v19  ;;  %v5211_v46 = vld [vmem:[#allocation18_spill] sm:$0xff] }
 0x1d9   :  { %v887_v59 = vmul.f32 %v746_v24, %v746_v24  ;;  %v4483_v55 = vmul.f32 0.5, %v746_v24  ;;  %v1142_v27 = vadd.f32 0.7978846, %v1014_v37  ;;  %v1141_v54 = vadd.f32 0.7978846, %v1013_v4  ;;  %v5212_v12 = vld [vmem:[#allocation42_spill] sm:$0xff] }
 0x1da   :  { %3376 = vtanh.f32 %v1267_v40  ;;  %v1268_v23 = vmul.f32 %v1140_v53, %v551_v15  ;;  %v1753_v8 = vmul.f32 %v1625_v25, %v5211_v46  ;;  %v1627_v3 = vadd.f32 1.0, %v4296_v50  ;;  %v5214_v4 = vld [vmem:[#allocation19_spill] sm:$0xff]  ;;  %v5216_v50 = vld [vmem:[#allocation70_spill] sm:$0xff] }
 0x1db   :  { %5210 = vst [vmem:[#allocation14_spill] sm:$0xff] %v4483_v55  ;;  %v1015_v43 = vmul.f32 0.035677407, %v887_v59  ;;  %v1270_v13 = vmul.f32 %v1142_v27, %v744_v63  ;;  %v1269_v42 = vmul.f32 %v1141_v54, %v553_v58  ;;  %v1757_v10 = vmul.f32 %v1629_v44, %v5212_v12  ;;  %v5213_v55 = vld [vmem:[#allocation39_spill] sm:$0xff]  ;;  %v5220_v12 = vld [vmem:[#allocation13_spill] sm:$0xff] }
 0x1dc   :  { %v1631_v20 = vadd.f32 1.0, %v4320_v38  ;;  %3378 = vtanh.f32 %v1268_v23  ;;  %v1755_v40 = vmul.f32 %v1627_v3, %v5213_v55  ;;  %v557_v37 = vadd.f32 %v5214_v4, %v3696_v29  ;;  %v5215_v25 = vld [vmem:[#allocation43_spill] sm:$0xff]  ;;  %v5222_v4 = vld [vmem:[#allocation81_spill] sm:$0xff] }
 0x1dd   :  { %v1143_v36 = vadd.f32 0.7978846, %v1015_v43  ;;  %v4493_v19 = vpop.eup %3370  ;;  %3380 = vtanh.f32 %v1270_v13  ;;  %v1857_v15 = vpack.c.bf16 %v1757_v10, %v1753_v8  ;;  %v750_v63 = vadd.f32 %v5216_v50, %v3699_v30  ;;  %v5219_v13 = vld [vmem:[#allocation23_spill] sm:$0xff]  ;;  %v5224_v50 = vld [vmem:[#allocation40_spill] sm:$0xff] }
 0x1de   :  { %v1759_v59 = vmul.f32 %v1631_v20, %v5215_v25  ;;  %3382 = vtanh.f32 %v1269_v42  ;;  %v888_v23 = vmul.f32 %v557_v37, %v557_v37  ;;  %v4500_v43 = vmul.f32 0.5, %v557_v37 }
 0x1df   :  { %v4498_v58 = vpop.eup %3372  ;;  %v1271_v38 = vmul.f32 %v1143_v36, %v746_v24  ;;  %2238 = vmatprep.mubr.bf16.mxu0 %v1857_v15  ;;  %v890_v53 = vmul.f32 %v750_v63, %v750_v63  ;;  %v4502_v27 = vmul.f32 0.5, %v750_v63  ;;  %v1624_v54 = vadd.f32 1.0, %v4259_v33 }
 0x1e0   :  { %5217 = vst [vmem:[#allocation71_spill] sm:$0xff] %v4500_v43  ;;  %v1859_v55 = vpack.c.bf16 %v1759_v59, %v1755_v40  ;;  %v1016_v8 = vmul.f32 0.035677407, %v888_v23  ;;  %v1628_v44 = vadd.f32 1.0, %v4300_v39  ;;  %v1626_v46 = vadd.f32 1.0, %v4265_v45  ;;  %v5221_v40 = vld [vmem:[#allocation24_spill] sm:$0xff] }
 0x1e1   :  { %5218 = vst [vmem:[#allocation65_spill] sm:$0xff] %v4502_v27  ;;  %3384 = vtanh.f32 %v1271_v38  ;;  %v1018_v3 = vmul.f32 0.035677407, %v890_v53  ;;  %v1752_v24 = vmul.f32 %v1624_v54, %v5219_v13  ;;  %v1630_v42 = vadd.f32 1.0, %v4310_v16  ;;  %v5223_v39 = vld [vmem:[#allocation15_spill] sm:$0xff] }
 0x1e2   :  { %2399 = vmatprep.mubr.bf16.mxu1 %v1859_v55  ;;  %v559_v10 = vadd.f32 %v5220_v12, %v3702_v31  ;;  %v4511_v20 = vpop.eup %3374  ;;  %v1144_v36 = vadd.f32 0.7978846, %v1016_v8  ;;  %v1756_v33 = vmul.f32 %v1628_v44, %v5221_v40  ;;  %v1754_v15 = vmul.f32 %v1626_v46, %v5222_v4  ;;  %v5226_v46 = vld [vmem:[#allocation21_spill] sm:$0xff] }
 0x1e3   :  { %v752_v25 = vadd.f32 %v5223_v39, %v3705_v32  ;;  %v1146_v59 = vadd.f32 0.7978846, %v1018_v3  ;;  %v1758_v38 = vmul.f32 %v1630_v42, %v5224_v50  ;;  %v561_v40 = vadd.f32 %v5226_v46, %v3696_v29  ;;  %v5227_v42 = vld [vmem:[#allocation72_spill] sm:$0xff] }
 0x1e4   :  { %v4517_v45 = vpop.eup %3376  ;;  %v889_v23 = vmul.f32 %v559_v10, %v559_v10  ;;  %v4520_v16 = vmul.f32 0.5, %v559_v10  ;;  %v1272_v55 = vmul.f32 %v1144_v36, %v557_v37  ;;  %v1856_v53 = vpack.c.bf16 %v1756_v33, %v1752_v24  ;;  %v5228_v37 = vld [vmem:[#allocation27_spill] sm:$0xff] }
 0x1e5   :  { %v891_v54 = vmul.f32 %v752_v25, %v752_v25  ;;  %v4522_v13 = vmul.f32 0.5, %v752_v25  ;;  %v1274_v8 = vmul.f32 %v1146_v59, %v750_v63  ;;  %v1858_v44 = vpack.c.bf16 %v1758_v38, %v1754_v15 }
 0x1e6   :  { %v1017_v12 = vmul.f32 0.035677407, %v889_v23  ;;  %v4526_v4 = vpop.eup %3378  ;;  %3386 = vtanh.f32 %v1272_v55  ;;  %2239 = vmatmul.mubr.bf16.gmra.mrb[88].mxu0 %v1856_v53  ;;  %v754_v39 = vadd.f32 %v5227_v42, %v3699_v30  ;;  %v563_v24 = vadd.f32 %v5228_v37, %v3702_v31  ;;  %v5232_v42 = vld [vmem:[#allocation73_spill] sm:$0xff] }
 0x1e7   :  { %5225 = vst [vmem:[#allocation30_spill] sm:$0xff] %v4522_v13  ;;  %v1019_v3 = vmul.f32 0.035677407, %v891_v54  ;;  %v4532_v36 = vpop.eup %3380  ;;  %3388 = vtanh.f32 %v1274_v8  ;;  %2400 = vmatmul.mubr.bf16.gmra.mrb[88].mxu1 %v1858_v44  ;;  %v892_v33 = vmul.f32 %v561_v40, %v561_v40  ;;  %v4534_v15 = vmul.f32 0.5, %v561_v40 }
 0x1e8   :  { %v1145_v63 = vadd.f32 0.7978846, %v1017_v12  ;;  %v4536_v59 = vpop.eup %3382  ;;  %v894_v38 = vmul.f32 %v754_v39, %v754_v39  ;;  %v4538_v23 = vmul.f32 0.5, %v754_v39  ;;  %v893_v55 = vmul.f32 %v563_v24, %v563_v24 }
 0x1e9   :  { %5229 = vst [vmem:[#allocation66_spill] sm:$0xff] %v4534_v15  ;;  %v1147_v50 = vadd.f32 0.7978846, %v1019_v3  ;;  %v1020_v54 = vmul.f32 0.035677407, %v892_v33  ;;  %v4540_v46 = vmul.f32 0.5, %v563_v24  ;;  %v756_v37 = vadd.f32 %v5232_v42, %v3705_v32 }
 0x1ea   :  { %5230 = vst [vmem:[#allocation67_spill] sm:$0xff] %v4538_v23  ;;  %v1273_v53 = vmul.f32 %v1145_v63, %v559_v10  ;;  %v1022_v12 = vmul.f32 0.035677407, %v894_v38  ;;  %v1021_v27 = vmul.f32 0.035677407, %v893_v55  ;;  %v1633_v15 = vadd.f32 1.0, %v4367_v0 }
 0x1eb   :  { %5231 = vst [vmem:[#allocation68_spill] sm:$0xff] %v4540_v46  ;;  %v4544_v8 = vpop.eup %3384  ;;  %v1275_v44 = vmul.f32 %v1147_v50, %v752_v25  ;;  %v1148_v3 = vadd.f32 0.7978846, %v1020_v54  ;;  %v895_v43 = vmul.f32 %v756_v37, %v756_v37  ;;  %v4547_v13 = vmul.f32 0.5, %v756_v37 }
 0x1ec   :  { %3390 = vtanh.f32 %v1273_v53  ;;  %v1150_v10 = vadd.f32 0.7978846, %v1022_v12  ;;  %v1149_v63 = vadd.f32 0.7978846, %v1021_v27  ;;  %v1637_v33 = vadd.f32 1.0, %v4394_v18  ;;  %v5233_v27 = vld [vmem:[#allocation16_spill] sm:$0xff] }
 0x1ed   :  { %3392 = vtanh.f32 %v1275_v44  ;;  %v1276_v23 = vmul.f32 %v1148_v3, %v561_v40  ;;  %v1023_v46 = vmul.f32 0.035677407, %v895_v43  ;;  %v1761_v42 = vmul.f32 %v1633_v15, %v4294_v51 }
 0x1ee   :  { %v1635_v25 = vadd.f32 1.0, %v4373_v57  ;;  %v1278_v50 = vmul.f32 %v1150_v10, %v754_v39  ;;  %v1277_v38 = vmul.f32 %v1149_v63, %v563_v24  ;;  %v1765_v0 = vmul.f32 %v1637_v33, %v4322_v22  ;;  %v5234_v57 = vld [vmem:[#allocation28_spill] sm:$0xff]  ;;  %v5235_v33 = vld [vmem:[#allocation74_spill] sm:$0xff] }
 0x1ef   :  { %v1639_v55 = vadd.f32 1.0, %v4404_v60  ;;  %3394 = vtanh.f32 %v1276_v23  ;;  %v1151_v53 = vadd.f32 0.7978846, %v1023_v46  ;;  %v567_v44 = vadd.f32 %v5233_v27, %v3696_v29 }
 0x1f0   :  { %v1763_v54 = vmul.f32 %v1635_v25, %v4298_v52  ;;  %v4557_v18 = vpop.eup %3386  ;;  %3396 = vtanh.f32 %v1278_v50  ;;  %v1861_v43 = vpack.c.bf16 %v1765_v0, %v1761_v42  ;;  %v760_v40 = vadd.f32 %v5234_v57, %v3699_v30 }
 0x1f1   :  { %v1767_v51 = vmul.f32 %v1639_v55, %v4327_v62  ;;  %v4562_v39 = vpop.eup %3388  ;;  %3398 = vtanh.f32 %v1277_v38  ;;  %v1279_v22 = vmul.f32 %v1151_v53, %v756_v37  ;;  %v896_v60 = vmul.f32 %v567_v44, %v567_v44  ;;  %v5237_v53 = vld [vmem:[#allocation32_spill] sm:$0xff] }
 0x1f2   :  { %v4564_v24 = vmul.f32 0.5, %v567_v44  ;;  %2246 = vmatprep.mubr.bf16.mxu0 %v1861_v43  ;;  %v898_v15 = vmul.f32 %v760_v40, %v760_v40  ;;  %v4566_v23 = vmul.f32 0.5, %v760_v40  ;;  %v1632_v46 = vadd.f32 1.0, %v4339_v47 }
 0x1f3   :  { %v1863_v52 = vpack.c.bf16 %v1767_v51, %v1763_v54  ;;  %3400 = vtanh.f32 %v1279_v22  ;;  %v1024_v12 = vmul.f32 0.035677407, %v896_v60  ;;  %v1636_v62 = vadd.f32 1.0, %v4382_v26  ;;  %v5236_v26 = vld [vmem:[#allocation75_spill] sm:$0xff] }
 0x1f4   :  { %v1634_v3 = vadd.f32 1.0, %v4346_v2  ;;  %v1026_v10 = vmul.f32 0.035677407, %v898_v15  ;;  %v1760_v37 = vmul.f32 %v1632_v46, %v4268_v34  ;;  %v1638_v63 = vadd.f32 1.0, %v4390_v17 }
 0x1f5   :  { %2407 = vmatprep.mubr.bf16.mxu1 %v1863_v52  ;;  %v569_v42 = vadd.f32 %v5235_v33, %v3702_v31  ;;  %v1152_v50 = vadd.f32 0.7978846, %v1024_v12  ;;  %v1764_v47 = vmul.f32 %v1636_v62, %v4312_v14  ;;  %v762_v0 = vadd.f32 %v5236_v26, %v3705_v32  ;;  %v5239_v12 = vld [vmem:[#allocation77_spill] sm:$0xff] }
 0x1f6   :  { %v4575_v25 = vpop.eup %3390  ;;  %v1762_v38 = vmul.f32 %v1634_v3, %v4274_v9  ;;  %v1154_v55 = vadd.f32 0.7978846, %v1026_v10  ;;  %v1766_v34 = vmul.f32 %v1638_v63, %v5237_v53  ;;  %v5238_v9 = vld [vmem:[#allocation76_spill] sm:$0xff]  ;;  %v764_v62 = vadd.f32 %v5239_v12, %v3699_v30 }
 0x1f7   :  { %v4581_v2 = vpop.eup %3392  ;;  %v897_v54 = vmul.f32 %v569_v42, %v569_v42  ;;  %v4584_v17 = vmul.f32 0.5, %v569_v42  ;;  %v1280_v27 = vmul.f32 %v1152_v50, %v567_v44  ;;  %v1860_v43 = vpack.c.bf16 %v1764_v47, %v1760_v37  ;;  %v5240_v44 = vld [vmem:[#allocation31_spill] sm:$0xff] }
 0x1f8   :  { %v899_v51 = vmul.f32 %v762_v0, %v762_v0  ;;  %v4586_v57 = vmul.f32 0.5, %v762_v0  ;;  %v1282_v22 = vmul.f32 %v1154_v55, %v760_v40  ;;  %v1862_v14 = vpack.c.bf16 %v1766_v34, %v1762_v38 }
 0x1f9   :  { %v1025_v60 = vmul.f32 0.035677407, %v897_v54  ;;  %v571_v52 = vadd.f32 %v5238_v9, %v3696_v29  ;;  %v4590_v15 = vpop.eup %3394  ;;  %3402 = vtanh.f32 %v1280_v27  ;;  %2247 = vmatmul.mubr.bf16.gmra.mrb[92].mxu0 %v1860_v43  ;;  %v573_v3 = vadd.f32 %v5240_v44, %v3702_v31  ;;  %v5242_v54 = vld [vmem:[#allocation78_spill] sm:$0xff] }
 0x1fa   :  { %v1027_v46 = vmul.f32 0.035677407, %v899_v51  ;;  %v4596_v10 = vpop.eup %3396  ;;  %3404 = vtanh.f32 %v1282_v22  ;;  %2408 = vmatmul.mubr.bf16.gmra.mrb[92].mxu1 %v1862_v14  ;;  %v902_v47 = vmul.f32 %v764_v62, %v764_v62  ;;  %v4602_v38 = vmul.f32 0.5, %v764_v62 }
 0x1fb   :  { %v1153_v40 = vadd.f32 0.7978846, %v1025_v60  ;;  %v900_v37 = vmul.f32 %v571_v52, %v571_v52  ;;  %v4598_v63 = vmul.f32 0.5, %v571_v52  ;;  %v4600_v33 = vpop.eup %3398  ;;  %v901_v26 = vmul.f32 %v573_v3, %v573_v3 }
 0x1fc   :  { %v1155_v50 = vadd.f32 0.7978846, %v1027_v46  ;;  %5241 = vst [vmem:[#allocation69_spill] sm:$0xff] %v4602_v38  ;;  %v4604_v34 = vmul.f32 0.5, %v573_v3  ;;  %v766_v27 = vadd.f32 %v5242_v54, %v3705_v32  ;;  %v1030_v22 = vmul.f32 0.035677407, %v902_v47 }
 0x1fd   :  { %v1281_v55 = vmul.f32 %v1153_v40, %v569_v42  ;;  %v1028_v53 = vmul.f32 0.035677407, %v900_v37  ;;  %v4608_v43 = vpop.eup %3400  ;;  %v1029_v14 = vmul.f32 0.035677407, %v901_v26  ;;  %v1641_v60 = vadd.f32 1.0, %v4447_v11 }
 0x1fe   :  { %v1283_v51 = vmul.f32 %v1155_v50, %v762_v0  ;;  %v903_v46 = vmul.f32 %v766_v27, %v766_v27  ;;  %v4611_v12 = vmul.f32 0.5, %v766_v27  ;;  %v1158_v42 = vadd.f32 0.7978846, %v1030_v22 }
 0x1ff   :  { %3406 = vtanh.f32 %v1281_v55  ;;  %v1156_v9 = vadd.f32 0.7978846, %v1028_v53  ;;  %v1157_v44 = vadd.f32 0.7978846, %v1029_v14  ;;  %v1645_v40 = vadd.f32 1.0, %v4472_v48 }
 0x200   :  { %3408 = vtanh.f32 %v1283_v51  ;;  %v1031_v38 = vmul.f32 0.035677407, %v903_v46  ;;  %v1769_v54 = vmul.f32 %v1641_v60, %v4376_v6  ;;  %v1643_v0 = vadd.f32 1.0, %v4453_v56  ;;  %v5243_v51 = vld [vmem:[#allocation22_spill] sm:$0xff] }
 0x201   :  { %v1284_v37 = vmul.f32 %v1156_v9, %v571_v52  ;;  %v1286_v50 = vmul.f32 %v1158_v42, %v764_v62  ;;  %v1285_v47 = vmul.f32 %v1157_v44, %v573_v3  ;;  %v1773_v11 = vmul.f32 %v1645_v40, %v4400_v5  ;;  %v5244_v56 = vld [vmem:[#allocation26_spill] sm:$0xff]  ;;  %v5247_v40 = vld [vmem:[#allocation56_spill] sm:$0xff] }
 0x202   :  { %v1647_v26 = vadd.f32 1.0, %v4480_v41  ;;  %v1159_v55 = vadd.f32 0.7978846, %v1031_v38  ;;  %v1771_v53 = vmul.f32 %v1643_v0, %v4378_v49  ;;  %v577_v22 = vadd.f32 %v5243_v51, %v3696_v29 }
 0x203   :  { %3410 = vtanh.f32 %v1284_v37  ;;  %v4621_v48 = vpop.eup %3402  ;;  %v1865_v52 = vpack.c.bf16 %v1773_v11, %v1769_v54  ;;  %v770_v62 = vadd.f32 %v5244_v56, %v3699_v30  ;;  %v1640_v9 = vadd.f32 1.0, %v4419_v61  ;;  %v5248_v54 = vld [vmem:[#allocation35_spill] sm:$0xff]  ;;  %v5249_v11 = vld [vmem:[#allocation54_spill] sm:$0xff] }
 0x204   :  { %3412 = vtanh.f32 %v1286_v50  ;;  %v1775_v6 = vmul.f32 %v1647_v26, %v4407_v7  ;;  %v4626_v3 = vpop.eup %3404  ;;  %v1287_v5 = vmul.f32 %v1159_v55, %v766_v27  ;;  %v904_v41 = vmul.f32 %v577_v22, %v577_v22  ;;  %v5250_v26 = vld [vmem:[#allocation84_spill] sm:$0xff] }
 0x205   :  { %3414 = vtanh.f32 %v1285_v47  ;;  %v4628_v38 = vmul.f32 0.5, %v577_v22  ;;  %2254 = vmatprep.mubr.bf16.mxu0 %v1865_v52  ;;  %v906_v14 = vmul.f32 %v770_v62, %v770_v62  ;;  %v4630_v60 = vmul.f32 0.5, %v770_v62  ;;  %v5252_v52 = vld [vmem:[#allocation59_spill] sm:$0xff] }
 0x206   :  { %v1867_v49 = vpack.c.bf16 %v1775_v6, %v1771_v53  ;;  %3416 = vtanh.f32 %v1287_v5  ;;  %v1032_v46 = vmul.f32 0.035677407, %v904_v41  ;;  %v1644_v7 = vadd.f32 1.0, %v4462_v1  ;;  %v5251_v1 = vld [vmem:[#allocation36_spill] sm:$0xff] }
 0x207   :  { %5245 = vst [vmem:[#allocation18_spill] sm:$0xff] %v4628_v38  ;;  %5246 = vst [vmem:[#allocation42_spill] sm:$0xff] %v4630_v60  ;;  %v1642_v42 = vadd.f32 1.0, %v4426_v35  ;;  %v1034_v44 = vmul.f32 0.035677407, %v906_v14  ;;  %v1768_v27 = vmul.f32 %v1640_v9, %v5247_v40  ;;  %v1646_v37 = vadd.f32 1.0, %v4468_v28 }
 0x208   :  { %2415 = vmatprep.mubr.bf16.mxu1 %v1867_v49  ;;  %v579_v0 = vadd.f32 %v5248_v54, %v3702_v31  ;;  %v1160_v47 = vadd.f32 0.7978846, %v1032_v46  ;;  %v1772_v61 = vmul.f32 %v1644_v7, %v5249_v11  ;;  %v772_v53 = vadd.f32 %v5251_v1, %v3705_v32 }
 0x209   :  { %v4639_v50 = vpop.eup %3406  ;;  %v1770_v55 = vmul.f32 %v1642_v42, %v5250_v26  ;;  %v1162_v51 = vadd.f32 0.7978846, %v1034_v44  ;;  %v1774_v6 = vmul.f32 %v1646_v37, %v5252_v52  ;;  %v5253_v42 = vld [vmem:[#allocation29_spill] sm:$0xff]  ;;  %v5254_v37 = vld [vmem:[#allocation79_spill] sm:$0xff] }
 0x20a   :  { %v4645_v35 = vpop.eup %3408  ;;  %v905_v56 = vmul.f32 %v579_v0, %v579_v0  ;;  %v4648_v28 = vmul.f32 0.5, %v579_v0  ;;  %v1288_v5 = vmul.f32 %v1160_v47, %v577_v22  ;;  %v1864_v41 = vpack.c.bf16 %v1772_v61, %v1768_v27  ;;  %v5255_v22 = vld [vmem:[#allocation37_spill] sm:$0xff] }
 0x20b   :  { %v907_v49 = vmul.f32 %v772_v53, %v772_v53  ;;  %v4650_v14 = vmul.f32 0.5, %v772_v53  ;;  %v1290_v9 = vmul.f32 %v1162_v51, %v770_v62  ;;  %v1866_v46 = vpack.c.bf16 %v1774_v6, %v1770_v55 }
 0x20c   :  { %v1033_v7 = vmul.f32 0.035677407, %v905_v56  ;;  %v581_v40 = vadd.f32 %v5253_v42, %v3696_v29  ;;  %3418 = vtanh.f32 %v1288_v5  ;;  %2255 = vmatmul.mubr.bf16.gmra.mrb[96].mxu0 %v1864_v41  ;;  %v774_v11 = vadd.f32 %v5254_v37, %v3699_v30 }
 0x20d   :  { %v4654_v54 = vpop.eup %3410  ;;  %v1035_v44 = vmul.f32 0.035677407, %v907_v49  ;;  %v583_v27 = vadd.f32 %v5255_v22, %v3702_v31  ;;  %3420 = vtanh.f32 %v1290_v9  ;;  %2416 = vmatmul.mubr.bf16.gmra.mrb[96].mxu1 %v1866_v46  ;;  %v5258_v49 = vld [vmem:[#allocation82_spill] sm:$0xff]  ;;  %v1649_v22 = vadd.f32 1.0, %v4511_v20 }
 0x20e   :  { %v4660_v47 = vpop.eup %3412  ;;  %v1161_v62 = vadd.f32 0.7978846, %v1033_v7  ;;  %v908_v61 = vmul.f32 %v581_v40, %v581_v40  ;;  %v4662_v26 = vmul.f32 0.5, %v581_v40  ;;  %v910_v51 = vmul.f32 %v774_v11, %v774_v11 }
 0x20f   :  { %v4664_v55 = vpop.eup %3414  ;;  %v1163_v1 = vadd.f32 0.7978846, %v1035_v44  ;;  %v4666_v52 = vmul.f32 0.5, %v774_v11  ;;  %v909_v6 = vmul.f32 %v583_v27, %v583_v27  ;;  %v4668_v41 = vmul.f32 0.5, %v583_v27 }
 0x210   :  { %5256 = vst [vmem:[#allocation39_spill] sm:$0xff] %v4662_v26  ;;  %v1289_v56 = vmul.f32 %v1161_v62, %v579_v0  ;;  %v1036_v5 = vmul.f32 0.035677407, %v908_v61  ;;  %v776_v42 = vadd.f32 %v5258_v49, %v3705_v32  ;;  %v4672_v9 = vpop.eup %3416  ;;  %v1038_v7 = vmul.f32 0.035677407, %v910_v51 }
 0x211   :  { %5257 = vst [vmem:[#allocation19_spill] sm:$0xff] %v4666_v52  ;;  %v1291_v46 = vmul.f32 %v1163_v1, %v772_v53  ;;  %v1037_v37 = vmul.f32 0.035677407, %v909_v6  ;;  %v1653_v61 = vadd.f32 1.0, %v4536_v59  ;;  %v1777_v49 = vmul.f32 %v1649_v22, %v4456_v21  ;;  %v5260_v6 = vld [vmem:[#allocation64_spill] sm:$0xff]  ;;  %v5263_v21 = vld [vmem:[#allocation14_spill] sm:$0xff] }
 0x212   :  { %3422 = vtanh.f32 %v1289_v56  ;;  %v1164_v44 = vadd.f32 0.7978846, %v1036_v5  ;;  %v911_v60 = vmul.f32 %v776_v42, %v776_v42  ;;  %v4675_v26 = vmul.f32 0.5, %v776_v42 }
 0x213   :  { %3424 = vtanh.f32 %v1291_v46  ;;  %v1166_v0 = vadd.f32 0.7978846, %v1038_v7  ;;  %v1165_v62 = vadd.f32 0.7978846, %v1037_v37  ;;  %v1651_v53 = vadd.f32 1.0, %v4517_v45  ;;  %v5262_v7 = vld [vmem:[#allocation20_spill] sm:$0xff] }
 0x214   :  { %5259 = vst [vmem:[#allocation43_spill] sm:$0xff] %v4675_v26  ;;  %v1292_v52 = vmul.f32 %v1164_v44, %v581_v40  ;;  %v1039_v38 = vmul.f32 0.035677407, %v911_v60  ;;  %v1781_v20 = vmul.f32 %v1653_v61, %v5260_v6  ;;  %v1655_v56 = vadd.f32 1.0, %v4544_v8  ;;  %v5261_v26 = vld [vmem:[#allocation80_spill] sm:$0xff]  ;;  %v5264_v45 = vld [vmem:[#allocation41_spill] sm:$0xff] }
 0x215   :  { %v1294_v1 = vmul.f32 %v1166_v0, %v774_v11  ;;  %v1293_v51 = vmul.f32 %v1165_v62, %v583_v27  ;;  %v1779_v46 = vmul.f32 %v1651_v53, %v5261_v26  ;;  %v587_v37 = vadd.f32 %v5262_v7, %v3696_v29  ;;  %v5268_v6 = vld [vmem:[#allocation83_spill] sm:$0xff]  ;;  %v5270_v7 = vld [vmem:[#allocation62_spill] sm:$0xff] }
 0x216   :  { %3426 = vtanh.f32 %v1292_v52  ;;  %v1167_v5 = vadd.f32 0.7978846, %v1039_v38  ;;  %v4685_v59 = vpop.eup %3418  ;;  %v1869_v60 = vpack.c.bf16 %v1781_v20, %v1777_v49  ;;  %v1783_v40 = vmul.f32 %v1655_v56, %v5263_v21 }
 0x217   :  { %3428 = vtanh.f32 %v1294_v1  ;;  %v780_v11 = vadd.f32 %v5264_v45, %v3699_v30  ;;  %v4690_v27 = vpop.eup %3420  ;;  %v912_v52 = vmul.f32 %v587_v37, %v587_v37  ;;  %v4692_v38 = vmul.f32 0.5, %v587_v37  ;;  %v5267_v1 = vld [vmem:[#allocation57_spill] sm:$0xff] }
 0x218   :  { %3430 = vtanh.f32 %v1293_v51  ;;  %v1295_v8 = vmul.f32 %v1167_v5, %v776_v42  ;;  %2262 = vmatprep.mubr.bf16.mxu0 %v1869_v60  ;;  %v1871_v26 = vpack.c.bf16 %v1783_v40, %v1779_v46  ;;  %v1648_v0 = vadd.f32 1.0, %v4493_v19  ;;  %v5269_v46 = vld [vmem:[#allocation17_spill] sm:$0xff] }
 0x219   :  { %5265 = vst [vmem:[#allocation70_spill] sm:$0xff] %v4692_v38  ;;  %v914_v22 = vmul.f32 %v780_v11, %v780_v11  ;;  %v4694_v44 = vmul.f32 0.5, %v780_v11  ;;  %v1040_v62 = vmul.f32 0.035677407, %v912_v52  ;;  %v1652_v61 = vadd.f32 1.0, %v4526_v4  ;;  %v5271_v4 = vld [vmem:[#allocation34_spill] sm:$0xff] }
 0x21a   :  { %3432 = vtanh.f32 %v1295_v8  ;;  %v1650_v49 = vadd.f32 1.0, %v4498_v58  ;;  %2423 = vmatprep.mubr.bf16.mxu1 %v1871_v26  ;;  %v1776_v42 = vmul.f32 %v1648_v0, %v5267_v1  ;;  %v1654_v51 = vadd.f32 1.0, %v4532_v36  ;;  %v5272_v45 = vld [vmem:[#allocation25_spill] sm:$0xff] }
 0x21b   :  { %5266 = vst [vmem:[#allocation23_spill] sm:$0xff] %v4694_v44  ;;  %v1042_v53 = vmul.f32 0.035677407, %v914_v22  ;;  %v589_v20 = vadd.f32 %v5268_v6, %v3702_v31  ;;  %v1168_v5 = vadd.f32 0.7978846, %v1040_v62  ;;  %v1780_v19 = vmul.f32 %v1652_v61, %v5269_v46 }
 0x21c   :  { %v4703_v56 = vpop.eup %3422  ;;  %v1778_v60 = vmul.f32 %v1650_v49, %v5270_v7  ;;  %v782_v21 = vadd.f32 %v5271_v4, %v3705_v32  ;;  %v1782_v8 = vmul.f32 %v1654_v51, %v5272_v45  ;;  %v5274_v49 = vld [vmem:[#allocation46_spill] sm:$0xff] }
 0x21d   :  { %v4709_v58 = vpop.eup %3424  ;;  %v1170_v40 = vadd.f32 0.7978846, %v1042_v53  ;;  %v913_v52 = vmul.f32 %v589_v20, %v589_v20  ;;  %v4712_v36 = vmul.f32 0.5, %v589_v20  ;;  %v1296_v26 = vmul.f32 %v1168_v5, %v587_v37  ;;  %v5275_v51 = vld [vmem:[#allocation38_spill] sm:$0xff]  ;;  %v5276_v37 = vld [vmem:[#allocation47_spill] sm:$0xff] }
 0x21e   :  { %v1868_v22 = vpack.c.bf16 %v1780_v19, %v1776_v42  ;;  %v915_v0 = vmul.f32 %v782_v21, %v782_v21  ;;  %v4714_v1 = vmul.f32 0.5, %v782_v21  ;;  %v1870_v61 = vpack.c.bf16 %v1782_v8, %v1778_v60 }
 0x21f   :  { %v1298_v62 = vmul.f32 %v1170_v40, %v780_v11  ;;  %v1041_v6 = vmul.f32 0.035677407, %v913_v52  ;;  %v591_v46 = vadd.f32 %v5274_v49, %v3696_v29  ;;  %3434 = vtanh.f32 %v1296_v26 }
 0x220   :  { %5273 = vst [vmem:[#allocation13_spill] sm:$0xff] %v4714_v1  ;;  %v4718_v7 = vpop.eup %3426  ;;  %2263 = vmatmul.mubr.bf16.gmra.mrb[100].mxu0 %v1868_v22  ;;  %v1043_v53 = vmul.f32 0.035677407, %v915_v0  ;;  %v784_v4 = vadd.f32 %v5275_v51, %v3699_v30  ;;  %v593_v42 = vadd.f32 %v5276_v37, %v3702_v31  ;;  %2424 = vmatmul.mubr.bf16.gmra.mrb[100].mxu1 %v1870_v61  ;;  %v5280_v51 = vld [vmem:[#allocation49_spill] sm:$0xff] }
 0x221   :  { %v4724_v5 = vpop.eup %3428  ;;  %3436 = vtanh.f32 %v1298_v62  ;;  %v1169_v11 = vadd.f32 0.7978846, %v1041_v6  ;;  %v916_v19 = vmul.f32 %v591_v46, %v591_v46  ;;  %v4726_v60 = vmul.f32 0.5, %v591_v46 }
 0x222   :  { %v4728_v40 = vpop.eup %3430  ;;  %v1171_v45 = vadd.f32 0.7978846, %v1043_v53  ;;  %v918_v8 = vmul.f32 %v784_v4, %v784_v4  ;;  %v4730_v52 = vmul.f32 0.5, %v784_v4  ;;  %v917_v26 = vmul.f32 %v593_v42, %v593_v42 }
 0x223   :  { %5277 = vst [vmem:[#allocation24_spill] sm:$0xff] %v4726_v60  ;;  %v1297_v22 = vmul.f32 %v1169_v11, %v589_v20  ;;  %v1044_v0 = vmul.f32 0.035677407, %v916_v19  ;;  %v4732_v49 = vmul.f32 0.5, %v593_v42  ;;  %v786_v37 = vadd.f32 %v5280_v51, %v3705_v32 }
 0x224   :  { %5278 = vst [vmem:[#allocation81_spill] sm:$0xff] %v4730_v52  ;;  %v4736_v62 = vpop.eup %3432  ;;  %v1299_v61 = vmul.f32 %v1171_v45, %v782_v21  ;;  %v1046_v6 = vmul.f32 0.035677407, %v918_v8  ;;  %v1045_v44 = vmul.f32 0.035677407, %v917_v26  ;;  %v1657_v60 = vadd.f32 1.0, %v4575_v25 }
 0x225   :  { %5279 = vst [vmem:[#allocation15_spill] sm:$0xff] %v4732_v49  ;;  %3438 = vtanh.f32 %v1297_v22  ;;  %v1172_v53 = vadd.f32 0.7978846, %v1044_v0  ;;  %v919_v38 = vmul.f32 %v786_v37, %v786_v37  ;;  %v4739_v1 = vmul.f32 0.5, %v786_v37  ;;  %v5282_v26 = vld [vmem:[#allocation68_spill] sm:$0xff] }
 0x226   :  { %3440 = vtanh.f32 %v1299_v61  ;;  %v1174_v20 = vadd.f32 0.7978846, %v1046_v6  ;;  %v1173_v11 = vadd.f32 0.7978846, %v1045_v44  ;;  %v1661_v19 = vadd.f32 1.0, %v4600_v33  ;;  %v5284_v44 = vld [vmem:[#allocation48_spill] sm:$0xff] }
 0x227   :  { %5281 = vst [vmem:[#allocation40_spill] sm:$0xff] %v4739_v1  ;;  %v1300_v52 = vmul.f32 %v1172_v53, %v591_v46  ;;  %v1047_v49 = vmul.f32 0.035677407, %v919_v38  ;;  %v1785_v51 = vmul.f32 %v1657_v60, %v4520_v16  ;;  %v1659_v21 = vadd.f32 1.0, %v4581_v2  ;;  %v5283_v1 = vld [vmem:[#allocation30_spill] sm:$0xff]  ;;  %v5285_v2 = vld [vmem:[#allocation44_spill] sm:$0xff] }
 0x228   :  { %v1302_v45 = vmul.f32 %v1174_v20, %v784_v4  ;;  %v1301_v8 = vmul.f32 %v1173_v11, %v593_v42  ;;  %v1789_v25 = vmul.f32 %v1661_v19, %v5282_v26  ;;  %v1663_v22 = vadd.f32 1.0, %v4608_v43 }
 0x229   :  { %3442 = vtanh.f32 %v1300_v52  ;;  %v1175_v0 = vadd.f32 0.7978846, %v1047_v49  ;;  %v1787_v61 = vmul.f32 %v1659_v21, %v5283_v1  ;;  %v597_v6 = vadd.f32 %v5284_v44, %v3696_v29  ;;  %v4749_v33 = vpop.eup %3434 }
 0x22a   :  { %3444 = vtanh.f32 %v1302_v45  ;;  %v1873_v38 = vpack.c.bf16 %v1789_v25, %v1785_v51  ;;  %v1791_v16 = vmul.f32 %v1663_v22, %v4547_v13  ;;  %v790_v46 = vadd.f32 %v5285_v2, %v3699_v30  ;;  %v5288_v51 = vld [vmem:[#allocation71_spill] sm:$0xff]  ;;  %v5289_v45 = vld [vmem:[#allocation33_spill] sm:$0xff]  ;;  %v5290_v22 = vld [vmem:[#allocation66_spill] sm:$0xff] }
 0x22b   :  { %v4754_v4 = vpop.eup %3436  ;;  %3446 = vtanh.f32 %v1301_v8  ;;  %v1303_v43 = vmul.f32 %v1175_v0, %v786_v37  ;;  %v920_v42 = vmul.f32 %v597_v6, %v597_v6  ;;  %v4756_v60 = vmul.f32 0.5, %v597_v6  ;;  %v5291_v0 = vld [vmem:[#allocation65_spill] sm:$0xff] }
 0x22c   :  { %2270 = vmatprep.mubr.bf16.mxu0 %v1873_v38  ;;  %v1875_v1 = vpack.c.bf16 %v1791_v16, %v1787_v61  ;;  %v922_v52 = vmul.f32 %v790_v46, %v790_v46  ;;  %v4758_v49 = vmul.f32 0.5, %v790_v46  ;;  %v1656_v53 = vadd.f32 1.0, %v4557_v18  ;;  %v5293_v16 = vld [vmem:[#allocation67_spill] sm:$0xff] }
 0x22d   :  { %5286 = vst [vmem:[#allocation21_spill] sm:$0xff] %v4756_v60  ;;  %3448 = vtanh.f32 %v1303_v43  ;;  %v1048_v20 = vmul.f32 0.035677407, %v920_v42  ;;  %v1660_v13 = vadd.f32 1.0, %v4590_v15  ;;  %v1658_v11 = vadd.f32 1.0, %v4562_v39  ;;  %v5292_v15 = vld [vmem:[#allocation45_spill] sm:$0xff] }
 0x22e   :  { %5287 = vst [vmem:[#allocation72_spill] sm:$0xff] %v4758_v49  ;;  %2431 = vmatprep.mubr.bf16.mxu1 %v1875_v1  ;;  %v1050_v19 = vmul.f32 0.035677407, %v922_v52  ;;  %v1784_v37 = vmul.f32 %v1656_v53, %v5288_v51  ;;  %v1662_v21 = vadd.f32 1.0, %v4596_v10  ;;  %v599_v8 = vadd.f32 %v5289_v45, %v3702_v31 }
 0x22f   :  { %v4767_v26 = vpop.eup %3438  ;;  %v1176_v25 = vadd.f32 0.7978846, %v1048_v20  ;;  %v1788_v18 = vmul.f32 %v1660_v13, %v5290_v22  ;;  %v1786_v61 = vmul.f32 %v1658_v11, %v5291_v0  ;;  %v792_v44 = vadd.f32 %v5292_v15, %v3705_v32  ;;  %v5295_v11 = vld [vmem:[#allocation51_spill] sm:$0xff] }
 0x230   :  { %v4773_v39 = vpop.eup %3440  ;;  %v1178_v38 = vadd.f32 0.7978846, %v1050_v19  ;;  %v1790_v2 = vmul.f32 %v1662_v21, %v5293_v16  ;;  %v921_v43 = vmul.f32 %v599_v8, %v599_v8  ;;  %v4776_v10 = vmul.f32 0.5, %v599_v8  ;;  %v5296_v21 = vld [vmem:[#allocation52_spill] sm:$0xff] }
 0x231   :  { %v1304_v42 = vmul.f32 %v1176_v25, %v597_v6  ;;  %v1872_v1 = vpack.c.bf16 %v1788_v18, %v1784_v37  ;;  %v923_v52 = vmul.f32 %v792_v44, %v792_v44  ;;  %v4778_v53 = vmul.f32 0.5, %v792_v44  ;;  %v5297_v6 = vld [vmem:[#allocation85_spill] sm:$0xff] }
 0x232   :  { %v1306_v20 = vmul.f32 %v1178_v38, %v790_v46  ;;  %v1874_v13 = vpack.c.bf16 %v1790_v2, %v1786_v61  ;;  %v1049_v51 = vmul.f32 0.035677407, %v921_v43  ;;  %v601_v45 = vadd.f32 %v5295_v11, %v3696_v29  ;;  %v5300_v11 = vld [vmem:[#allocation86_spill] sm:$0xff] }
 0x233   :  { %5294 = vst [vmem:[#allocation27_spill] sm:$0xff] %v4778_v53  ;;  %v4782_v22 = vpop.eup %3442  ;;  %3450 = vtanh.f32 %v1304_v42  ;;  %2271 = vmatmul.mubr.bf16.gmra.mrb[104].mxu0 %v1872_v1  ;;  %v1051_v19 = vmul.f32 0.035677407, %v923_v52  ;;  %v794_v0 = vadd.f32 %v5296_v21, %v3699_v30  ;;  %v603_v37 = vadd.f32 %v5297_v6, %v3702_v31 }
 0x234   :  { %v4788_v25 = vpop.eup %3444  ;;  %3452 = vtanh.f32 %v1306_v20  ;;  %2432 = vmatmul.mubr.bf16.gmra.mrb[104].mxu1 %v1874_v13  ;;  %v1177_v46 = vadd.f32 0.7978846, %v1049_v51  ;;  %v924_v18 = vmul.f32 %v601_v45, %v601_v45  ;;  %v4790_v61 = vmul.f32 0.5, %v601_v45 }
 0x235   :  { %v4792_v15 = vpop.eup %3446  ;;  %v1179_v38 = vadd.f32 0.7978846, %v1051_v19  ;;  %v926_v16 = vmul.f32 %v794_v0, %v794_v0  ;;  %v4794_v2 = vmul.f32 0.5, %v794_v0  ;;  %v925_v43 = vmul.f32 %v603_v37, %v603_v37 }
 0x236   :  { %5298 = vst [vmem:[#allocation73_spill] sm:$0xff] %v4790_v61  ;;  %v1305_v42 = vmul.f32 %v1177_v46, %v599_v8  ;;  %v1052_v1 = vmul.f32 0.035677407, %v924_v18  ;;  %v4796_v52 = vmul.f32 0.5, %v603_v37  ;;  %v796_v21 = vadd.f32 %v5300_v11, %v3705_v32 }
 0x237   :  { %5299 = vst [vmem:[#allocation16_spill] sm:$0xff] %v4794_v2  ;;  %v4800_v20 = vpop.eup %3448  ;;  %v1307_v13 = vmul.f32 %v1179_v38, %v792_v44  ;;  %v1054_v51 = vmul.f32 0.035677407, %v926_v16  ;;  %v1053_v6 = vmul.f32 0.035677407, %v925_v43  ;;  %v1665_v49 = vadd.f32 1.0, %v4639_v50 }
 0x238   :  { %3454 = vtanh.f32 %v1305_v42  ;;  %v1180_v19 = vadd.f32 0.7978846, %v1052_v1  ;;  %v927_v61 = vmul.f32 %v796_v21, %v796_v21  ;;  %v4803_v60 = vmul.f32 0.5, %v796_v21 }
 0x239   :  { %3456 = vtanh.f32 %v1307_v13  ;;  %v1182_v8 = vadd.f32 0.7978846, %v1054_v51  ;;  %v1181_v46 = vadd.f32 0.7978846, %v1053_v6  ;;  %v1669_v18 = vadd.f32 1.0, %v4664_v55  ;;  %v5301_v13 = vld [vmem:[#allocation50_spill] sm:$0xff] }
 0x23a   :  { %v1308_v2 = vmul.f32 %v1180_v19, %v601_v45  ;;  %v1055_v53 = vmul.f32 0.035677407, %v927_v61  ;;  %v1793_v11 = vmul.f32 %v1665_v49, %v4584_v17  ;;  %v1667_v44 = vadd.f32 1.0, %v4645_v35  ;;  %v5302_v35 = vld [vmem:[#allocation53_spill] sm:$0xff] }
 0x23b   :  { %v1310_v38 = vmul.f32 %v1182_v8, %v794_v0  ;;  %v1309_v16 = vmul.f32 %v1181_v46, %v603_v37  ;;  %v1797_v50 = vmul.f32 %v1669_v18, %v4604_v34  ;;  %v1671_v43 = vadd.f32 1.0, %v4672_v9  ;;  %v5303_v18 = vld [vmem:[#allocation55_spill] sm:$0xff] }
 0x23c   :  { %3458 = vtanh.f32 %v1308_v2  ;;  %v1183_v42 = vadd.f32 0.7978846, %v1055_v53  ;;  %v1795_v1 = vmul.f32 %v1667_v44, %v4586_v57  ;;  %v607_v51 = vadd.f32 %v5301_v13, %v3696_v29 }
 0x23d   :  { %v4813_v55 = vpop.eup %3450  ;;  %3460 = vtanh.f32 %v1310_v38  ;;  %v1877_v45 = vpack.c.bf16 %v1797_v50, %v1793_v11  ;;  %v1799_v17 = vmul.f32 %v1671_v43, %v4611_v12  ;;  %v800_v49 = vadd.f32 %v5302_v35, %v3699_v30 }
 0x23e   :  { %v4818_v0 = vpop.eup %3452  ;;  %3462 = vtanh.f32 %v1309_v16  ;;  %v1311_v34 = vmul.f32 %v1183_v42, %v796_v21  ;;  %v928_v9 = vmul.f32 %v607_v51, %v607_v51  ;;  %v4820_v53 = vmul.f32 0.5, %v607_v51  ;;  %v5305_v42 = vld [vmem:[#allocation69_spill] sm:$0xff] }
 0x23f   :  { %2278 = vmatprep.mubr.bf16.mxu0 %v1877_v45  ;;  %v1879_v57 = vpack.c.bf16 %v1799_v17, %v1795_v1  ;;  %v930_v37 = vmul.f32 %v800_v49, %v800_v49  ;;  %v4822_v61 = vmul.f32 0.5, %v800_v49  ;;  %v1664_v2 = vadd.f32 1.0, %v4621_v48 }
 0x240   :  { %3464 = vtanh.f32 %v1311_v34  ;;  %v1056_v6 = vmul.f32 0.035677407, %v928_v9  ;;  %v1668_v12 = vadd.f32 1.0, %v4654_v54  ;;  %v1666_v19 = vadd.f32 1.0, %v4626_v3  ;;  %v5304_v54 = vld [vmem:[#allocation61_spill] sm:$0xff] }
 0x241   :  { %2439 = vmatprep.mubr.bf16.mxu1 %v1879_v57  ;;  %v1058_v8 = vmul.f32 0.035677407, %v930_v37  ;;  %v1792_v21 = vmul.f32 %v1664_v2, %v4564_v24  ;;  %v1670_v46 = vadd.f32 1.0, %v4660_v47  ;;  %v609_v11 = vadd.f32 %v5303_v18, %v3702_v31 }
 0x242   :  { %v4831_v44 = vpop.eup %3454  ;;  %v1184_v38 = vadd.f32 0.7978846, %v1056_v6  ;;  %v1796_v48 = vmul.f32 %v1668_v12, %v4598_v63  ;;  %v1794_v16 = vmul.f32 %v1666_v19, %v4566_v23  ;;  %v802_v50 = vadd.f32 %v5304_v54, %v3705_v32  ;;  %v5306_v23 = vld [vmem:[#allocation58_spill] sm:$0xff]  ;;  %v5307_v12 = vld [vmem:[#allocation60_spill] sm:$0xff]  ;;  %v5308_v19 = vld [vmem:[#allocation63_spill] sm:$0xff] }
 0x243   :  { %v4837_v3 = vpop.eup %3456  ;;  %v1186_v43 = vadd.f32 0.7978846, %v1058_v8  ;;  %v1798_v24 = vmul.f32 %v1670_v46, %v5305_v42  ;;  %v929_v1 = vmul.f32 %v609_v11, %v609_v11  ;;  %v4840_v47 = vmul.f32 0.5, %v609_v11  ;;  %v4846_v37 = vpop.f32.mrb[64].mxu0 }
 0x244   :  { %v1312_v13 = vmul.f32 %v1184_v38, %v607_v51  ;;  %v1876_v45 = vpack.c.bf16 %v1796_v48, %v1792_v21  ;;  %v931_v17 = vmul.f32 %v802_v50, %v802_v50  ;;  %v4842_v35 = vmul.f32 0.5, %v802_v50  ;;  %v4854_v21 = vpop.f32.mrb[64].mxu1 }
 0x245   :  { %v1314_v34 = vmul.f32 %v1186_v43, %v800_v49  ;;  %v1878_v63 = vpack.c.bf16 %v1798_v24, %v1794_v16  ;;  %v1057_v9 = vmul.f32 0.035677407, %v929_v1  ;;  %v611_v57 = vadd.f32 %v5306_v23, %v3696_v29  ;;  %v4856_v49 = vpop.f32.mrb[65].mxu0  ;;  %v4862_v48 = vpop.f32.mrb[65].mxu1 }
 0x246   :  { %v4848_v2 = vpop.eup %3458  ;;  %3466 = vtanh.f32 %v1312_v13  ;;  %2279 = vmatmul.mubr.bf16.gmra.mrb[108].mxu0 %v1876_v45  ;;  %v1059_v6 = vmul.f32 0.035677407, %v931_v17  ;;  %v804_v51 = vadd.f32 %v5307_v12, %v3699_v30  ;;  %v613_v8 = vadd.f32 %v5308_v19, %v3702_v31  ;;  %5309 = vst [vmem:[#allocation28_spill] sm:$0xff] %v4862_v48  ;;  %v4864_v16 = vpop.f32.mrb[66].mxu0 }
 0x247   :  { %v4858_v46 = vpop.eup %3460  ;;  %3468 = vtanh.f32 %v1314_v34  ;;  %2440 = vmatmul.mubr.bf16.gmra.mrb[108].mxu1 %v1878_v63  ;;  %v1185_v29 = vadd.f32 0.7978846, %v1057_v9  ;;  %v932_v18 = vmul.f32 %v611_v57, %v611_v57  ;;  %v4860_v38 = vmul.f32 0.5, %v611_v57  ;;  %5310 = vst [vmem:[#allocation74_spill] sm:$0xff] %v4864_v16  ;;  %v4870_v24 = vpop.f32.mrb[66].mxu1  ;;  %v5313_v34 = vld [vmem:[#allocation87_spill] sm:$0xff] }
 0x248   :  { %v4866_v30 = vpop.eup %3462  ;;  %v1187_v54 = vadd.f32 0.7978846, %v1059_v6  ;;  %v934_v31 = vmul.f32 %v804_v51, %v804_v51  ;;  %v4868_v43 = vmul.f32 0.5, %v804_v51  ;;  %v933_v42 = vmul.f32 %v613_v8, %v613_v8  ;;  %5311 = vst [vmem:[#allocation75_spill] sm:$0xff] %v4870_v24  ;;  %v4872_v1 = vpop.f32.mrb[67].mxu0 }
 0x249   :  { %5312 = vst [vmem:[#allocation32_spill] sm:$0xff] %v4872_v1  ;;  %v1313_v13 = vmul.f32 %v1185_v29, %v609_v11  ;;  %v1060_v45 = vmul.f32 0.035677407, %v932_v18  ;;  %v4874_v17 = vmul.f32 0.5, %v613_v8  ;;  %v806_v63 = vadd.f32 %v5313_v34, %v3705_v32  ;;  %v4878_v9 = vpop.f32.mrb[67].mxu1 }
 0x24a   :  { %5314 = vst [vmem:[#allocation76_spill] sm:$0xff] %v4878_v9  ;;  %v4880_v23 = vpop.eup %3464  ;;  %v1315_v6 = vmul.f32 %v1187_v54, %v802_v50  ;;  %v1062_v12 = vmul.f32 0.035677407, %v934_v31  ;;  %v1061_v19 = vmul.f32 0.035677407, %v933_v42  ;;  %v1673_v16 = vadd.f32 1.0, %v4703_v56 }
 0x24b   :  { %3470 = vtanh.f32 %v1313_v13  ;;  %v1188_v24 = vadd.f32 0.7978846, %v1060_v45  ;;  %v935_v48 = vmul.f32 %v806_v63, %v806_v63  ;;  %v4883_v1 = vmul.f32 0.5, %v806_v63 }
 0x24c   :  { %3472 = vtanh.f32 %v1315_v6  ;;  %v1190_v11 = vadd.f32 0.7978846, %v1062_v12  ;;  %v1189_v29 = vadd.f32 0.7978846, %v1061_v19  ;;  %v1677_v18 = vadd.f32 1.0, %v4728_v40  ;;  %v5318_v19 = vld [vmem:[#allocation42_spill] sm:$0xff] }
 0x24d   :  { %v1316_v32 = vmul.f32 %v1188_v24, %v611_v57  ;;  %v1063_v34 = vmul.f32 0.035677407, %v935_v48  ;;  %v1801_v9 = vmul.f32 %v1673_v16, %v4648_v28  ;;  %v1675_v50 = vadd.f32 1.0, %v4709_v58  ;;  %v5315_v57 = vld [vmem:[#allocation43_spill] sm:$0xff] }
 0x24e   :  { %v1318_v54 = vmul.f32 %v1190_v11, %v804_v51  ;;  %v1317_v31 = vmul.f32 %v1189_v29, %v613_v8  ;;  %v1805_v56 = vmul.f32 %v1677_v18, %v4668_v41  ;;  %v1679_v42 = vadd.f32 1.0, %v4736_v62  ;;  %v5316_v8 = vld [vmem:[#allocation18_spill] sm:$0xff]  ;;  %v5317_v16 = vld [vmem:[#allocation39_spill] sm:$0xff] }
 0x24f   :  { %3474 = vtanh.f32 %v1316_v32  ;;  %v1191_v13 = vadd.f32 0.7978846, %v1063_v34  ;;  %v1803_v45 = vmul.f32 %v1675_v50, %v4650_v14  ;;  %v1672_v6 = vadd.f32 1.0, %v4685_v59  ;;  %v5319_v18 = vld [vmem:[#allocation19_spill] sm:$0xff] }
 0x250   :  { %v4892_v12 = vpop.eup %3466  ;;  %3476 = vtanh.f32 %v1318_v54  ;;  %v1881_v40 = vpack.c.bf16 %v1805_v56, %v1801_v9  ;;  %v1807_v28 = vmul.f32 %v1679_v42, %v5315_v57  ;;  %v1676_v58 = vadd.f32 1.0, %v4718_v7  ;;  %v5320_v54 = vld [vmem:[#allocation15_spill] sm:$0xff] }
 0x251   :  { %v4896_v51 = vpop.eup %3468  ;;  %3478 = vtanh.f32 %v1317_v31  ;;  %v1319_v41 = vmul.f32 %v1191_v13, %v806_v63  ;;  %v1800_v62 = vmul.f32 %v1672_v6, %v5316_v8  ;;  %v1674_v48 = vadd.f32 1.0, %v4690_v27  ;;  %v5321_v31 = vld [vmem:[#allocation13_spill] sm:$0xff]  ;;  %v5322_v13 = vld [vmem:[#allocation40_spill] sm:$0xff]  ;;  %v5325_v8 = vld [vmem:[#allocation23_spill] sm:$0xff] }
 0x252   :  { %2286 = vmatprep.mubr.bf16.mxu0 %v1881_v40  ;;  %v1883_v14 = vpack.c.bf16 %v1807_v28, %v1803_v45  ;;  %v1804_v59 = vmul.f32 %v1676_v58, %v5317_v16  ;;  %v1678_v24 = vadd.f32 1.0, %v4724_v5  ;;  %v1681_v9 = vadd.f32 1.0, %v4767_v26  ;;  %v5324_v28 = vld [vmem:[#allocation24_spill] sm:$0xff] }
 0x253   :  { %3480 = vtanh.f32 %v1319_v41  ;;  %v1802_v11 = vmul.f32 %v1674_v48, %v5318_v19  ;;  %v1685_v7 = vadd.f32 1.0, %v4792_v15  ;;  %v1683_v29 = vadd.f32 1.0, %v4773_v39 }
 0x254   :  { %2447 = vmatprep.mubr.bf16.mxu1 %v1883_v14  ;;  %v1880_v63 = vpack.c.bf16 %v1804_v59, %v1800_v62  ;;  %v1806_v32 = vmul.f32 %v1678_v24, %v5319_v18  ;;  %v1809_v27 = vmul.f32 %v1681_v9, %v4712_v36  ;;  %v1687_v34 = vadd.f32 1.0, %v4800_v20  ;;  %v5323_v20 = vld [vmem:[#allocation70_spill] sm:$0xff]  ;;  %v5326_v62 = vld [vmem:[#allocation81_spill] sm:$0xff]  ;;  %v5327_v18 = vld [vmem:[#allocation27_spill] sm:$0xff] }
 0x255   :  { %v3471_v50 = vpop.eup %3470  ;;  %v1813_v5 = vmul.f32 %v1685_v7, %v5320_v54  ;;  %v1811_v26 = vmul.f32 %v1683_v29, %v5321_v31  ;;  %v1680_v56 = vadd.f32 1.0, %v4749_v33  ;;  %v1684_v42 = vadd.f32 1.0, %v4782_v22  ;;  %v5328_v54 = vld [vmem:[#allocation21_spill] sm:$0xff] }
 0x256   :  { %v3473_v15 = vpop.eup %3472  ;;  %2287 = vmatmul.mubr.bf16.gmra.mrb[112].mxu0 %v1880_v63  ;;  %v1882_v39 = vpack.c.bf16 %v1806_v32, %v1802_v11  ;;  %v1815_v45 = vmul.f32 %v1687_v34, %v5322_v13  ;;  %v1682_v6 = vadd.f32 1.0, %v4754_v4  ;;  %v1686_v36 = vadd.f32 1.0, %v4788_v25  ;;  %v5329_v31 = vld [vmem:[#allocation73_spill] sm:$0xff] }
 0x257   :  { %v1885_v40 = vpack.c.bf16 %v1813_v5, %v1809_v27  ;;  %v1808_v57 = vmul.f32 %v1680_v56, %v5323_v20  ;;  %v1812_v58 = vmul.f32 %v1684_v42, %v5324_v28  ;;  %v1689_v41 = vadd.f32 1.0, %v4831_v44  ;;  %v2919_v9 = vpop.f32.mrb[68].mxu0 }
 0x258   :  { %2448 = vmatmul.mubr.bf16.gmra.mrb[112].mxu1 %v1882_v39  ;;  %v1887_v33 = vpack.c.bf16 %v1815_v45, %v1811_v26  ;;  %v1810_v22 = vmul.f32 %v1682_v6, %v5325_v8  ;;  %v1814_v48 = vmul.f32 %v1686_v36, %v5326_v62  ;;  %v1693_v14 = vadd.f32 1.0, %v4866_v30  ;;  %v2920_v30 = vpop.f32.mrb[69].mxu0  ;;  %v5330_v39 = vld [vmem:[#allocation72_spill] sm:$0xff] }
 0x259   :  { %v3475_v16 = vpop.eup %3474  ;;  %2294 = vmatprep.mubr.bf16.mxu0 %v1885_v40  ;;  %v1884_v4 = vpack.c.bf16 %v1812_v58, %v1808_v57  ;;  %v1817_v25 = vmul.f32 %v1689_v41, %v4776_v10  ;;  %v1691_v59 = vadd.f32 1.0, %v4837_v3  ;;  %v1695_v24 = vadd.f32 1.0, %v4880_v23  ;;  %v2922_v27 = vpop.f32.mrb[70].mxu0  ;;  %v5331_v45 = vld [vmem:[#allocation16_spill] sm:$0xff] }
 0x25a   :  { %v3477_v19 = vpop.eup %3476  ;;  %2455 = vmatprep.mubr.bf16.mxu1 %v1887_v33  ;;  %v1886_v44 = vpack.c.bf16 %v1814_v48, %v1810_v22  ;;  %v1821_v11 = vmul.f32 %v1693_v14, %v4796_v52  ;;  %v1688_v7 = vadd.f32 1.0, %v4813_v55  ;;  %v1692_v29 = vadd.f32 1.0, %v4848_v2  ;;  %v3031_v55 = vpop.f32.mrb[68].mxu1 }
 0x25b   :  { %v3479_v63 = vpop.eup %3478  ;;  %v1819_v32 = vmul.f32 %v1691_v59, %v5327_v18  ;;  %v1823_v10 = vmul.f32 %v1695_v24, %v4803_v60  ;;  %v1690_v3 = vadd.f32 1.0, %v4818_v0  ;;  %v1694_v23 = vadd.f32 1.0, %v4858_v46  ;;  %v2923_v56 = vpop.f32.mrb[71].mxu0 }
 0x25c   :  { %v1889_v34 = vpack.c.bf16 %v1821_v11, %v1817_v25  ;;  %v1816_v5 = vmul.f32 %v1688_v7, %v5328_v54  ;;  %v1820_v52 = vmul.f32 %v1692_v29, %v5329_v31  ;;  %v1697_v26 = vadd.f32 1.0, %v3471_v50  ;;  %v3032_v36 = vpop.f32.mrb[69].mxu1  ;;  %v1960_v50 = vld [vmem:[%s5011_s4] sm:$0x1]  ;;  %v5336_v7 = vld [vmem:[#allocation75_spill] sm:$0xff]  ;;  %s3584_s4 = smov [#allocation8]  }
 0x25d   :  { %v3481_v2 = vpop.eup %3480  ;;  %v1891_v42 = vpack.c.bf16 %v1823_v10, %v1819_v32  ;;  %v1818_v13 = vmul.f32 %v1690_v3, %v5330_v39  ;;  %v1822_v6 = vmul.f32 %v1694_v23, %v5331_v45  ;;  %v1701_v60 = vadd.f32 1.0, %v3479_v63  ;;  %v3034_v57 = vpop.f32.mrb[70].mxu1  ;;  %v5337_v29 = vld [vmem:[#allocation76_spill] sm:$0xff]  ;;  %s2645_s8 = sshll.u32 %s3584_s4, 4  ;;  %s2646_s8 = int_to_ptr.vmem [resolvable:$true] %s2645_s8 }
 0x25e   :  { %2295 = vmatmul.mubr.bf16.gmra.mrb[116].mxu0 %v1884_v4  ;;  %v1888_v0 = vpack.c.bf16 %v1820_v52, %v1816_v5  ;;  %v1825_v46 = vmul.f32 %v1697_v26, %v4840_v47  ;;  %v1699_v40 = vadd.f32 1.0, %v3473_v15  ;;  %v1703_v20 = vadd.f32 1.0, %v3481_v2  ;;  %v3035_v8 = vpop.f32.mrb[71].mxu1  ;;  %s3548_s9 = scalar_lea.vmem %s2646_s8, 2048  ;;  %p3553_p11 = scmp.lt.s32.totalorder %s2646_s8, %s2646_s8 }
 0x25f   :  { %2302 = vmatprep.mubr.bf16.mxu0 %v1889_v34  ;;  %v1890_v28 = vpack.c.bf16 %v1822_v6, %v1818_v13  ;;  %v1829_v58 = vmul.f32 %v1701_v60, %v4874_v17  ;;  %v1696_v41 = vadd.f32 1.0, %v4892_v12  ;;  %v1700_v33 = vadd.f32 1.0, %v3475_v16  ;;  %p3549_p10 = scmp.ne.s32.totalorder %s2646_s8, %s3548_s9  ;;  %p3554_p12 = scmp.lt.s32.totalorder %s3548_s9, %s3548_s9 }
 0x260   :  { %2456 = vmatmul.mubr.bf16.gmra.mrb[116].mxu1 %v1886_v44  ;;  %v1827_v22 = vmul.f32 %v1699_v40, %v4842_v35  ;;  %v1831_v47 = vmul.f32 %v1703_v20, %v4883_v1  ;;  %v1698_v15 = vadd.f32 1.0, %v4896_v51  ;;  %v1702_v62 = vadd.f32 1.0, %v3477_v19  ;;  %v5332_v1 = vld [vmem:[#allocation12_spill] sm:$0xff]  ;;  %v5334_v44 = vld [vmem:[#allocation74_spill] sm:$0xff] }
 0x261   :  { %2463 = vmatprep.mubr.bf16.mxu1 %v1891_v42  ;;  %v1893_v48 = vpack.c.bf16 %v1829_v58, %v1825_v46  ;;  %v1824_v14 = vmul.f32 %v1696_v41, %v4820_v53  ;;  %v1828_v4 = vmul.f32 %v1700_v33, %v4860_v38  ;;  %v1961_v25 = vunpack.c.l.bf16 %v1960_v50  ;;  %v5333_v51 = vld [vmem:[#allocation28_spill] sm:$0xff]  ;;  %p3555_p13 = por %p3554_p12, %p3553_p11 }
 0x262   :  { %v1895_v17 = vpack.c.bf16 %v1831_v47, %v1827_v22  ;;  %v1826_v12 = vmul.f32 %v1698_v15, %v4822_v61  ;;  %v1830_v16 = vmul.f32 %v1702_v62, %v4868_v43  ;;  %v2915_v35 = vadd.f32 %v4856_v49, %v4846_v37  ;;  %v5335_v53 = vld [vmem:[#allocation32_spill] sm:$0xff] }
 0x263   :  { %v1892_v59 = vpack.c.bf16 %v1828_v4, %v1824_v14  ;;  %v4952_v24 = vrot.slane %v1961_v25, %v5332_v1  ;;  %v3027_v19 = vadd.f32 %v5333_v51, %v4854_v21  ;;  %v2918_v11 = vadd.f32 %v5335_v53, %v5334_v44  ;;  %p3556_p0 = pnand %p3555_p13, %p3549_p10 }
 0x264   :  { %v1894_v38 = vpack.c.bf16 %v1830_v16, %v1826_v12  ;;  %v3030_v63 = vadd.f32 %v5337_v29, %v5336_v7  ;;  %v2921_v61 = vadd.f32 %v2920_v30, %v2919_v9  ;;  %v3033_v18 = vadd.f32 %v3032_v36, %v3031_v55 }
 0x265   :  { %v2193_v43 = vadd.f32 %v2915_v35, %v4952_v24  ;;  %v2196_v37 = vadd.f32 %v2918_v11, %v4952_v24  ;;  %v2924_v49 = vadd.f32 %v2923_v56, %v2922_v27  ;;  %v3036_v32 = vadd.f32 %v3035_v8, %v3034_v57 }
 0x266   :  { %2303 = vmatmul.mubr.bf16.gmra.mrb[120].mxu0 %v1888_v0  ;;  %v2201_v10 = vadd.f32 %v2921_v61, %v4952_v24 }
 0x267   :  { %2310 = vmatprep.mubr.bf16.mxu0 %v1893_v48  ;;  %v2354_v21 = vadd.f32 %v3027_v19, %v2193_v43  ;;  %v2357_v3 = vadd.f32 %v3030_v63, %v2196_v37  ;;  %v2204_v23 = vadd.f32 %v2924_v49, %v4952_v24 }
 0x268   :  { %2464 = vmatmul.mubr.bf16.gmra.mrb[120].mxu1 %v1890_v28  ;;  %v2362_v34 = vadd.f32 %v3033_v18, %v2201_v10 }
 0x269   :  { %2471 = vmatprep.mubr.bf16.mxu1 %v1895_v17  ;;  %v2805_v54 = vpack.c.bf16 %v2357_v3, %v2354_v21  ;;  %v2365_v9 = vadd.f32 %v3036_v32, %v2204_v23 }
 0x26b   :  { %2806 = vst [vmem:[#allocation8] sm:$0xff] %v2805_v54   ;;  %v2810_v30 = vpack.c.bf16 %v2365_v9, %v2362_v34 }
 0x26d   :  { %2882 = vst [vmem:[#allocation8 + $0x8] sm:$0xff] %v2810_v30   ;;  %v2925_v5 = vpop.f32.mrb[72].mxu0 }
 0x26e   :  { %2311 = vmatmul.mubr.bf16.gmra.mrb[124].mxu0 %v1892_v59  ;;  %v3037_v27 = vpop.f32.mrb[72].mxu1  ;;  %v2926_v31 = vpop.f32.mrb[73].mxu0 }
 0x26f   :  { %v2927_v52 = vadd.f32 %v2926_v31, %v2925_v5  ;;  %v3038_v26 = vpop.f32.mrb[73].mxu1  ;;  %v2928_v55 = vpop.f32.mrb[74].mxu0 }
 0x270   :  { %2472 = vmatmul.mubr.bf16.gmra.mrb[124].mxu1 %v1894_v38  ;;  %v3039_v56 = vadd.f32 %v3038_v26, %v3037_v27  ;;  %v3040_v2 = vpop.f32.mrb[74].mxu1  ;;  %v2929_v42 = vpop.f32.mrb[75].mxu0 }
 0x271   :  { %v2209_v39 = vadd.f32 %v2927_v52, %v4952_v24  ;;  %v2930_v13 = vadd.f32 %v2929_v42, %v2928_v55  ;;  %v3041_v45 = vpop.f32.mrb[75].mxu1 }
 0x272   :  { %v3042_v6 = vadd.f32 %v3041_v45, %v3040_v2 }
 0x273   :  { %v2370_v60 = vadd.f32 %v3039_v56, %v2209_v39  ;;  %v2212_v36 = vadd.f32 %v2930_v13, %v4952_v24 }
 0x275   :  { %v2373_v0 = vadd.f32 %v3042_v6, %v2212_v36 }
 0x277   :  { %v2815_v46 = vpack.c.bf16 %v2373_v0, %v2370_v60 }
 0x279   :  { %2883 = vst [vmem:[#allocation8 + $0x10] sm:$0xff] %v2815_v46  }
 0x280   :  { %v2931_v40 = vpop.f32.mrb[76].mxu0 }
 0x281   :  { %v3043_v20 = vpop.f32.mrb[76].mxu1  ;;  %v2932_v50 = vpop.f32.mrb[77].mxu0 }
 0x282   :  { %v2933_v57 = vadd.f32 %v2932_v50, %v2931_v40  ;;  %v3044_v28 = vpop.f32.mrb[77].mxu1  ;;  %v2934_v58 = vpop.f32.mrb[78].mxu0 }
 0x283   :  { %v3045_v41 = vadd.f32 %v3044_v28, %v3043_v20  ;;  %v3046_v33 = vpop.f32.mrb[78].mxu1  ;;  %v2935_v8 = vpop.f32.mrb[79].mxu0 }
 0x284   :  { %v2217_v22 = vadd.f32 %v2933_v57, %v4952_v24  ;;  %v2936_v47 = vadd.f32 %v2935_v8, %v2934_v58  ;;  %v3047_v15 = vpop.f32.mrb[79].mxu1 }
 0x285   :  { %v3048_v62 = vadd.f32 %v3047_v15, %v3046_v33 }
 0x286   :  { %v2378_v48 = vadd.f32 %v3045_v41, %v2217_v22  ;;  %v2220_v14 = vadd.f32 %v2936_v47, %v4952_v24 }
 0x288   :  { %v2381_v4 = vadd.f32 %v3048_v62, %v2220_v14 }
 0x28a   :  { %v2820_v25 = vpack.c.bf16 %v2381_v4, %v2378_v48 }
 0x28c   :  { %2884 = vst [vmem:[#allocation8 + $0x18] sm:$0xff] %v2820_v25  }
 0x293   :  { %v2937_v17 = vpop.f32.mrb[80].mxu0 }
 0x294   :  { %v3049_v12 = vpop.f32.mrb[80].mxu1  ;;  %v2938_v16 = vpop.f32.mrb[81].mxu0 }
 0x295   :  { %v2939_v35 = vadd.f32 %v2938_v16, %v2937_v17  ;;  %v3050_v59 = vpop.f32.mrb[81].mxu1  ;;  %v2940_v1 = vpop.f32.mrb[82].mxu0 }
 0x296   :  { %v3051_v51 = vadd.f32 %v3050_v59, %v3049_v12  ;;  %v3052_v19 = vpop.f32.mrb[82].mxu1  ;;  %v2941_v44 = vpop.f32.mrb[83].mxu0 }
 0x297   :  { %v2225_v53 = vadd.f32 %v2939_v35, %v4952_v24  ;;  %v2942_v11 = vadd.f32 %v2941_v44, %v2940_v1  ;;  %v3053_v38 = vpop.f32.mrb[83].mxu1 }
 0x298   :  { %v3054_v7 = vadd.f32 %v3053_v38, %v3052_v19 }
 0x299   :  { %v2386_v29 = vadd.f32 %v3051_v51, %v2225_v53  ;;  %v2228_v63 = vadd.f32 %v2942_v11, %v4952_v24 }
 0x29b   :  { %v2389_v61 = vadd.f32 %v3054_v7, %v2228_v63 }
 0x29d   :  { %v2825_v18 = vpack.c.bf16 %v2389_v61, %v2386_v29 }
 0x29f   :  { %2885 = vst [vmem:[#allocation8 + $0x20] sm:$0xff] %v2825_v18  }
 0x2a6   :  { %v2943_v43 = vpop.f32.mrb[84].mxu0 }
 0x2a7   :  { %v3055_v37 = vpop.f32.mrb[84].mxu1  ;;  %v2944_v49 = vpop.f32.mrb[85].mxu0 }
 0x2a8   :  { %v2945_v32 = vadd.f32 %v2944_v49, %v2943_v43  ;;  %v3056_v10 = vpop.f32.mrb[85].mxu1  ;;  %v2946_v21 = vpop.f32.mrb[86].mxu0 }
 0x2a9   :  { %v3057_v3 = vadd.f32 %v3056_v10, %v3055_v37  ;;  %v3058_v23 = vpop.f32.mrb[86].mxu1  ;;  %v2947_v34 = vpop.f32.mrb[87].mxu0 }
 0x2aa   :  { %v2233_v54 = vadd.f32 %v2945_v32, %v4952_v24  ;;  %v2948_v9 = vadd.f32 %v2947_v34, %v2946_v21  ;;  %v3059_v30 = vpop.f32.mrb[87].mxu1 }
 0x2ab   :  { %v3060_v5 = vadd.f32 %v3059_v30, %v3058_v23 }
 0x2ac   :  { %v2394_v27 = vadd.f32 %v3057_v3, %v2233_v54  ;;  %v2236_v31 = vadd.f32 %v2948_v9, %v4952_v24 }
 0x2ae   :  { %v2397_v52 = vadd.f32 %v3060_v5, %v2236_v31 }
 0x2b0   :  { %v2830_v26 = vpack.c.bf16 %v2397_v52, %v2394_v27 }
 0x2b2   :  { %2886 = vst [vmem:[#allocation8 + $0x28] sm:$0xff] %v2830_v26  }
 0x2b9   :  { %v2949_v55 = vpop.f32.mrb[88].mxu0 }
 0x2ba   :  { %v3061_v56 = vpop.f32.mrb[88].mxu1  ;;  %v2950_v2 = vpop.f32.mrb[89].mxu0 }
 0x2bb   :  { %v2951_v42 = vadd.f32 %v2950_v2, %v2949_v55  ;;  %v3062_v39 = vpop.f32.mrb[89].mxu1  ;;  %v2952_v13 = vpop.f32.mrb[90].mxu0 }
 0x2bc   :  { %v3063_v45 = vadd.f32 %v3062_v39, %v3061_v56  ;;  %v3064_v6 = vpop.f32.mrb[90].mxu1  ;;  %v2953_v60 = vpop.f32.mrb[91].mxu0 }
 0x2bd   :  { %v2241_v36 = vadd.f32 %v2951_v42, %v4952_v24  ;;  %v2954_v0 = vadd.f32 %v2953_v60, %v2952_v13  ;;  %v3065_v46 = vpop.f32.mrb[91].mxu1 }
 0x2be   :  { %v3066_v40 = vadd.f32 %v3065_v46, %v3064_v6 }
 0x2bf   :  { %v2402_v20 = vadd.f32 %v3063_v45, %v2241_v36  ;;  %v2244_v50 = vadd.f32 %v2954_v0, %v4952_v24 }
 0x2c1   :  { %v2405_v57 = vadd.f32 %v3066_v40, %v2244_v50 }
 0x2c3   :  { %v2835_v28 = vpack.c.bf16 %v2405_v57, %v2402_v20 }
 0x2c5   :  { %2887 = vst [vmem:[#allocation8 + $0x30] sm:$0xff] %v2835_v28  }
 0x2cc   :  { %v2955_v58 = vpop.f32.mrb[92].mxu0 }
 0x2cd   :  { %v3067_v41 = vpop.f32.mrb[92].mxu1  ;;  %v2956_v33 = vpop.f32.mrb[93].mxu0 }
 0x2ce   :  { %v2957_v8 = vadd.f32 %v2956_v33, %v2955_v58  ;;  %v3068_v22 = vpop.f32.mrb[93].mxu1  ;;  %v2958_v47 = vpop.f32.mrb[94].mxu0 }
 0x2cf   :  { %v3069_v15 = vadd.f32 %v3068_v22, %v3067_v41  ;;  %v3070_v62 = vpop.f32.mrb[94].mxu1  ;;  %v2959_v48 = vpop.f32.mrb[95].mxu0 }
 0x2d0   :  { %v2249_v14 = vadd.f32 %v2957_v8, %v4952_v24  ;;  %v2960_v4 = vadd.f32 %v2959_v48, %v2958_v47  ;;  %v3071_v25 = vpop.f32.mrb[95].mxu1 }
 0x2d1   :  { %v3072_v17 = vadd.f32 %v3071_v25, %v3070_v62 }
 0x2d2   :  { %v2410_v12 = vadd.f32 %v3069_v15, %v2249_v14  ;;  %v2252_v16 = vadd.f32 %v2960_v4, %v4952_v24 }
 0x2d4   :  { %v2413_v35 = vadd.f32 %v3072_v17, %v2252_v16 }
 0x2d6   :  { %v2840_v59 = vpack.c.bf16 %v2413_v35, %v2410_v12 }
 0x2d8   :  { %2888 = vst [vmem:[#allocation8 + $0x38] sm:$0xff] %v2840_v59  }
 0x2df   :  { %v2961_v1 = vpop.f32.mrb[96].mxu0 }
 0x2e0   :  { %v3073_v51 = vpop.f32.mrb[96].mxu1  ;;  %v2962_v19 = vpop.f32.mrb[97].mxu0 }
 0x2e1   :  { %v2963_v44 = vadd.f32 %v2962_v19, %v2961_v1  ;;  %v3074_v53 = vpop.f32.mrb[97].mxu1  ;;  %v2964_v11 = vpop.f32.mrb[98].mxu0 }
 0x2e2   :  { %v3075_v38 = vadd.f32 %v3074_v53, %v3073_v51  ;;  %v3076_v7 = vpop.f32.mrb[98].mxu1  ;;  %v2965_v29 = vpop.f32.mrb[99].mxu0 }
 0x2e3   :  { %v2257_v63 = vadd.f32 %v2963_v44, %v4952_v24  ;;  %v2966_v61 = vadd.f32 %v2965_v29, %v2964_v11  ;;  %v3077_v18 = vpop.f32.mrb[99].mxu1 }
 0x2e4   :  { %v3078_v43 = vadd.f32 %v3077_v18, %v3076_v7 }
 0x2e5   :  { %v2418_v37 = vadd.f32 %v3075_v38, %v2257_v63  ;;  %v2260_v49 = vadd.f32 %v2966_v61, %v4952_v24 }
 0x2e7   :  { %v2421_v32 = vadd.f32 %v3078_v43, %v2260_v49 }
 0x2e9   :  { %v2845_v10 = vpack.c.bf16 %v2421_v32, %v2418_v37 }
 0x2eb   :  { %2889 = vst [vmem:[#allocation8 + $0x40] sm:$0xff] %v2845_v10  }
 0x2f3   :  { %v2967_v21 = vpop.f32.mrb[100].mxu0  ;;  %v3079_v3 = vpop.f32.mrb[100].mxu1 }
 0x2f4   :  { %v2968_v23 = vpop.f32.mrb[101].mxu0  ;;  %v3080_v54 = vpop.f32.mrb[101].mxu1 }
 0x2f5   :  { %v2969_v34 = vadd.f32 %v2968_v23, %v2967_v21  ;;  %v2970_v9 = vpop.f32.mrb[102].mxu0  ;;  %v3081_v30 = vadd.f32 %v3080_v54, %v3079_v3  ;;  %v3082_v5 = vpop.f32.mrb[102].mxu1 }
 0x2f6   :  { %v2971_v27 = vpop.f32.mrb[103].mxu0  ;;  %v3083_v26 = vpop.f32.mrb[103].mxu1 }
 0x2f7   :  { %v2265_v31 = vadd.f32 %v2969_v34, %v4952_v24  ;;  %v2972_v52 = vadd.f32 %v2971_v27, %v2970_v9  ;;  %v3084_v55 = vadd.f32 %v3083_v26, %v3082_v5 }
 0x2f9   :  { %v2426_v56 = vadd.f32 %v3081_v30, %v2265_v31  ;;  %v2268_v2 = vadd.f32 %v2972_v52, %v4952_v24 }
 0x2fb   :  { %v2429_v42 = vadd.f32 %v3084_v55, %v2268_v2 }
 0x2fd   :  { %v2850_v39 = vpack.c.bf16 %v2429_v42, %v2426_v56 }
 0x2ff   :  { %2890 = vst [vmem:[#allocation8 + $0x48] sm:$0xff] %v2850_v39  }
 0x306   :  { %v2973_v13 = vpop.f32.mrb[104].mxu0 }
 0x307   :  { %v3085_v45 = vpop.f32.mrb[104].mxu1  ;;  %v2974_v6 = vpop.f32.mrb[105].mxu0 }
 0x308   :  { %v2975_v60 = vadd.f32 %v2974_v6, %v2973_v13  ;;  %v3086_v36 = vpop.f32.mrb[105].mxu1  ;;  %v2976_v0 = vpop.f32.mrb[106].mxu0 }
 0x309   :  { %v3087_v46 = vadd.f32 %v3086_v36, %v3085_v45  ;;  %v3088_v40 = vpop.f32.mrb[106].mxu1  ;;  %v2977_v20 = vpop.f32.mrb[107].mxu0 }
 0x30a   :  { %v2273_v50 = vadd.f32 %v2975_v60, %v4952_v24  ;;  %v2978_v57 = vadd.f32 %v2977_v20, %v2976_v0  ;;  %v3089_v28 = vpop.f32.mrb[107].mxu1 }
 0x30b   :  { %v3090_v58 = vadd.f32 %v3089_v28, %v3088_v40 }
 0x30c   :  { %v2434_v41 = vadd.f32 %v3087_v46, %v2273_v50  ;;  %v2276_v33 = vadd.f32 %v2978_v57, %v4952_v24 }
 0x30e   :  { %v2437_v8 = vadd.f32 %v3090_v58, %v2276_v33 }
 0x310   :  { %v2855_v22 = vpack.c.bf16 %v2437_v8, %v2434_v41 }
 0x312   :  { %2891 = vst [vmem:[#allocation8 + $0x50] sm:$0xff] %v2855_v22  }
 0x319   :  { %v2979_v47 = vpop.f32.mrb[108].mxu0 }
 0x31a   :  { %v3091_v15 = vpop.f32.mrb[108].mxu1  ;;  %v2980_v62 = vpop.f32.mrb[109].mxu0 }
 0x31b   :  { %v2981_v48 = vadd.f32 %v2980_v62, %v2979_v47  ;;  %v3092_v14 = vpop.f32.mrb[109].mxu1  ;;  %v2982_v4 = vpop.f32.mrb[110].mxu0 }
 0x31c   :  { %v3093_v25 = vadd.f32 %v3092_v14, %v3091_v15  ;;  %v3094_v17 = vpop.f32.mrb[110].mxu1  ;;  %v2983_v12 = vpop.f32.mrb[111].mxu0 }
 0x31d   :  { %v2281_v16 = vadd.f32 %v2981_v48, %v4952_v24  ;;  %v2984_v35 = vadd.f32 %v2983_v12, %v2982_v4  ;;  %v3095_v59 = vpop.f32.mrb[111].mxu1 }
 0x31e   :  { %v3096_v1 = vadd.f32 %v3095_v59, %v3094_v17 }
 0x31f   :  { %v2442_v51 = vadd.f32 %v3093_v25, %v2281_v16  ;;  %v2284_v19 = vadd.f32 %v2984_v35, %v4952_v24 }
 0x321   :  { %v2445_v44 = vadd.f32 %v3096_v1, %v2284_v19 }
 0x323   :  { %v2860_v53 = vpack.c.bf16 %v2445_v44, %v2442_v51 }
 0x325   :  { %2892 = vst [vmem:[#allocation8 + $0x58] sm:$0xff] %v2860_v53  }
 0x329   :  { %v2985_v11 = vpop.f32.mrb[112].mxu0 }
 0x32a   :  { %v2986_v38 = vpop.f32.mrb[113].mxu0 }
 0x32b   :  { %v3097_v7 = vpop.f32.mrb[112].mxu1  ;;  %v2987_v29 = vadd.f32 %v2986_v38, %v2985_v11  ;;  %v2988_v63 = vpop.f32.mrb[114].mxu0 }
 0x32c   :  { %v3098_v61 = vpop.f32.mrb[113].mxu1  ;;  %v2989_v18 = vpop.f32.mrb[115].mxu0 }
 0x32d   :  { %v2289_v43 = vadd.f32 %v2987_v29, %v4952_v24  ;;  %v3099_v37 = vadd.f32 %v3098_v61, %v3097_v7  ;;  %v3100_v49 = vpop.f32.mrb[114].mxu1  ;;  %v2990_v32 = vadd.f32 %v2989_v18, %v2988_v63 }
 0x32e   :  { %v3101_v10 = vpop.f32.mrb[115].mxu1 }
 0x32f   :  { %v2450_v21 = vadd.f32 %v3099_v37, %v2289_v43  ;;  %v2292_v3 = vadd.f32 %v2990_v32, %v4952_v24  ;;  %v3102_v23 = vadd.f32 %v3101_v10, %v3100_v49 }
 0x331   :  { %v2453_v34 = vadd.f32 %v3102_v23, %v2292_v3  ;;  %v2991_v54 = vpop.f32.mrb[116].mxu0 }
 0x332   :  { %v2992_v9 = vpop.f32.mrb[117].mxu0 }
 0x333   :  { %v2865_v30 = vpack.c.bf16 %v2453_v34, %v2450_v21  ;;  %v3103_v5 = vpop.f32.mrb[116].mxu1  ;;  %v2993_v27 = vadd.f32 %v2992_v9, %v2991_v54  ;;  %v2994_v31 = vpop.f32.mrb[118].mxu0 }
 0x334   :  { %v3104_v52 = vpop.f32.mrb[117].mxu1  ;;  %v2995_v26 = vpop.f32.mrb[119].mxu0 }
 0x335   :  { %2893 = vst [vmem:[#allocation8 + $0x60] sm:$0xff] %v2865_v30   ;;  %v2297_v55 = vadd.f32 %v2993_v27, %v4952_v24  ;;  %v3105_v56 = vadd.f32 %v3104_v52, %v3103_v5  ;;  %v3106_v2 = vpop.f32.mrb[118].mxu1  ;;  %v2996_v42 = vadd.f32 %v2995_v26, %v2994_v31 }
 0x336   :  { %v3107_v39 = vpop.f32.mrb[119].mxu1 }
 0x337   :  { %v2458_v13 = vadd.f32 %v3105_v56, %v2297_v55  ;;  %v2300_v45 = vadd.f32 %v2996_v42, %v4952_v24  ;;  %v3108_v6 = vadd.f32 %v3107_v39, %v3106_v2 }
 0x339   :  { %v2461_v60 = vadd.f32 %v3108_v6, %v2300_v45  ;;  %v2997_v36 = vpop.f32.mrb[120].mxu0 }
 0x33a   :  { %v2998_v0 = vpop.f32.mrb[121].mxu0 }
 0x33b   :  { %v2870_v46 = vpack.c.bf16 %v2461_v60, %v2458_v13  ;;  %v3109_v40 = vpop.f32.mrb[120].mxu1  ;;  %v2999_v20 = vadd.f32 %v2998_v0, %v2997_v36  ;;  %v3000_v50 = vpop.f32.mrb[122].mxu0 }
 0x33c   :  { %v3110_v57 = vpop.f32.mrb[121].mxu1  ;;  %v3001_v28 = vpop.f32.mrb[123].mxu0 }
 0x33d   :  { %2894 = vst [vmem:[#allocation8 + $0x68] sm:$0xff] %v2870_v46   ;;  %v2305_v58 = vadd.f32 %v2999_v20, %v4952_v24  ;;  %v3111_v41 = vadd.f32 %v3110_v57, %v3109_v40  ;;  %v3112_v33 = vpop.f32.mrb[122].mxu1  ;;  %v3002_v8 = vadd.f32 %v3001_v28, %v3000_v50 }
 0x33e   :  { %v3113_v22 = vpop.f32.mrb[123].mxu1 }
 0x33f   :  { %v2466_v47 = vadd.f32 %v3111_v41, %v2305_v58  ;;  %v2308_v15 = vadd.f32 %v3002_v8, %v4952_v24  ;;  %v3114_v62 = vadd.f32 %v3113_v22, %v3112_v33 }
 0x341   :  { %v2469_v48 = vadd.f32 %v3114_v62, %v2308_v15  ;;  %v3003_v14 = vpop.f32.mrb[124].mxu0 }
 0x342   :  { %v3004_v4 = vpop.f32.mrb[125].mxu0 }
 0x343   :  { %v2875_v25 = vpack.c.bf16 %v2469_v48, %v2466_v47  ;;  %v3115_v17 = vpop.f32.mrb[124].mxu1  ;;  %v3005_v12 = vadd.f32 %v3004_v4, %v3003_v14  ;;  %v3006_v16 = vpop.f32.mrb[126].mxu0 }
 0x344   :  { %v3116_v35 = vpop.f32.mrb[125].mxu1  ;;  %v3007_v59 = vpop.f32.mrb[127].mxu0 }
 0x345   :  { %2895 = vst [vmem:[#allocation8 + $0x70] sm:$0xff] %v2875_v25   ;;  %v2313_v1 = vadd.f32 %v3005_v12, %v4952_v24  ;;  %v3117_v51 = vadd.f32 %v3116_v35, %v3115_v17  ;;  %v3118_v19 = vpop.f32.mrb[126].mxu1  ;;  %v3008_v44 = vadd.f32 %v3007_v59, %v3006_v16 }
 0x346   :  { %v3119_v53 = vpop.f32.mrb[127].mxu1 }
 0x347   :  { %v2474_v11 = vadd.f32 %v3117_v51, %v2313_v1  ;;  %v2316_v38 = vadd.f32 %v3008_v44, %v4952_v24  ;;  %v3120_v7 = vadd.f32 %v3119_v53, %v3118_v19 }
 0x349   :  { %v2477_v29 = vadd.f32 %v3120_v7, %v2316_v38 }
 0x34b   :  { %v2880_v63 = vpack.c.bf16 %v2477_v29, %v2474_v11 }
 0x34d   :  { %2896 = vst [vmem:[#allocation8 + $0x78] sm:$0xff] %v2880_v63  }
 0x34e   :  { %3559 = shalt.err (!%p3556_p0)
}
 0x34f   :  { %s3560_s12 = scalar_lea.hbm %s5012_s5, 2048 }
 0x350   :  { %p3561_p1 = scmp.ne.s32.totalorder %s5012_s5, %s3560_s12  ;;  %p3564_p2 = scmp.lt.u32.totalorder %s3560_s12, %s5012_s5 }
 0x352   :  { %p3566_p3 = pnand %p3564_p2, %p3561_p1 }
 0x354   :  { %3569 = shalt.err (!%p3566_p3)
}
 0x355   :  { %2651 = dma.vmem_to_hbm [thread:$0]  %s2646_s8, 2048, %s5012_s5, [#allocation4], %s3580_s1, %s3580_s1, %s3581_s17  }
 0x356   :  { %3574 = dma.done.wait [#allocation4], 2048  }
 0x357   :  { %3575 = vsyncadd [#allocation4], 4294965248 }
 0x358   :  { %2655 = vsyncpa [#allocation3], 1 }
 0x359   :  { %2656 = vsyncpa [#allocation6], 1 }
 0x35a   :  { %2657 = vsyncpa [#allocation4], 1 }

</bundles_post_ra>
